<compile_context>
chip_gen: v5e
topology: v5e:2x2
jax: 0.10.0
libtpu: 0.0.40
codegen_flags: <defaults>
</compile_context>

<pallas_src>
import functools

import jax
import jax.numpy as jnp
from jax import lax
from jax.experimental import pallas as pl
from jax.experimental.pallas import tpu as pltpu


# ----------------------------------------------------------------------------
# helpers
# ----------------------------------------------------------------------------
def _pick_tile(n, candidates):
    """Largest TPU-aligned candidate dividing n, else the full extent."""
    for c in candidates:
        if n >= c and n % c == 0:
            return c
    return n


def _cparams(*sem):
    return pltpu.CompilerParams(
        dimension_semantics=sem,
        vmem_limit_bytes=64 * 1024 * 1024,
    )


# ----------------------------------------------------------------------------
# Pallas kernels
# ----------------------------------------------------------------------------
def _conv1x1_nchw_kernel(x_ref, *refs, n_out, mm_dtype):
    # Fused 1x1 convs, NCHW-direct.  x: (1, C, TN); refs = (w_0, b_0, ...,
    # w_{k-1}, b_{k-1}, o_0, ..., o_{k-1}); w_i: (Cout, C), b_i: (Cout, 1),
    # o_i: (1, Cout, TN).  One HBM read of the x tile feeds all outputs.
    x = x_ref[0].astype(mm_dtype)                               # (C, TN)
    outs = refs[2 * n_out:]
    for i in range(n_out):
        w = refs[2 * i][...].astype(mm_dtype)                   # (Cout, C)
        b = refs[2 * i + 1][...]                                # (Cout, 1) f32
        y = jnp.dot(w, x, preferred_element_type=jnp.float32)   # (Cout, TN)
        outs[i][0] = (y + b).astype(outs[i].dtype)


def _pool_phi_gi_kernel(x_ref, se_ref, so_ref, wp_ref, bp_ref, wg_ref, bg_ref,
                        op_ref, og_ref, *, tho, mm_dtype):
    # Fused MaxPool2d(2, stride=2) + phi & gi 1x1 convs, NCHW-direct.
    #   x: (1, C, 2*tho, W)         -- 2*tho full-resolution input rows
    #   se/so: (W, Wo)              -- 0/1 matrices selecting even/odd columns
    #   wp/wg: (Cq, C), bp/bg: (Cq, 1)
    #   op/og: (1, Cq, tho, Wo)
    # The W-direction pair-max is expressed as max(rm @ se, rm @ so): an exact
    # (0/1 weights) lane-friendly stride-2 gather that avoids lane-strided ops.
    se = se_ref[...]
    so = so_ref[...]
    wp = wp_ref[...].astype(mm_dtype)
    wg = wg_ref[...].astype(mm_dtype)
    bp = bp_ref[...]
    bg = bg_ref[...]
    for t in range(tho):                                        # static unroll
        r0 = x_ref[0, :, 2 * t, :]                              # (C, W)
        r1 = x_ref[0, :, 2 * t + 1, :]                          # (C, W)
        rm = jnp.maximum(r0, r1).astype(mm_dtype)               # row-pair max
        pooled = jnp.maximum(
            jnp.dot(rm, se, preferred_element_type=jnp.float32),
            jnp.dot(rm, so, preferred_element_type=jnp.float32),
        ).astype(mm_dtype)                                      # (C, Wo)
        yp = jnp.dot(wp, pooled, preferred_element_type=jnp.float32) + bp
        yg = jnp.dot(wg, pooled, preferred_element_type=jnp.float32) + bg
        op_ref[0, :, t, :] = yp.astype(op_ref.dtype)
        og_ref[0, :, t, :] = yg.astype(og_ref.dtype)


def _attn_kernel(th_ref, ph_ref, gi_ref, o_ref, m_sc, l_sc, acc_sc, *, mm_dtype):
    # Flash-style non-local attention, tiled over KV (M) blocks.
    #   th: (1, Cq, TQ), ph/gi: (1, Cq, TM)  (channel-major) -> o: (1, TQ, Cq)
    # Running max / denom / accumulator persist in VMEM scratch across the
    # trailing "arbitrary" M axis; output written only on the last M step.
    # Softmax math stays f32; matmuls take mm_dtype inputs with f32 accumulate.
    mi = pl.program_id(2)

    @pl.when(mi == 0)
    def _():
        m_sc[...] = jnp.full_like(m_sc, -jnp.inf)
        l_sc[...] = jnp.zeros_like(l_sc)
        acc_sc[...] = jnp.zeros_like(acc_sc)

    th = th_ref[0].astype(mm_dtype)                             # (Cq, TQ)
    ph = ph_ref[0].astype(mm_dtype)                             # (Cq, TM)
    # s[q, m] = sum_c th[c, q] * ph[c, m]   (contract Cq: dim 0 of both)
    s = lax.dot_general(th, ph, (((0,), (0,)), ((), ())),
                        preferred_element_type=jnp.float32)     # (TQ, TM)

    m_prev = m_sc[...]
    m_new = jnp.maximum(m_prev, jnp.max(s, axis=-1, keepdims=True))
    alpha = jnp.exp(m_prev - m_new)                             # (TQ, 1)
    p = jnp.exp(s - m_new)                                      # (TQ, TM) f32
    l_sc[...] = alpha * l_sc[...] + jnp.sum(p, axis=-1, keepdims=True)
    # acc[q, c] += sum_m p[q, m] * gi[c, m]
    pv = lax.dot_general(p.astype(mm_dtype), gi_ref[0].astype(mm_dtype),
                         (((1,), (1,)), ((), ())),
                         preferred_element_type=jnp.float32)    # (TQ, Cq)
    acc_sc[...] = alpha * acc_sc[...] + pv
    m_sc[...] = m_new

    @pl.when(mi == pl.num_programs(2) - 1)
    def _():
        # Softmax normalization folded into the output scale (EUP reciprocal).
        o_ref[0] = (acc_sc[...] * pl.reciprocal(l_sc[...], approx=True)
                    ).astype(o_ref.dtype)


def _wz_residual_kernel(m_ref, r_ref, w_ref, b_ref, o_ref, *, mm_dtype):
    # Wz 1x1 conv + bias + residual, NCHW-direct (lane-dense output stores).
    #   m: (1, Cq, TN), r: (1, C, TN) f32, w: (C, Cq), b: (C, 1) -> o: (1, C, TN)
    y = jnp.dot(w_ref[...].astype(mm_dtype), m_ref[0].astype(mm_dtype),
                preferred_element_type=jnp.float32)             # (C, TN)
    o_ref[0] = (y + b_ref[...] + r_ref[0]).astype(o_ref.dtype)


# ----------------------------------------------------------------------------
# pallas_call wrappers
# ----------------------------------------------------------------------------
def conv1x1_nchw(x_bcn, weights, biases, *, out_dtype, mm_dtype):
    """len(weights) fused 1x1 convs over x (B, C, N), outputs (B, Cout_i, N)."""
    B, C, N = x_bcn.shape
    n_out = len(weights)
    tn = _pick_tile(N, (2048, 1024, 512, 256, 128))
    args = [x_bcn]
    wb_specs = []
    for w, b in zip(weights, biases):
        cout = w.shape[0]
        wb_specs += [pl.BlockSpec((cout, C), lambda b_, j: (0, 0)),
                     pl.BlockSpec((cout, 1), lambda b_, j: (0, 0))]
        args += [w, b.reshape(cout, 1)]
    out_shapes = tuple(jax.ShapeDtypeStruct((B, w.shape[0], N), out_dtype)
                       for w in weights)
    out_specs = tuple(pl.BlockSpec((1, w.shape[0], tn), lambda b_, j: (b_, 0, j))
                      for w in weights)
    return pl.pallas_call(
        functools.partial(_conv1x1_nchw_kernel, n_out=n_out, mm_dtype=mm_dtype),
        out_shape=out_shapes,
        grid=(B, N // tn),
        in_specs=[pl.BlockSpec((1, C, tn), lambda b_, j: (b_, 0, j))] + wb_specs,
        out_specs=out_specs,
        compiler_params=_cparams("parallel", "parallel"),
    )(*args)


def pool_phi_gi_fused(x, w_phi, b_phi, w_gi, b_gi, *, out_dtype, mm_dtype):
    """MaxPool2d(2, stride=2) fused with the phi & gi 1x1 convs (one x read)."""
    B, C, H, W = x.shape
    Cq = w_phi.shape[0]
    Ho, Wo = H // 2, W // 2
    tho = 8 if Ho % 8 == 0 else Ho
    cols = jnp.arange(W, dtype=jnp.int32)[:, None]
    sel = 2 * jnp.arange(Wo, dtype=jnp.int32)[None, :]
    s_even = (cols == sel).astype(mm_dtype)                     # (W, Wo)
    s_odd = (cols == sel + 1).astype(mm_dtype)
    phi, gi = pl.pallas_call(
        functools.partial(_pool_phi_gi_kernel, tho=tho, mm_dtype=mm_dtype),
        out_shape=(jax.ShapeDtypeStruct((B, Cq, Ho, Wo), out_dtype),
                   jax.ShapeDtypeStruct((B, Cq, Ho, Wo), out_dtype)),
        grid=(B, Ho // tho),
        in_specs=[
            pl.BlockSpec((1, C, 2 * tho, W), lambda b, h: (b, 0, h, 0)),
            pl.BlockSpec((W, Wo), lambda b, h: (0, 0)),
            pl.BlockSpec((W, Wo), lambda b, h: (0, 0)),
            pl.BlockSpec((Cq, C), lambda b, h: (0, 0)),
            pl.BlockSpec((Cq, 1), lambda b, h: (0, 0)),
            pl.BlockSpec((Cq, C), lambda b, h: (0, 0)),
            pl.BlockSpec((Cq, 1), lambda b, h: (0, 0)),
        ],
        out_specs=(pl.BlockSpec((1, Cq, tho, Wo), lambda b, h: (b, 0, h, 0)),
                   pl.BlockSpec((1, Cq, tho, Wo), lambda b, h: (b, 0, h, 0))),
        compiler_params=_cparams("parallel", "parallel"),
    )(x, s_even, s_odd, w_phi, b_phi.reshape(Cq, 1), w_gi, b_gi.reshape(Cq, 1))
    return phi.reshape(B, Cq, Ho * Wo), gi.reshape(B, Cq, Ho * Wo)


def nonlocal_attention(theta_bcn, phi_bcm, gi_bcm, *, out_dtype, mm_dtype):
    """m2 = softmax(theta1 @ pi1, dim=2) @ gi1, flash-tiled over (B, Q, M)."""
    B, Cq, N = theta_bcn.shape
    M = phi_bcm.shape[2]
    tq = _pick_tile(N, (256, 128))
    tm = _pick_tile(M, (512, 256, 128))
    isz = jnp.dtype(theta_bcn.dtype).itemsize
    cost = pl.CostEstimate(
        flops=4 * B * N * M * Cq,
        transcendentals=B * N * M,
        bytes_accessed=isz * (B * N * Cq * (M // tm)
                              + 2 * B * M * Cq * (N // tq)
                              + B * N * Cq),
    )
    return pl.pallas_call(
        functools.partial(_attn_kernel, mm_dtype=mm_dtype),
        out_shape=jax.ShapeDtypeStruct((B, N, Cq), out_dtype),
        grid=(B, N // tq, M // tm),
        in_specs=[
            pl.BlockSpec((1, Cq, tq), lambda b, q, m: (b, 0, q)),
            pl.BlockSpec((1, Cq, tm), lambda b, q, m: (b, 0, m)),
            pl.BlockSpec((1, Cq, tm), lambda b, q, m: (b, 0, m)),
        ],
        out_specs=pl.BlockSpec((1, tq, Cq), lambda b, q, m: (b, q, 0)),
        scratch_shapes=[pltpu.VMEM((tq, 1), jnp.float32),
                        pltpu.VMEM((tq, 1), jnp.float32),
                        pltpu.VMEM((tq, Cq), jnp.float32)],
        compiler_params=_cparams("parallel", "parallel", "arbitrary"),
        cost_estimate=cost,
    )(theta_bcn, phi_bcm, gi_bcm)


def conv_wz_residual(m3_bcn, x_bcn, weight, bias, *, mm_dtype):
    """z = Wz(m3) + x, computed directly in NCHW layout."""
    B, Cq, N = m3_bcn.shape
    C = weight.shape[0]
    tn = _pick_tile(N, (2048, 1024, 512, 256, 128))
    # TODO(synk): donate x at the jit boundary to re-enable output aliasing of
    # the residual buffer; a non-donated input made the alias a defensive copy.
    return pl.pallas_call(
        functools.partial(_wz_residual_kernel, mm_dtype=mm_dtype),
        out_shape=jax.ShapeDtypeStruct((B, C, N), jnp.float32),
        grid=(B, N // tn),
        in_specs=[
            pl.BlockSpec((1, Cq, tn), lambda b, j: (b, 0, j)),
            pl.BlockSpec((1, C, tn), lambda b, j: (b, 0, j)),
            pl.BlockSpec((C, Cq), lambda b, j: (0, 0)),
            pl.BlockSpec((C, 1), lambda b, j: (0, 0)),
        ],
        out_specs=pl.BlockSpec((1, C, tn), lambda b, j: (b, 0, j)),
        compiler_params=_cparams("parallel", "parallel"),
    )(m3_bcn, x_bcn, weight, bias.reshape(C, 1))


# ----------------------------------------------------------------------------
# non_local_block forward
# ----------------------------------------------------------------------------
def non_local_block_forward(x, params, down_sample=True, avg_kernel_size=2,
                            matmul_dtype=jnp.bfloat16):
    B, C, H, W = x.shape
    N = H * W
    mm_dtype = jnp.dtype(matmul_dtype)
    inter_dtype = (jnp.bfloat16 if mm_dtype == jnp.dtype(jnp.bfloat16)
                   else jnp.float32)

    x_bcn = x.reshape(B, C, N)                # free row-major view of NCHW x

    if not down_sample:
        # theta / phi / gi share the same input rows: 3-way fused, one x read.
        theta, phi, gi = conv1x1_nchw(
            x_bcn,
            [params["theta_w"], params["phi_w"], params["gi_w"]],
            [params["theta_b"], params["phi_b"], params["gi_b"]],
            out_dtype=inter_dtype, mm_dtype=mm_dtype)
    else:
        (theta,) = conv1x1_nchw(
            x_bcn, [params["theta_w"]], [params["theta_b"]],
            out_dtype=inter_dtype, mm_dtype=mm_dtype)
        k = avg_kernel_size
        Ho = (H - k) // 2 + 1
        Wo = (W - k) // 2 + 1
        M = Ho * Wo
        fused_ok = (k == 2 and Ho >= 1 and Wo >= 1
                    and (Ho % 8 == 0 or (H % 2 == 0 and Ho <= 64)))
        if fused_ok:
            phi, gi = pool_phi_gi_fused(
                x, params["phi_w"], params["phi_b"],
                params["gi_w"], params["gi_b"],
                out_dtype=inter_dtype, mm_dtype=mm_dtype)
        else:
            # TODO(synk): overlapping-window max-pool (kernel_size != 2) is
            # left to lax.reduce_window; BlockSpecs can't express it cleanly.
            xp = lax.reduce_window(
                x, -jnp.inf, lax.max,
                window_dimensions=(1, 1, k, k),
                window_strides=(1, 1, 2, 2), padding="VALID")
            phi, gi = conv1x1_nchw(
                xp.reshape(B, C, M),
                [params["phi_w"], params["gi_w"]],
                [params["phi_b"], params["gi_b"]],
                out_dtype=inter_dtype, mm_dtype=mm_dtype)

    # m1 = softmax(theta1 @ pi1, dim=2); m2 = m1 @ gi1   (one flash kernel)
    m2 = nonlocal_attention(theta, phi, gi,
                            out_dtype=inter_dtype, mm_dtype=mm_dtype)  # (B,N,Cq)

    # torch: m3 = m2.view(B, Cq, H, -1) -- raw row-major reinterpretation
    # (NOT a transpose); reproduced exactly by this free reshape.
    Cq = params["theta_w"].shape[0]
    m3_bcn = m2.reshape(B, Cq, N)

    # m4 = Wz(m3); z = m4 + ox   (fused conv + residual, no exit transpose)
    z_bcn = conv_wz_residual(m3_bcn, x_bcn, params["Wz_w"], params["Wz_b"],
                             mm_dtype=mm_dtype)
    return z_bcn.reshape(B, C, H, W)


# ----------------------------------------------------------------------------
# Deterministic parameter init (kaiming_normal fan_in, like the torch module)
# ----------------------------------------------------------------------------
def init_params(key, in_channels, channel_scale_factor):
    Cq = in_channels // channel_scale_factor

    def kaiming_w(k, cout, cin):
        std = (2.0 / cin) ** 0.5  # fan_in = cin * 1 * 1 for a 1x1 conv, a=0
        return std * jax.random.normal(k, (cout, cin), jnp.float32)

    def default_b(k, cout, cin):
        bound = 1.0 / (cin ** 0.5)
        return jax.random.uniform(k, (cout,), jnp.float32, -bound, bound)

    ks = jax.random.split(key, 8)
    return {
        "theta_w": kaiming_w(ks[0], Cq, in_channels),
        "theta_b": default_b(ks[1], Cq, in_channels),
        "phi_w": kaiming_w(ks[2], Cq, in_channels),
        "phi_b": default_b(ks[3], Cq, in_channels),
        "gi_w": kaiming_w(ks[4], Cq, in_channels),
        "gi_b": default_b(ks[5], Cq, in_channels),
        "Wz_w": kaiming_w(ks[6], in_channels, Cq),
        "Wz_b": default_b(ks[7], in_channels, Cq),
    }


if __name__ == "__main__":
    in_channels = 4
    channel_scale_factor = 2
    avg_kernel_size = 2
    B, H, W = 2, 16, 16

    key = jax.random.PRNGKey(0)
    kx, kp = jax.random.split(key)
    x = jax.random.normal(kx, (B, in_channels, H, W), jnp.float32)
    params = init_params(kp, in_channels, channel_scale_factor)

    fwd = jax.jit(
        lambda xx: non_local_block_forward(
            xx, params, down_sample=True, avg_kernel_size=avg_kernel_size
        )
    )
    z = fwd(x)
    jax.block_until_ready(z)
    assert z.shape == (B, in_channels, H, W)
    assert z.dtype == jnp.float32
    assert bool(jnp.all(jnp.isfinite(z)))
    print("KERNEL_OK")
</pallas_src>

<mosaic_0001>
module attributes {stable_mosaic.version = 11 : i64} {
  func.func @_conv1x1_nchw_kernel(%arg0: i32, %arg1: i32, %arg2: memref<1x4x256xf32, #tpu.memory_space<vmem>>, %arg3: memref<2x4xf32, #tpu.memory_space<vmem>>, %arg4: memref<2x1xf32, #tpu.memory_space<vmem>>, %arg5: memref<1x2x256xbf16, #tpu.memory_space<vmem>>) attributes {dimension_semantics = [#tpu.dimension_semantics<parallel>, #tpu.dimension_semantics<parallel>], iteration_bounds = array<i64: 2, 1>, scalar_prefetch = 0 : i64, scratch_operands = 0 : i64, tpu.core_type = #tpu.core_type<tc>, window_params = [{transform_indices = @transform_0, window_bounds = array<i64: 1, 4, 256>}, {pipeline_mode = #tpu.pipeline_mode<synchronous>, transform_indices = @transform_1, window_bounds = array<i64: 2, 4>}, {pipeline_mode = #tpu.pipeline_mode<synchronous>, transform_indices = @transform_2, window_bounds = array<i64: 2, 1>}, {transform_indices = @transform_3, window_bounds = array<i64: 1, 2, 256>}]} {
    %c0 = arith.constant 0 : index
    %c0_0 = arith.constant 0 : index
    %c0_1 = arith.constant 0 : index
    %0 = vector.load %arg2[%c0, %c0_0, %c0_1] : memref<1x4x256xf32, #tpu.memory_space<vmem>>, vector<1x4x256xf32>
    %1 = vector.shape_cast %0 : vector<1x4x256xf32> to vector<4x256xf32>
    %2 = arith.truncf %1 : vector<4x256xf32> to vector<4x256xbf16>
    %c0_2 = arith.constant 0 : index
    %c0_3 = arith.constant 0 : index
    %3 = vector.load %arg3[%c0_2, %c0_3] : memref<2x4xf32, #tpu.memory_space<vmem>>, vector<2x4xf32>
    %4 = arith.truncf %3 : vector<2x4xf32> to vector<2x4xbf16>
    %c0_4 = arith.constant 0 : index
    %c0_5 = arith.constant 0 : index
    %5 = vector.load %arg4[%c0_4, %c0_5] : memref<2x1xf32, #tpu.memory_space<vmem>>, vector<2x1xf32>
    %cst = arith.constant dense<0.000000e+00> : vector<2x256xf32>
    %6 = tpu.matmul %4, %2, %cst {dimension_numbers = #tpu.dot_dimension_numbers<[1], [0], [0], [1], [0, 0, 1, 1], [], []>} : vector<2x4xbf16>, vector<4x256xbf16>, vector<2x256xf32> -> vector<2x256xf32>
    %7 = vector.broadcast %5 : vector<2x1xf32> to vector<2x256xf32>
    %8 = arith.addf %6, %7 : vector<2x256xf32>
    %9 = arith.truncf %8 : vector<2x256xf32> to vector<2x256xbf16>
    %c0_6 = arith.constant 0 : index
    %c0_7 = arith.constant 0 : index
    %c0_8 = arith.constant 0 : index
    %10 = vector.load %arg5[%c0_6, %c0_7, %c0_8] : memref<1x2x256xbf16, #tpu.memory_space<vmem>>, vector<1x2x256xbf16>
    %11 = vector.shape_cast %10 : vector<1x2x256xbf16> to vector<2x256xbf16>
    %12 = vector.shape_cast %9 : vector<2x256xbf16> to vector<1x2x256xbf16>
    tpu.vector_store %arg5[%c0_6, %c0_7, %c0_8], %12 {strides = array<i32>} : memref<1x2x256xbf16, #tpu.memory_space<vmem>>, vector<1x2x256xbf16>,
    return
  }
  func.func @transform_0(%arg0: i32, %arg1: i32) -> (i32, i32, i32) {
    %c0_i32 = arith.constant 0 : i32
    %c0_i32_0 = arith.constant 0 : i32
    return %arg0, %c0_i32, %arg1 : i32, i32, i32
  }
  func.func @transform_1(%arg0: i32, %arg1: i32) -> (i32, i32) {
    %c0_i32 = arith.constant 0 : i32
    %c0_i32_0 = arith.constant 0 : i32
    %c0_i32_1 = arith.constant 0 : i32
    return %c0_i32, %c0_i32_0 : i32, i32
  }
  func.func @transform_2(%arg0: i32, %arg1: i32) -> (i32, i32) {
    %c0_i32 = arith.constant 0 : i32
    %c0_i32_0 = arith.constant 0 : i32
    %c0_i32_1 = arith.constant 0 : i32
    return %c0_i32, %c0_i32_0 : i32, i32
  }
  func.func @transform_3(%arg0: i32, %arg1: i32) -> (i32, i32, i32) {
    %c0_i32 = arith.constant 0 : i32
    %c0_i32_0 = arith.constant 0 : i32
    return %arg0, %c0_i32, %arg1 : i32, i32, i32
  }
}

module attributes {stable_mosaic.version = 11 : i64} {
  func.func @_pool_phi_gi_kernel(%arg0: i32, %arg1: i32, %arg2: memref<1x4x16x16xf32, #tpu.memory_space<vmem>>, %arg3: memref<16x8xbf16, #tpu.memory_space<vmem>>, %arg4: memref<16x8xbf16, #tpu.memory_space<vmem>>, %arg5: memref<2x4xf32, #tpu.memory_space<vmem>>, %arg6: memref<2x1xf32, #tpu.memory_space<vmem>>, %arg7: memref<2x4xf32, #tpu.memory_space<vmem>>, %arg8: memref<2x1xf32, #tpu.memory_space<vmem>>, %arg9: memref<1x2x8x8xbf16, #tpu.memory_space<vmem>>, %arg10: memref<1x2x8x8xbf16, #tpu.memory_space<vmem>>) attributes {dimension_semantics = [#tpu.dimension_semantics<parallel>, #tpu.dimension_semantics<parallel>], iteration_bounds = array<i64: 2, 1>, scalar_prefetch = 0 : i64, scratch_operands = 0 : i64, tpu.core_type = #tpu.core_type<tc>, window_params = [{transform_indices = @transform_0, window_bounds = array<i64: 1, 4, 16, 16>}, {pipeline_mode = #tpu.pipeline_mode<synchronous>, transform_indices = @transform_1, window_bounds = array<i64: 16, 8>}, {pipeline_mode = #tpu.pipeline_mode<synchronous>, transform_indices = @transform_2, window_bounds = array<i64: 16, 8>}, {pipeline_mode = #tpu.pipeline_mode<synchronous>, transform_indices = @transform_3, window_bounds = array<i64: 2, 4>}, {pipeline_mode = #tpu.pipeline_mode<synchronous>, transform_indices = @transform_4, window_bounds = array<i64: 2, 1>}, {pipeline_mode = #tpu.pipeline_mode<synchronous>, transform_indices = @transform_5, window_bounds = array<i64: 2, 4>}, {pipeline_mode = #tpu.pipeline_mode<synchronous>, transform_indices = @transform_6, window_bounds = array<i64: 2, 1>}, {transform_indices = @transform_7, window_bounds = array<i64: 1, 2, 8, 8>}, {transform_indices = @transform_8, window_bounds = array<i64: 1, 2, 8, 8>}]} {
    %c0 = arith.constant 0 : index
    %c0_0 = arith.constant 0 : index
    %0 = vector.load %arg3[%c0, %c0_0] : memref<16x8xbf16, #tpu.memory_space<vmem>>, vector<16x8xbf16>
    %c0_1 = arith.constant 0 : index
    %c0_2 = arith.constant 0 : index
    %1 = vector.load %arg4[%c0_1, %c0_2] : memref<16x8xbf16, #tpu.memory_space<vmem>>, vector<16x8xbf16>
    %c0_3 = arith.constant 0 : index
    %c0_4 = arith.constant 0 : index
    %2 = vector.load %arg5[%c0_3, %c0_4] : memref<2x4xf32, #tpu.memory_space<vmem>>, vector<2x4xf32>
    %3 = arith.truncf %2 : vector<2x4xf32> to vector<2x4xbf16>
    %c0_5 = arith.constant 0 : index
    %c0_6 = arith.constant 0 : index
    %4 = vector.load %arg7[%c0_5, %c0_6] : memref<2x4xf32, #tpu.memory_space<vmem>>, vector<2x4xf32>
    %5 = arith.truncf %4 : vector<2x4xf32> to vector<2x4xbf16>
    %c0_7 = arith.constant 0 : index
    %c0_8 = arith.constant 0 : index
    %6 = vector.load %arg6[%c0_7, %c0_8] : memref<2x1xf32, #tpu.memory_space<vmem>>, vector<2x1xf32>
    %c0_9 = arith.constant 0 : index
    %c0_10 = arith.constant 0 : index
    %7 = vector.load %arg8[%c0_9, %c0_10] : memref<2x1xf32, #tpu.memory_space<vmem>>, vector<2x1xf32>
    %c0_11 = arith.constant 0 : index
    %c0_12 = arith.constant 0 : index
    %c0_13 = arith.constant 0 : index
    %c0_14 = arith.constant 0 : index
    %8 = vector.load %arg2[%c0_11, %c0_12, %c0_13, %c0_14] : memref<1x4x16x16xf32, #tpu.memory_space<vmem>>, vector<1x4x1x16xf32>
    %9 = vector.shape_cast %8 : vector<1x4x1x16xf32> to vector<4x16xf32>
    %c0_15 = arith.constant 0 : index
    %c0_16 = arith.constant 0 : index
    %c1 = arith.constant 1 : index
    %c0_17 = arith.constant 0 : index
    %10 = vector.load %arg2[%c0_15, %c0_16, %c1, %c0_17] : memref<1x4x16x16xf32, #tpu.memory_space<vmem>>, vector<1x4x1x16xf32>
    %11 = vector.shape_cast %10 : vector<1x4x1x16xf32> to vector<4x16xf32>
    %12 = arith.maximumf %9, %11 : vector<4x16xf32>
    %13 = arith.truncf %12 : vector<4x16xf32> to vector<4x16xbf16>
    %cst = arith.constant dense<0.000000e+00> : vector<4x8xf32>
    %14 = tpu.matmul %13, %0, %cst {dimension_numbers = #tpu.dot_dimension_numbers<[1], [0], [0], [1], [0, 0, 1, 1], [], []>} : vector<4x16xbf16>, vector<16x8xbf16>, vector<4x8xf32> -> vector<4x8xf32>
    %cst_18 = arith.constant dense<0.000000e+00> : vector<4x8xf32>
    %15 = tpu.matmul %13, %1, %cst_18 {dimension_numbers = #tpu.dot_dimension_numbers<[1], [0], [0], [1], [0, 0, 1, 1], [], []>} : vector<4x16xbf16>, vector<16x8xbf16>, vector<4x8xf32> -> vector<4x8xf32>
    %16 = arith.maximumf %14, %15 : vector<4x8xf32>
    %17 = arith.truncf %16 : vector<4x8xf32> to vector<4x8xbf16>
    %cst_19 = arith.constant dense<0.000000e+00> : vector<2x8xf32>
    %18 = tpu.matmul %3, %17, %cst_19 {dimension_numbers = #tpu.dot_dimension_numbers<[1], [0], [0], [1], [0, 0, 1, 1], [], []>} : vector<2x4xbf16>, vector<4x8xbf16>, vector<2x8xf32> -> vector<2x8xf32>
    %19 = vector.broadcast %6 : vector<2x1xf32> to vector<2x8xf32>
    %20 = arith.addf %18, %19 : vector<2x8xf32>
    %cst_20 = arith.constant dense<0.000000e+00> : vector<2x8xf32>
    %21 = tpu.matmul %5, %17, %cst_20 {dimension_numbers = #tpu.dot_dimension_numbers<[1], [0], [0], [1], [0, 0, 1, 1], [], []>} : vector<2x4xbf16>, vector<4x8xbf16>, vector<2x8xf32> -> vector<2x8xf32>
    %22 = vector.broadcast %7 : vector<2x1xf32> to vector<2x8xf32>
    %23 = arith.addf %21, %22 : vector<2x8xf32>
    %24 = arith.truncf %20 : vector<2x8xf32> to vector<2x8xbf16>
    %c0_21 = arith.constant 0 : index
    %c0_22 = arith.constant 0 : index
    %c0_23 = arith.constant 0 : index
    %c0_24 = arith.constant 0 : index
    %25 = vector.load %arg9[%c0_21, %c0_22, %c0_23, %c0_24] : memref<1x2x8x8xbf16, #tpu.memory_space<vmem>>, vector<1x2x1x8xbf16>
    %26 = vector.shape_cast %25 : vector<1x2x1x8xbf16> to vector<2x8xbf16>
    %27 = vector.shape_cast %24 : vector<2x8xbf16> to vector<1x2x1x8xbf16>
    tpu.vector_store %arg9[%c0_21, %c0_22, %c0_23, %c0_24], %27 {strides = array<i32>} : memref<1x2x8x8xbf16, #tpu.memory_space<vmem>>, vector<1x2x1x8xbf16>,
    %28 = arith.truncf %23 : vector<2x8xf32> to vector<2x8xbf16>
    %c0_25 = arith.constant 0 : index
    %c0_26 = arith.constant 0 : index
    %c0_27 = arith.constant 0 : index
    %c0_28 = arith.constant 0 : index
    %29 = vector.load %arg10[%c0_25, %c0_26, %c0_27, %c0_28] : memref<1x2x8x8xbf16, #tpu.memory_space<vmem>>, vector<1x2x1x8xbf16>
    %30 = vector.shape_cast %29 : vector<1x2x1x8xbf16> to vector<2x8xbf16>
    %31 = vector.shape_cast %28 : vector<2x8xbf16> to vector<1x2x1x8xbf16>
    tpu.vector_store %arg10[%c0_25, %c0_26, %c0_27, %c0_28], %31 {strides = array<i32>} : memref<1x2x8x8xbf16, #tpu.memory_space<vmem>>, vector<1x2x1x8xbf16>,
    %c0_29 = arith.constant 0 : index
    %c0_30 = arith.constant 0 : index
    %c2 = arith.constant 2 : index
    %c0_31 = arith.constant 0 : index
    %32 = vector.load %arg2[%c0_29, %c0_30, %c2, %c0_31] : memref<1x4x16x16xf32, #tpu.memory_space<vmem>>, vector<1x4x1x16xf32>
    %33 = vector.shape_cast %32 : vector<1x4x1x16xf32> to vector<4x16xf32>
    %c0_32 = arith.constant 0 : index
    %c0_33 = arith.constant 0 : index
    %c3 = arith.constant 3 : index
    %c0_34 = arith.constant 0 : index
    %34 = vector.load %arg2[%c0_32, %c0_33, %c3, %c0_34] : memref<1x4x16x16xf32, #tpu.memory_space<vmem>>, vector<1x4x1x16xf32>
    %35 = vector.shape_cast %34 : vector<1x4x1x16xf32> to vector<4x16xf32>
    %36 = arith.maximumf %33, %35 : vector<4x16xf32>
    %37 = arith.truncf %36 : vector<4x16xf32> to vector<4x16xbf16>
    %cst_35 = arith.constant dense<0.000000e+00> : vector<4x8xf32>
    %38 = tpu.matmul %37, %0, %cst_35 {dimension_numbers = #tpu.dot_dimension_numbers<[1], [0], [0], [1], [0, 0, 1, 1], [], []>} : vector<4x16xbf16>, vector<16x8xbf16>, vector<4x8xf32> -> vector<4x8xf32>
    %cst_36 = arith.constant dense<0.000000e+00> : vector<4x8xf32>
    %39 = tpu.matmul %37, %1, %cst_36 {dimension_numbers = #tpu.dot_dimension_numbers<[1], [0], [0], [1], [0, 0, 1, 1], [], []>} : vector<4x16xbf16>, vector<16x8xbf16>, vector<4x8xf32> -> vector<4x8xf32>
    %40 = arith.maximumf %38, %39 : vector<4x8xf32>
    %41 = arith.truncf %40 : vector<4x8xf32> to vector<4x8xbf16>
    %cst_37 = arith.constant dense<0.000000e+00> : vector<2x8xf32>
    %42 = tpu.matmul %3, %41, %cst_37 {dimension_numbers = #tpu.dot_dimension_numbers<[1], [0], [0], [1], [0, 0, 1, 1], [], []>} : vector<2x4xbf16>, vector<4x8xbf16>, vector<2x8xf32> -> vector<2x8xf32>
    %43 = vector.broadcast %6 : vector<2x1xf32> to vector<2x8xf32>
    %44 = arith.addf %42, %43 : vector<2x8xf32>
    %cst_38 = arith.constant dense<0.000000e+00> : vector<2x8xf32>
    %45 = tpu.matmul %5, %41, %cst_38 {dimension_numbers = #tpu.dot_dimension_numbers<[1], [0], [0], [1], [0, 0, 1, 1], [], []>} : vector<2x4xbf16>, vector<4x8xbf16>, vector<2x8xf32> -> vector<2x8xf32>
    %46 = vector.broadcast %7 : vector<2x1xf32> to vector<2x8xf32>
    %47 = arith.addf %45, %46 : vector<2x8xf32>
    %48 = arith.truncf %44 : vector<2x8xf32> to vector<2x8xbf16>
    %c0_39 = arith.constant 0 : index
    %c0_40 = arith.constant 0 : index
    %c1_41 = arith.constant 1 : index
    %c0_42 = arith.constant 0 : index
    %49 = vector.load %arg9[%c0_39, %c0_40, %c1_41, %c0_42] : memref<1x2x8x8xbf16, #tpu.memory_space<vmem>>, vector<1x2x1x8xbf16>
    %50 = vector.shape_cast %49 : vector<1x2x1x8xbf16> to vector<2x8xbf16>
    %51 = vector.shape_cast %48 : vector<2x8xbf16> to vector<1x2x1x8xbf16>
    tpu.vector_store %arg9[%c0_39, %c0_40, %c1_41, %c0_42], %51 {strides = array<i32>} : memref<1x2x8x8xbf16, #tpu.memory_space<vmem>>, vector<1x2x1x8xbf16>,
    %52 = arith.truncf %47 : vector<2x8xf32> to vector<2x8xbf16>
    %c0_43 = arith.constant 0 : index
    %c0_44 = arith.constant 0 : index
    %c1_45 = arith.constant 1 : index
    %c0_46 = arith.constant 0 : index
    %53 = vector.load %arg10[%c0_43, %c0_44, %c1_45, %c0_46] : memref<1x2x8x8xbf16, #tpu.memory_space<vmem>>, vector<1x2x1x8xbf16>
    %54 = vector.shape_cast %53 : vector<1x2x1x8xbf16> to vector<2x8xbf16>
    %55 = vector.shape_cast %52 : vector<2x8xbf16> to vector<1x2x1x8xbf16>
    tpu.vector_store %arg10[%c0_43, %c0_44, %c1_45, %c0_46], %55 {strides = array<i32>} : memref<1x2x8x8xbf16, #tpu.memory_space<vmem>>, vector<1x2x1x8xbf16>,
    %c0_47 = arith.constant 0 : index
    %c0_48 = arith.constant 0 : index
    %c4 = arith.constant 4 : index
    %c0_49 = arith.constant 0 : index
    %56 = vector.load %arg2[%c0_47, %c0_48, %c4, %c0_49] : memref<1x4x16x16xf32, #tpu.memory_space<vmem>>, vector<1x4x1x16xf32>
    %57 = vector.shape_cast %56 : vector<1x4x1x16xf32> to vector<4x16xf32>
    %c0_50 = arith.constant 0 : index
    %c0_51 = arith.constant 0 : index
    %c5 = arith.constant 5 : index
    %c0_52 = arith.constant 0 : index
    %58 = vector.load %arg2[%c0_50, %c0_51, %c5, %c0_52] : memref<1x4x16x16xf32, #tpu.memory_space<vmem>>, vector<1x4x1x16xf32>
    %59 = vector.shape_cast %58 : vector<1x4x1x16xf32> to vector<4x16xf32>
    %60 = arith.maximumf %57, %59 : vector<4x16xf32>
    %61 = arith.truncf %60 : vector<4x16xf32> to vector<4x16xbf16>
    %cst_53 = arith.constant dense<0.000000e+00> : vector<4x8xf32>
    %62 = tpu.matmul %61, %0, %cst_53 {dimension_numbers = #tpu.dot_dimension_numbers<[1], [0], [0], [1], [0, 0, 1, 1], [], []>} : vector<4x16xbf16>, vector<16x8xbf16>, vector<4x8xf32> -> vector<4x8xf32>
    %cst_54 = arith.constant dense<0.000000e+00> : vector<4x8xf32>
    %63 = tpu.matmul %61, %1, %cst_54 {dimension_numbers = #tpu.dot_dimension_numbers<[1], [0], [0], [1], [0, 0, 1, 1], [], []>} : vector<4x16xbf16>, vector<16x8xbf16>, vector<4x8xf32> -> vector<4x8xf32>
    %64 = arith.maximumf %62, %63 : vector<4x8xf32>
    %65 = arith.truncf %64 : vector<4x8xf32> to vector<4x8xbf16>
    %cst_55 = arith.constant dense<0.000000e+00> : vector<2x8xf32>
    %66 = tpu.matmul %3, %65, %cst_55 {dimension_numbers = #tpu.dot_dimension_numbers<[1], [0], [0], [1], [0, 0, 1, 1], [], []>} : vector<2x4xbf16>, vector<4x8xbf16>, vector<2x8xf32> -> vector<2x8xf32>
    %67 = vector.broadcast %6 : vector<2x1xf32> to vector<2x8xf32>
    %68 = arith.addf %66, %67 : vector<2x8xf32>
    %cst_56 = arith.constant dense<0.000000e+00> : vector<2x8xf32>
    %69 = tpu.matmul %5, %65, %cst_56 {dimension_numbers = #tpu.dot_dimension_numbers<[1], [0], [0], [1], [0, 0, 1, 1], [], []>} : vector<2x4xbf16>, vector<4x8xbf16>, vector<2x8xf32> -> vector<2x8xf32>
    %70 = vector.broadcast %7 : vector<2x1xf32> to vector<2x8xf32>
    %71 = arith.addf %69, %70 : vector<2x8xf32>
    %72 = arith.truncf %68 : vector<2x8xf32> to vector<2x8xbf16>
    %c0_57 = arith.constant 0 : index
    %c0_58 = arith.constant 0 : index
    %c2_59 = arith.constant 2 : index
    %c0_60 = arith.constant 0 : index
    %73 = vector.load %arg9[%c0_57, %c0_58, %c2_59, %c0_60] : memref<1x2x8x8xbf16, #tpu.memory_space<vmem>>, vector<1x2x1x8xbf16>
    %74 = vector.shape_cast %73 : vector<1x2x1x8xbf16> to vector<2x8xbf16>
    %75 = vector.shape_cast %72 : vector<2x8xbf16> to vector<1x2x1x8xbf16>
    tpu.vector_store %arg9[%c0_57, %c0_58, %c2_59, %c0_60], %75 {strides = array<i32>} : memref<1x2x8x8xbf16, #tpu.memory_space<vmem>>, vector<1x2x1x8xbf16>,
    %76 = arith.truncf %71 : vector<2x8xf32> to vector<2x8xbf16>
    %c0_61 = arith.constant 0 : index
    %c0_62 = arith.constant 0 : index
    %c2_63 = arith.constant 2 : index
    %c0_64 = arith.constant 0 : index
    %77 = vector.load %arg10[%c0_61, %c0_62, %c2_63, %c0_64] : memref<1x2x8x8xbf16, #tpu.memory_space<vmem>>, vector<1x2x1x8xbf16>
    %78 = vector.shape_cast %77 : vector<1x2x1x8xbf16> to vector<2x8xbf16>
    %79 = vector.shape_cast %76 : vector<2x8xbf16> to vector<1x2x1x8xbf16>
    tpu.vector_store %arg10[%c0_61, %c0_62, %c2_63, %c0_64], %79 {strides = array<i32>} : memref<1x2x8x8xbf16, #tpu.memory_space<vmem>>, vector<1x2x1x8xbf16>,
    %c0_65 = arith.constant 0 : index
    %c0_66 = arith.constant 0 : index
    %c6 = arith.constant 6 : index
    %c0_67 = arith.constant 0 : index
    %80 = vector.load %arg2[%c0_65, %c0_66, %c6, %c0_67] : memref<1x4x16x16xf32, #tpu.memory_space<vmem>>, vector<1x4x1x16xf32>
    %81 = vector.shape_cast %80 : vector<1x4x1x16xf32> to vector<4x16xf32>
    %c0_68 = arith.constant 0 : index
    %c0_69 = arith.constant 0 : index
    %c7 = arith.constant 7 : index
    %c0_70 = arith.constant 0 : index
    %82 = vector.load %arg2[%c0_68, %c0_69, %c7, %c0_70] : memref<1x4x16x16xf32, #tpu.memory_space<vmem>>, vector<1x4x1x16xf32>
    %83 = vector.shape_cast %82 : vector<1x4x1x16xf32> to vector<4x16xf32>
    %84 = arith.maximumf %81, %83 : vector<4x16xf32>
    %85 = arith.truncf %84 : vector<4x16xf32> to vector<4x16xbf16>
    %cst_71 = arith.constant dense<0.000000e+00> : vector<4x8xf32>
    %86 = tpu.matmul %85, %0, %cst_71 {dimension_numbers = #tpu.dot_dimension_numbers<[1], [0], [0], [1], [0, 0, 1, 1], [], []>} : vector<4x16xbf16>, vector<16x8xbf16>, vector<4x8xf32> -> vector<4x8xf32>
    %cst_72 = arith.constant dense<0.000000e+00> : vector<4x8xf32>
    %87 = tpu.matmul %85, %1, %cst_72 {dimension_numbers = #tpu.dot_dimension_numbers<[1], [0], [0], [1], [0, 0, 1, 1], [], []>} : vector<4x16xbf16>, vector<16x8xbf16>, vector<4x8xf32> -> vector<4x8xf32>
    %88 = arith.maximumf %86, %87 : vector<4x8xf32>
    %89 = arith.truncf %88 : vector<4x8xf32> to vector<4x8xbf16>
    %cst_73 = arith.constant dense<0.000000e+00> : vector<2x8xf32>
    %90 = tpu.matmul %3, %89, %cst_73 {dimension_numbers = #tpu.dot_dimension_numbers<[1], [0], [0], [1], [0, 0, 1, 1], [], []>} : vector<2x4xbf16>, vector<4x8xbf16>, vector<2x8xf32> -> vector<2x8xf32>
    %91 = vector.broadcast %6 : vector<2x1xf32> to vector<2x8xf32>
    %92 = arith.addf %90, %91 : vector<2x8xf32>
    %cst_74 = arith.constant dense<0.000000e+00> : vector<2x8xf32>
    %93 = tpu.matmul %5, %89, %cst_74 {dimension_numbers = #tpu.dot_dimension_numbers<[1], [0], [0], [1], [0, 0, 1, 1], [], []>} : vector<2x4xbf16>, vector<4x8xbf16>, vector<2x8xf32> -> vector<2x8xf32>
    %94 = vector.broadcast %7 : vector<2x1xf32> to vector<2x8xf32>
    %95 = arith.addf %93, %94 : vector<2x8xf32>
    %96 = arith.truncf %92 : vector<2x8xf32> to vector<2x8xbf16>
    %c0_75 = arith.constant 0 : index
    %c0_76 = arith.constant 0 : index
    %c3_77 = arith.constant 3 : index
    %c0_78 = arith.constant 0 : index
    %97 = vector.load %arg9[%c0_75, %c0_76, %c3_77, %c0_78] : memref<1x2x8x8xbf16, #tpu.memory_space<vmem>>, vector<1x2x1x8xbf16>
    %98 = vector.shape_cast %97 : vector<1x2x1x8xbf16> to vector<2x8xbf16>
    %99 = vector.shape_cast %96 : vector<2x8xbf16> to vector<1x2x1x8xbf16>
    tpu.vector_store %arg9[%c0_75, %c0_76, %c3_77, %c0_78], %99 {strides = array<i32>} : memref<1x2x8x8xbf16, #tpu.memory_space<vmem>>, vector<1x2x1x8xbf16>,
    %100 = arith.truncf %95 : vector<2x8xf32> to vector<2x8xbf16>
    %c0_79 = arith.constant 0 : index
    %c0_80 = arith.constant 0 : index
    %c3_81 = arith.constant 3 : index
    %c0_82 = arith.constant 0 : index
    %101 = vector.load %arg10[%c0_79, %c0_80, %c3_81, %c0_82] : memref<1x2x8x8xbf16, #tpu.memory_space<vmem>>, vector<1x2x1x8xbf16>
    %102 = vector.shape_cast %101 : vector<1x2x1x8xbf16> to vector<2x8xbf16>
    %103 = vector.shape_cast %100 : vector<2x8xbf16> to vector<1x2x1x8xbf16>
    tpu.vector_store %arg10[%c0_79, %c0_80, %c3_81, %c0_82], %103 {strides = array<i32>} : memref<1x2x8x8xbf16, #tpu.memory_space<vmem>>, vector<1x2x1x8xbf16>,
    %c0_83 = arith.constant 0 : index
    %c0_84 = arith.constant 0 : index
    %c8 = arith.constant 8 : index
    %c0_85 = arith.constant 0 : index
    %104 = vector.load %arg2[%c0_83, %c0_84, %c8, %c0_85] : memref<1x4x16x16xf32, #tpu.memory_space<vmem>>, vector<1x4x1x16xf32>
    %105 = vector.shape_cast %104 : vector<1x4x1x16xf32> to vector<4x16xf32>
    %c0_86 = arith.constant 0 : index
    %c0_87 = arith.constant 0 : index
    %c9 = arith.constant 9 : index
    %c0_88 = arith.constant 0 : index
    %106 = vector.load %arg2[%c0_86, %c0_87, %c9, %c0_88] : memref<1x4x16x16xf32, #tpu.memory_space<vmem>>, vector<1x4x1x16xf32>
    %107 = vector.shape_cast %106 : vector<1x4x1x16xf32> to vector<4x16xf32>
    %108 = arith.maximumf %105, %107 : vector<4x16xf32>
    %109 = arith.truncf %108 : vector<4x16xf32> to vector<4x16xbf16>
    %cst_89 = arith.constant dense<0.000000e+00> : vector<4x8xf32>
    %110 = tpu.matmul %109, %0, %cst_89 {dimension_numbers = #tpu.dot_dimension_numbers<[1], [0], [0], [1], [0, 0, 1, 1], [], []>} : vector<4x16xbf16>, vector<16x8xbf16>, vector<4x8xf32> -> vector<4x8xf32>
    %cst_90 = arith.constant dense<0.000000e+00> : vector<4x8xf32>
    %111 = tpu.matmul %109, %1, %cst_90 {dimension_numbers = #tpu.dot_dimension_numbers<[1], [0], [0], [1], [0, 0, 1, 1], [], []>} : vector<4x16xbf16>, vector<16x8xbf16>, vector<4x8xf32> -> vector<4x8xf32>
    %112 = arith.maximumf %110, %111 : vector<4x8xf32>
    %113 = arith.truncf %112 : vector<4x8xf32> to vector<4x8xbf16>
    %cst_91 = arith.constant dense<0.000000e+00> : vector<2x8xf32>
    %114 = tpu.matmul %3, %113, %cst_91 {dimension_numbers = #tpu.dot_dimension_numbers<[1], [0], [0], [1], [0, 0, 1, 1], [], []>} : vector<2x4xbf16>, vector<4x8xbf16>, vector<2x8xf32> -> vector<2x8xf32>
    %115 = vector.broadcast %6 : vector<2x1xf32> to vector<2x8xf32>
    %116 = arith.addf %114, %115 : vector<2x8xf32>
    %cst_92 = arith.constant dense<0.000000e+00> : vector<2x8xf32>
    %117 = tpu.matmul %5, %113, %cst_92 {dimension_numbers = #tpu.dot_dimension_numbers<[1], [0], [0], [1], [0, 0, 1, 1], [], []>} : vector<2x4xbf16>, vector<4x8xbf16>, vector<2x8xf32> -> vector<2x8xf32>
    %118 = vector.broadcast %7 : vector<2x1xf32> to vector<2x8xf32>
    %119 = arith.addf %117, %118 : vector<2x8xf32>
    %120 = arith.truncf %116 : vector<2x8xf32> to vector<2x8xbf16>
    %c0_93 = arith.constant 0 : index
    %c0_94 = arith.constant 0 : index
    %c4_95 = arith.constant 4 : index
    %c0_96 = arith.constant 0 : index
    %121 = vector.load %arg9[%c0_93, %c0_94, %c4_95, %c0_96] : memref<1x2x8x8xbf16, #tpu.memory_space<vmem>>, vector<1x2x1x8xbf16>
    %122 = vector.shape_cast %121 : vector<1x2x1x8xbf16> to vector<2x8xbf16>
    %123 = vector.shape_cast %120 : vector<2x8xbf16> to vector<1x2x1x8xbf16>
    tpu.vector_store %arg9[%c0_93, %c0_94, %c4_95, %c0_96], %123 {strides = array<i32>} : memref<1x2x8x8xbf16, #tpu.memory_space<vmem>>, vector<1x2x1x8xbf16>,
    %124 = arith.truncf %119 : vector<2x8xf32> to vector<2x8xbf16>
    %c0_97 = arith.constant 0 : index
    %c0_98 = arith.constant 0 : index
    %c4_99 = arith.constant 4 : index
    %c0_100 = arith.constant 0 : index
    %125 = vector.load %arg10[%c0_97, %c0_98, %c4_99, %c0_100] : memref<1x2x8x8xbf16, #tpu.memory_space<vmem>>, vector<1x2x1x8xbf16>
    %126 = vector.shape_cast %125 : vector<1x2x1x8xbf16> to vector<2x8xbf16>
    %127 = vector.shape_cast %124 : vector<2x8xbf16> to vector<1x2x1x8xbf16>
    tpu.vector_store %arg10[%c0_97, %c0_98, %c4_99, %c0_100], %127 {strides = array<i32>} : memref<1x2x8x8xbf16, #tpu.memory_space<vmem>>, vector<1x2x1x8xbf16>,
    %c0_101 = arith.constant 0 : index
    %c0_102 = arith.constant 0 : index
    %c10 = arith.constant 10 : index
    %c0_103 = arith.constant 0 : index
    %128 = vector.load %arg2[%c0_101, %c0_102, %c10, %c0_103] : memref<1x4x16x16xf32, #tpu.memory_space<vmem>>, vector<1x4x1x16xf32>
    %129 = vector.shape_cast %128 : vector<1x4x1x16xf32> to vector<4x16xf32>
    %c0_104 = arith.constant 0 : index
    %c0_105 = arith.constant 0 : index
    %c11 = arith.constant 11 : index
    %c0_106 = arith.constant 0 : index
    %130 = vector.load %arg2[%c0_104, %c0_105, %c11, %c0_106] : memref<1x4x16x16xf32, #tpu.memory_space<vmem>>, vector<1x4x1x16xf32>
    %131 = vector.shape_cast %130 : vector<1x4x1x16xf32> to vector<4x16xf32>
    %132 = arith.maximumf %129, %131 : vector<4x16xf32>
    %133 = arith.truncf %132 : vector<4x16xf32> to vector<4x16xbf16>
    %cst_107 = arith.constant dense<0.000000e+00> : vector<4x8xf32>
    %134 = tpu.matmul %133, %0, %cst_107 {dimension_numbers = #tpu.dot_dimension_numbers<[1], [0], [0], [1], [0, 0, 1, 1], [], []>} : vector<4x16xbf16>, vector<16x8xbf16>, vector<4x8xf32> -> vector<4x8xf32>
    %cst_108 = arith.constant dense<0.000000e+00> : vector<4x8xf32>
    %135 = tpu.matmul %133, %1, %cst_108 {dimension_numbers = #tpu.dot_dimension_numbers<[1], [0], [0], [1], [0, 0, 1, 1], [], []>} : vector<4x16xbf16>, vector<16x8xbf16>, vector<4x8xf32> -> vector<4x8xf32>
    %136 = arith.maximumf %134, %135 : vector<4x8xf32>
    %137 = arith.truncf %136 : vector<4x8xf32> to vector<4x8xbf16>
    %cst_109 = arith.constant dense<0.000000e+00> : vector<2x8xf32>
    %138 = tpu.matmul %3, %137, %cst_109 {dimension_numbers = #tpu.dot_dimension_numbers<[1], [0], [0], [1], [0, 0, 1, 1], [], []>} : vector<2x4xbf16>, vector<4x8xbf16>, vector<2x8xf32> -> vector<2x8xf32>
    %139 = vector.broadcast %6 : vector<2x1xf32> to vector<2x8xf32>
    %140 = arith.addf %138, %139 : vector<2x8xf32>
    %cst_110 = arith.constant dense<0.000000e+00> : vector<2x8xf32>
    %141 = tpu.matmul %5, %137, %cst_110 {dimension_numbers = #tpu.dot_dimension_numbers<[1], [0], [0], [1], [0, 0, 1, 1], [], []>} : vector<2x4xbf16>, vector<4x8xbf16>, vector<2x8xf32> -> vector<2x8xf32>
    %142 = vector.broadcast %7 : vector<2x1xf32> to vector<2x8xf32>
    %143 = arith.addf %141, %142 : vector<2x8xf32>
    %144 = arith.truncf %140 : vector<2x8xf32> to vector<2x8xbf16>
    %c0_111 = arith.constant 0 : index
    %c0_112 = arith.constant 0 : index
    %c5_113 = arith.constant 5 : index
    %c0_114 = arith.constant 0 : index
    %145 = vector.load %arg9[%c0_111, %c0_112, %c5_113, %c0_114] : memref<1x2x8x8xbf16, #tpu.memory_space<vmem>>, vector<1x2x1x8xbf16>
    %146 = vector.shape_cast %145 : vector<1x2x1x8xbf16> to vector<2x8xbf16>
    %147 = vector.shape_cast %144 : vector<2x8xbf16> to vector<1x2x1x8xbf16>
    tpu.vector_store %arg9[%c0_111, %c0_112, %c5_113, %c0_114], %147 {strides = array<i32>} : memref<1x2x8x8xbf16, #tpu.memory_space<vmem>>, vector<1x2x1x8xbf16>,
    %148 = arith.truncf %143 : vector<2x8xf32> to vector<2x8xbf16>
    %c0_115 = arith.constant 0 : index
    %c0_116 = arith.constant 0 : index
    %c5_117 = arith.constant 5 : index
    %c0_118 = arith.constant 0 : index
    %149 = vector.load %arg10[%c0_115, %c0_116, %c5_117, %c0_118] : memref<1x2x8x8xbf16, #tpu.memory_space<vmem>>, vector<1x2x1x8xbf16>
    %150 = vector.shape_cast %149 : vector<1x2x1x8xbf16> to vector<2x8xbf16>
    %151 = vector.shape_cast %148 : vector<2x8xbf16> to vector<1x2x1x8xbf16>
    tpu.vector_store %arg10[%c0_115, %c0_116, %c5_117, %c0_118], %151 {strides = array<i32>} : memref<1x2x8x8xbf16, #tpu.memory_space<vmem>>, vector<1x2x1x8xbf16>,
    %c0_119 = arith.constant 0 : index
    %c0_120 = arith.constant 0 : index
    %c12 = arith.constant 12 : index
    %c0_121 = arith.constant 0 : index
    %152 = vector.load %arg2[%c0_119, %c0_120, %c12, %c0_121] : memref<1x4x16x16xf32, #tpu.memory_space<vmem>>, vector<1x4x1x16xf32>
    %153 = vector.shape_cast %152 : vector<1x4x1x16xf32> to vector<4x16xf32>
    %c0_122 = arith.constant 0 : index
    %c0_123 = arith.constant 0 : index
    %c13 = arith.constant 13 : index
    %c0_124 = arith.constant 0 : index
    %154 = vector.load %arg2[%c0_122, %c0_123, %c13, %c0_124] : memref<1x4x16x16xf32, #tpu.memory_space<vmem>>, vector<1x4x1x16xf32>
    %155 = vector.shape_cast %154 : vector<1x4x1x16xf32> to vector<4x16xf32>
    %156 = arith.maximumf %153, %155 : vector<4x16xf32>
    %157 = arith.truncf %156 : vector<4x16xf32> to vector<4x16xbf16>
    %cst_125 = arith.constant dense<0.000000e+00> : vector<4x8xf32>
    %158 = tpu.matmul %157, %0, %cst_125 {dimension_numbers = #tpu.dot_dimension_numbers<[1], [0], [0], [1], [0, 0, 1, 1], [], []>} : vector<4x16xbf16>, vector<16x8xbf16>, vector<4x8xf32> -> vector<4x8xf32>
    %cst_126 = arith.constant dense<0.000000e+00> : vector<4x8xf32>
    %159 = tpu.matmul %157, %1, %cst_126 {dimension_numbers = #tpu.dot_dimension_numbers<[1], [0], [0], [1], [0, 0, 1, 1], [], []>} : vector<4x16xbf16>, vector<16x8xbf16>, vector<4x8xf32> -> vector<4x8xf32>
    %160 = arith.maximumf %158, %159 : vector<4x8xf32>
    %161 = arith.truncf %160 : vector<4x8xf32> to vector<4x8xbf16>
    %cst_127 = arith.constant dense<0.000000e+00> : vector<2x8xf32>
    %162 = tpu.matmul %3, %161, %cst_127 {dimension_numbers = #tpu.dot_dimension_numbers<[1], [0], [0], [1], [0, 0, 1, 1], [], []>} : vector<2x4xbf16>, vector<4x8xbf16>, vector<2x8xf32> -> vector<2x8xf32>
    %163 = vector.broadcast %6 : vector<2x1xf32> to vector<2x8xf32>
    %164 = arith.addf %162, %163 : vector<2x8xf32>
    %cst_128 = arith.constant dense<0.000000e+00> : vector<2x8xf32>
    %165 = tpu.matmul %5, %161, %cst_128 {dimension_numbers = #tpu.dot_dimension_numbers<[1], [0], [0], [1], [0, 0, 1, 1], [], []>} : vector<2x4xbf16>, vector<4x8xbf16>, vector<2x8xf32> -> vector<2x8xf32>
    %166 = vector.broadcast %7 : vector<2x1xf32> to vector<2x8xf32>
    %167 = arith.addf %165, %166 : vector<2x8xf32>
    %168 = arith.truncf %164 : vector<2x8xf32> to vector<2x8xbf16>
    %c0_129 = arith.constant 0 : index
    %c0_130 = arith.constant 0 : index
    %c6_131 = arith.constant 6 : index
    %c0_132 = arith.constant 0 : index
    %169 = vector.load %arg9[%c0_129, %c0_130, %c6_131, %c0_132] : memref<1x2x8x8xbf16, #tpu.memory_space<vmem>>, vector<1x2x1x8xbf16>
    %170 = vector.shape_cast %169 : vector<1x2x1x8xbf16> to vector<2x8xbf16>
    %171 = vector.shape_cast %168 : vector<2x8xbf16> to vector<1x2x1x8xbf16>
    tpu.vector_store %arg9[%c0_129, %c0_130, %c6_131, %c0_132], %171 {strides = array<i32>} : memref<1x2x8x8xbf16, #tpu.memory_space<vmem>>, vector<1x2x1x8xbf16>,
    %172 = arith.truncf %167 : vector<2x8xf32> to vector<2x8xbf16>
    %c0_133 = arith.constant 0 : index
    %c0_134 = arith.constant 0 : index
    %c6_135 = arith.constant 6 : index
    %c0_136 = arith.constant 0 : index
    %173 = vector.load %arg10[%c0_133, %c0_134, %c6_135, %c0_136] : memref<1x2x8x8xbf16, #tpu.memory_space<vmem>>, vector<1x2x1x8xbf16>
    %174 = vector.shape_cast %173 : vector<1x2x1x8xbf16> to vector<2x8xbf16>
    %175 = vector.shape_cast %172 : vector<2x8xbf16> to vector<1x2x1x8xbf16>
    tpu.vector_store %arg10[%c0_133, %c0_134, %c6_135, %c0_136], %175 {strides = array<i32>} : memref<1x2x8x8xbf16, #tpu.memory_space<vmem>>, vector<1x2x1x8xbf16>,
    %c0_137 = arith.constant 0 : index
    %c0_138 = arith.constant 0 : index
    %c14 = arith.constant 14 : index
    %c0_139 = arith.constant 0 : index
    %176 = vector.load %arg2[%c0_137, %c0_138, %c14, %c0_139] : memref<1x4x16x16xf32, #tpu.memory_space<vmem>>, vector<1x4x1x16xf32>
    %177 = vector.shape_cast %176 : vector<1x4x1x16xf32> to vector<4x16xf32>
    %c0_140 = arith.constant 0 : index
    %c0_141 = arith.constant 0 : index
    %c15 = arith.constant 15 : index
    %c0_142 = arith.constant 0 : index
    %178 = vector.load %arg2[%c0_140, %c0_141, %c15, %c0_142] : memref<1x4x16x16xf32, #tpu.memory_space<vmem>>, vector<1x4x1x16xf32>
    %179 = vector.shape_cast %178 : vector<1x4x1x16xf32> to vector<4x16xf32>
    %180 = arith.maximumf %177, %179 : vector<4x16xf32>
    %181 = arith.truncf %180 : vector<4x16xf32> to vector<4x16xbf16>
    %cst_143 = arith.constant dense<0.000000e+00> : vector<4x8xf32>
    %182 = tpu.matmul %181, %0, %cst_143 {dimension_numbers = #tpu.dot_dimension_numbers<[1], [0], [0], [1], [0, 0, 1, 1], [], []>} : vector<4x16xbf16>, vector<16x8xbf16>, vector<4x8xf32> -> vector<4x8xf32>
    %cst_144 = arith.constant dense<0.000000e+00> : vector<4x8xf32>
    %183 = tpu.matmul %181, %1, %cst_144 {dimension_numbers = #tpu.dot_dimension_numbers<[1], [0], [0], [1], [0, 0, 1, 1], [], []>} : vector<4x16xbf16>, vector<16x8xbf16>, vector<4x8xf32> -> vector<4x8xf32>
    %184 = arith.maximumf %182, %183 : vector<4x8xf32>
    %185 = arith.truncf %184 : vector<4x8xf32> to vector<4x8xbf16>
    %cst_145 = arith.constant dense<0.000000e+00> : vector<2x8xf32>
    %186 = tpu.matmul %3, %185, %cst_145 {dimension_numbers = #tpu.dot_dimension_numbers<[1], [0], [0], [1], [0, 0, 1, 1], [], []>} : vector<2x4xbf16>, vector<4x8xbf16>, vector<2x8xf32> -> vector<2x8xf32>
    %187 = vector.broadcast %6 : vector<2x1xf32> to vector<2x8xf32>
    %188 = arith.addf %186, %187 : vector<2x8xf32>
    %cst_146 = arith.constant dense<0.000000e+00> : vector<2x8xf32>
    %189 = tpu.matmul %5, %185, %cst_146 {dimension_numbers = #tpu.dot_dimension_numbers<[1], [0], [0], [1], [0, 0, 1, 1], [], []>} : vector<2x4xbf16>, vector<4x8xbf16>, vector<2x8xf32> -> vector<2x8xf32>
    %190 = vector.broadcast %7 : vector<2x1xf32> to vector<2x8xf32>
    %191 = arith.addf %189, %190 : vector<2x8xf32>
    %192 = arith.truncf %188 : vector<2x8xf32> to vector<2x8xbf16>
    %c0_147 = arith.constant 0 : index
    %c0_148 = arith.constant 0 : index
    %c7_149 = arith.constant 7 : index
    %c0_150 = arith.constant 0 : index
    %193 = vector.load %arg9[%c0_147, %c0_148, %c7_149, %c0_150] : memref<1x2x8x8xbf16, #tpu.memory_space<vmem>>, vector<1x2x1x8xbf16>
    %194 = vector.shape_cast %193 : vector<1x2x1x8xbf16> to vector<2x8xbf16>
    %195 = vector.shape_cast %192 : vector<2x8xbf16> to vector<1x2x1x8xbf16>
    tpu.vector_store %arg9[%c0_147, %c0_148, %c7_149, %c0_150], %195 {strides = array<i32>} : memref<1x2x8x8xbf16, #tpu.memory_space<vmem>>, vector<1x2x1x8xbf16>,
    %196 = arith.truncf %191 : vector<2x8xf32> to vector<2x8xbf16>
    %c0_151 = arith.constant 0 : index
    %c0_152 = arith.constant 0 : index
    %c7_153 = arith.constant 7 : index
    %c0_154 = arith.constant 0 : index
    %197 = vector.load %arg10[%c0_151, %c0_152, %c7_153, %c0_154] : memref<1x2x8x8xbf16, #tpu.memory_space<vmem>>, vector<1x2x1x8xbf16>
    %198 = vector.shape_cast %197 : vector<1x2x1x8xbf16> to vector<2x8xbf16>
    %199 = vector.shape_cast %196 : vector<2x8xbf16> to vector<1x2x1x8xbf16>
    tpu.vector_store %arg10[%c0_151, %c0_152, %c7_153, %c0_154], %199 {strides = array<i32>} : memref<1x2x8x8xbf16, #tpu.memory_space<vmem>>, vector<1x2x1x8xbf16>,
    return
  }
  func.func @transform_0(%arg0: i32, %arg1: i32) -> (i32, i32, i32, i32) {
    %c0_i32 = arith.constant 0 : i32
    %c0_i32_0 = arith.constant 0 : i32
    %c0_i32_1 = arith.constant 0 : i32
    return %arg0, %c0_i32, %arg1, %c0_i32_0 : i32, i32, i32, i32
  }
  func.func @transform_1(%arg0: i32, %arg1: i32) -> (i32, i32) {
    %c0_i32 = arith.constant 0 : i32
    %c0_i32_0 = arith.constant 0 : i32
    %c0_i32_1 = arith.constant 0 : i32
    return %c0_i32, %c0_i32_0 : i32, i32
  }
  func.func @transform_2(%arg0: i32, %arg1: i32) -> (i32, i32) {
    %c0_i32 = arith.constant 0 : i32
    %c0_i32_0 = arith.constant 0 : i32
    %c0_i32_1 = arith.constant 0 : i32
    return %c0_i32, %c0_i32_0 : i32, i32
  }
  func.func @transform_3(%arg0: i32, %arg1: i32) -> (i32, i32) {
    %c0_i32 = arith.constant 0 : i32
    %c0_i32_0 = arith.constant 0 : i32
    %c0_i32_1 = arith.constant 0 : i32
    return %c0_i32, %c0_i32_0 : i32, i32
  }
  func.func @transform_4(%arg0: i32, %arg1: i32) -> (i32, i32) {
    %c0_i32 = arith.constant 0 : i32
    %c0_i32_0 = arith.constant 0 : i32
    %c0_i32_1 = arith.constant 0 : i32
    return %c0_i32, %c0_i32_0 : i32, i32
  }
  func.func @transform_5(%arg0: i32, %arg1: i32) -> (i32, i32) {
    %c0_i32 = arith.constant 0 : i32
    %c0_i32_0 = arith.constant 0 : i32
    %c0_i32_1 = arith.constant 0 : i32
    return %c0_i32, %c0_i32_0 : i32, i32
  }
  func.func @transform_6(%arg0: i32, %arg1: i32) -> (i32, i32) {
    %c0_i32 = arith.constant 0 : i32
    %c0_i32_0 = arith.constant 0 : i32
    %c0_i32_1 = arith.constant 0 : i32
    return %c0_i32, %c0_i32_0 : i32, i32
  }
  func.func @transform_7(%arg0: i32, %arg1: i32) -> (i32, i32, i32, i32) {
    %c0_i32 = arith.constant 0 : i32
    %c0_i32_0 = arith.constant 0 : i32
    %c0_i32_1 = arith.constant 0 : i32
    return %arg0, %c0_i32, %arg1, %c0_i32_0 : i32, i32, i32, i32
  }
  func.func @transform_8(%arg0: i32, %arg1: i32) -> (i32, i32, i32, i32) {
    %c0_i32 = arith.constant 0 : i32
    %c0_i32_0 = arith.constant 0 : i32
    %c0_i32_1 = arith.constant 0 : i32
    return %arg0, %c0_i32, %arg1, %c0_i32_0 : i32, i32, i32, i32
  }
}

module attributes {stable_mosaic.version = 11 : i64} {
  func.func @_attn_kernel(%arg0: i32, %arg1: i32, %arg2: i32, %arg3: memref<1x2x256xbf16, #tpu.memory_space<vmem>>, %arg4: memref<1x2x64xbf16, #tpu.memory_space<vmem>>, %arg5: memref<1x2x64xbf16, #tpu.memory_space<vmem>>, %arg6: memref<1x256x2xbf16, #tpu.memory_space<vmem>>, %arg7: memref<256x1xf32, #tpu.memory_space<vmem>>, %arg8: memref<256x1xf32, #tpu.memory_space<vmem>>, %arg9: memref<256x2xf32, #tpu.memory_space<vmem>>) attributes {dimension_semantics = [#tpu.dimension_semantics<parallel>, #tpu.dimension_semantics<parallel>, #tpu.dimension_semantics<arbitrary>], iteration_bounds = array<i64: 2, 1, 1>, scalar_prefetch = 0 : i64, scratch_operands = 3 : i64, tpu.core_type = #tpu.core_type<tc>, window_params = [{transform_indices = @transform_0, window_bounds = array<i64: 1, 2, 256>}, {transform_indices = @transform_1, window_bounds = array<i64: 1, 2, 64>}, {transform_indices = @transform_2, window_bounds = array<i64: 1, 2, 64>}, {transform_indices = @transform_3, window_bounds = array<i64: 1, 256, 2>}]} {
    %c0_i32 = arith.constant 0 : i32
    %0 = arith.cmpi eq, %arg2, %c0_i32 : i32
    %1 = arith.extui %0 : i1 to i32
    %c0_i32_0 = arith.constant 0 : i32
    %2 = arith.cmpi ne, %1, %c0_i32_0 : i32
    scf.if %2 {
      %cst_26 = arith.constant 0xFF800000 : f32
      %36 = vector.broadcast %cst_26 : f32 to vector<256x1xf32>
      %c0_27 = arith.constant 0 : index
      %c0_28 = arith.constant 0 : index
      %37 = vector.load %arg7[%c0_27, %c0_28] : memref<256x1xf32, #tpu.memory_space<vmem>>, vector<256x1xf32>
      tpu.vector_store %arg7[%c0_27, %c0_28], %36 {strides = array<i32>} : memref<256x1xf32, #tpu.memory_space<vmem>>, vector<256x1xf32>,
      %cst_29 = arith.constant 0.000000e+00 : f32
      %38 = vector.broadcast %cst_29 : f32 to vector<256x1xf32>
      %c0_30 = arith.constant 0 : index
      %c0_31 = arith.constant 0 : index
      %39 = vector.load %arg8[%c0_30, %c0_31] : memref<256x1xf32, #tpu.memory_space<vmem>>, vector<256x1xf32>
      tpu.vector_store %arg8[%c0_30, %c0_31], %38 {strides = array<i32>} : memref<256x1xf32, #tpu.memory_space<vmem>>, vector<256x1xf32>,
      %cst_32 = arith.constant 0.000000e+00 : f32
      %40 = vector.broadcast %cst_32 : f32 to vector<256x2xf32>
      %c0_33 = arith.constant 0 : index
      %c0_34 = arith.constant 0 : index
      %41 = vector.load %arg9[%c0_33, %c0_34] : memref<256x2xf32, #tpu.memory_space<vmem>>, vector<256x2xf32>
      tpu.vector_store %arg9[%c0_33, %c0_34], %40 {strides = array<i32>} : memref<256x2xf32, #tpu.memory_space<vmem>>, vector<256x2xf32>,
    } else {
    }
    %c0 = arith.constant 0 : index
    %c0_1 = arith.constant 0 : index
    %c0_2 = arith.constant 0 : index
    %3 = vector.load %arg3[%c0, %c0_1, %c0_2] : memref<1x2x256xbf16, #tpu.memory_space<vmem>>, vector<1x2x256xbf16>
    %4 = vector.shape_cast %3 : vector<1x2x256xbf16> to vector<2x256xbf16>
    %c0_3 = arith.constant 0 : index
    %c0_4 = arith.constant 0 : index
    %c0_5 = arith.constant 0 : index
    %5 = vector.load %arg4[%c0_3, %c0_4, %c0_5] : memref<1x2x64xbf16, #tpu.memory_space<vmem>>, vector<1x2x64xbf16>
    %6 = vector.shape_cast %5 : vector<1x2x64xbf16> to vector<2x64xbf16>
    %cst = arith.constant dense<0.000000e+00> : vector<256x64xf32>
    %7 = tpu.matmul %4, %6, %cst {dimension_numbers = #tpu.dot_dimension_numbers<[0], [0], [1], [1], [0, 1, 1, 1], [], []>} : vector<2x256xbf16>, vector<2x64xbf16>, vector<256x64xf32> -> vector<256x64xf32>
    %c0_6 = arith.constant 0 : index
    %c0_7 = arith.constant 0 : index
    %8 = vector.load %arg7[%c0_6, %c0_7] : memref<256x1xf32, #tpu.memory_space<vmem>>, vector<256x1xf32>
    %cst_8 = arith.constant dense<0xFF800000> : vector<256xf32>
    %9 = vector.multi_reduction <maximumf>, %7, %cst_8 [1] : vector<256x64xf32> to vector<256xf32>
    %10 = vector.shape_cast %9 : vector<256xf32> to vector<256x1xf32>
    %11 = arith.maximumf %8, %10 : vector<256x1xf32>
    %12 = arith.subf %8, %11 : vector<256x1xf32>
    %13 = math.exp %12 : vector<256x1xf32>
    %14 = vector.broadcast %11 : vector<256x1xf32> to vector<256x64xf32>
    %15 = arith.subf %7, %14 : vector<256x64xf32>
    %16 = math.exp %15 : vector<256x64xf32>
    %c0_9 = arith.constant 0 : index
    %c0_10 = arith.constant 0 : index
    %17 = vector.load %arg8[%c0_9, %c0_10] : memref<256x1xf32, #tpu.memory_space<vmem>>, vector<256x1xf32>
    %18 = arith.mulf %13, %17 : vector<256x1xf32>
    %cst_11 = arith.constant dense<0.000000e+00> : vector<256xf32>
    %19 = vector.multi_reduction <add>, %16, %cst_11 [1] : vector<256x64xf32> to vector<256xf32>
    %20 = vector.shape_cast %19 : vector<256xf32> to vector<256x1xf32>
    %21 = arith.addf %18, %20 : vector<256x1xf32>
    %c0_12 = arith.constant 0 : index
    %c0_13 = arith.constant 0 : index
    %22 = vector.load %arg8[%c0_12, %c0_13] : memref<256x1xf32, #tpu.memory_space<vmem>>, vector<256x1xf32>
    tpu.vector_store %arg8[%c0_12, %c0_13], %21 {strides = array<i32>} : memref<256x1xf32, #tpu.memory_space<vmem>>, vector<256x1xf32>,
    %23 = arith.truncf %16 : vector<256x64xf32> to vector<256x64xbf16>
    %c0_14 = arith.constant 0 : index
    %c0_15 = arith.constant 0 : index
    %c0_16 = arith.constant 0 : index
    %24 = vector.load %arg5[%c0_14, %c0_15, %c0_16] : memref<1x2x64xbf16, #tpu.memory_space<vmem>>, vector<1x2x64xbf16>
    %25 = vector.shape_cast %24 : vector<1x2x64xbf16> to vector<2x64xbf16>
    %cst_17 = arith.constant dense<0.000000e+00> : vector<256x2xf32>
    %26 = tpu.matmul %23, %25, %cst_17 {dimension_numbers = #tpu.dot_dimension_numbers<[1], [1], [0], [0], [0, 0, 1, 0], [], []>} : vector<256x64xbf16>, vector<2x64xbf16>, vector<256x2xf32> -> vector<256x2xf32>
    %c0_18 = arith.constant 0 : index
    %c0_19 = arith.constant 0 : index
    %27 = vector.load %arg9[%c0_18, %c0_19] : memref<256x2xf32, #tpu.memory_space<vmem>>, vector<256x2xf32>
    %28 = vector.broadcast %13 : vector<256x1xf32> to vector<256x2xf32>
    %29 = arith.mulf %28, %27 : vector<256x2xf32>
    %30 = arith.addf %29, %26 : vector<256x2xf32>
    %c0_20 = arith.constant 0 : index
    %c0_21 = arith.constant 0 : index
    %31 = vector.load %arg9[%c0_20, %c0_21] : memref<256x2xf32, #tpu.memory_space<vmem>>, vector<256x2xf32>
    tpu.vector_store %arg9[%c0_20, %c0_21], %30 {strides = array<i32>} : memref<256x2xf32, #tpu.memory_space<vmem>>, vector<256x2xf32>,
    %c0_22 = arith.constant 0 : index
    %c0_23 = arith.constant 0 : index
    %32 = vector.load %arg7[%c0_22, %c0_23] : memref<256x1xf32, #tpu.memory_space<vmem>>, vector<256x1xf32>
    tpu.vector_store %arg7[%c0_22, %c0_23], %11 {strides = array<i32>} : memref<256x1xf32, #tpu.memory_space<vmem>>, vector<256x1xf32>,
    %c0_i32_24 = arith.constant 0 : i32
    %33 = arith.cmpi eq, %arg2, %c0_i32_24 : i32
    %34 = arith.extui %33 : i1 to i32
    %c0_i32_25 = arith.constant 0 : i32
    %35 = arith.cmpi ne, %34, %c0_i32_25 : i32
    scf.if %35 {
      %c0_26 = arith.constant 0 : index
      %c0_27 = arith.constant 0 : index
      %36 = vector.load %arg9[%c0_26, %c0_27] : memref<256x2xf32, #tpu.memory_space<vmem>>, vector<256x2xf32>
      %c0_28 = arith.constant 0 : index
      %c0_29 = arith.constant 0 : index
      %37 = vector.load %arg8[%c0_28, %c0_29] : memref<256x1xf32, #tpu.memory_space<vmem>>, vector<256x1xf32>
      %38 = tpu.reciprocal %37 {approx = true} : vector<256x1xf32> -> vector<256x1xf32>
      %39 = vector.broadcast %38 : vector<256x1xf32> to vector<256x2xf32>
      %40 = arith.mulf %36, %39 : vector<256x2xf32>
      %41 = arith.truncf %40 : vector<256x2xf32> to vector<256x2xbf16>
      %c0_30 = arith.constant 0 : index
      %c0_31 = arith.constant 0 : index
      %c0_32 = arith.constant 0 : index
      %42 = vector.load %arg6[%c0_30, %c0_31, %c0_32] : memref<1x256x2xbf16, #tpu.memory_space<vmem>>, vector<1x256x2xbf16>
      %43 = vector.shape_cast %42 : vector<1x256x2xbf16> to vector<256x2xbf16>
      %44 = vector.shape_cast %41 : vector<256x2xbf16> to vector<1x256x2xbf16>
      tpu.vector_store %arg6[%c0_30, %c0_31, %c0_32], %44 {strides = array<i32>} : memref<1x256x2xbf16, #tpu.memory_space<vmem>>, vector<1x256x2xbf16>,
    } else {
    }
    return
  }
  func.func @transform_0(%arg0: i32, %arg1: i32, %arg2: i32) -> (i32, i32, i32) {
    %c0_i32 = arith.constant 0 : i32
    %c0_i32_0 = arith.constant 0 : i32
    return %arg0, %c0_i32, %arg1 : i32, i32, i32
  }
  func.func @transform_1(%arg0: i32, %arg1: i32, %arg2: i32) -> (i32, i32, i32) {
    %c0_i32 = arith.constant 0 : i32
    %c0_i32_0 = arith.constant 0 : i32
    return %arg0, %c0_i32, %arg2 : i32, i32, i32
  }
  func.func @transform_2(%arg0: i32, %arg1: i32, %arg2: i32) -> (i32, i32, i32) {
    %c0_i32 = arith.constant 0 : i32
    %c0_i32_0 = arith.constant 0 : i32
    return %arg0, %c0_i32, %arg2 : i32, i32, i32
  }
  func.func @transform_3(%arg0: i32, %arg1: i32, %arg2: i32) -> (i32, i32, i32) {
    %c0_i32 = arith.constant 0 : i32
    %c0_i32_0 = arith.constant 0 : i32
    return %arg0, %arg1, %c0_i32 : i32, i32, i32
  }
}

module attributes {stable_mosaic.version = 11 : i64} {
  func.func @_wz_residual_kernel(%arg0: i32, %arg1: i32, %arg2: memref<1x2x256xbf16, #tpu.memory_space<vmem>>, %arg3: memref<1x4x256xf32, #tpu.memory_space<vmem>>, %arg4: memref<4x2xf32, #tpu.memory_space<vmem>>, %arg5: memref<4x1xf32, #tpu.memory_space<vmem>>, %arg6: memref<1x4x256xf32, #tpu.memory_space<vmem>>) attributes {dimension_semantics = [#tpu.dimension_semantics<parallel>, #tpu.dimension_semantics<parallel>], iteration_bounds = array<i64: 2, 1>, scalar_prefetch = 0 : i64, scratch_operands = 0 : i64, tpu.core_type = #tpu.core_type<tc>, window_params = [{transform_indices = @transform_0, window_bounds = array<i64: 1, 2, 256>}, {transform_indices = @transform_1, window_bounds = array<i64: 1, 4, 256>}, {pipeline_mode = #tpu.pipeline_mode<synchronous>, transform_indices = @transform_2, window_bounds = array<i64: 4, 2>}, {pipeline_mode = #tpu.pipeline_mode<synchronous>, transform_indices = @transform_3, window_bounds = array<i64: 4, 1>}, {transform_indices = @transform_4, window_bounds = array<i64: 1, 4, 256>}]} {
    %c0 = arith.constant 0 : index
    %c0_0 = arith.constant 0 : index
    %0 = vector.load %arg4[%c0, %c0_0] : memref<4x2xf32, #tpu.memory_space<vmem>>, vector<4x2xf32>
    %1 = arith.truncf %0 : vector<4x2xf32> to vector<4x2xbf16>
    %c0_1 = arith.constant 0 : index
    %c0_2 = arith.constant 0 : index
    %c0_3 = arith.constant 0 : index
    %2 = vector.load %arg2[%c0_1, %c0_2, %c0_3] : memref<1x2x256xbf16, #tpu.memory_space<vmem>>, vector<1x2x256xbf16>
    %3 = vector.shape_cast %2 : vector<1x2x256xbf16> to vector<2x256xbf16>
    %cst = arith.constant dense<0.000000e+00> : vector<4x256xf32>
    %4 = tpu.matmul %1, %3, %cst {dimension_numbers = #tpu.dot_dimension_numbers<[1], [0], [0], [1], [0, 0, 1, 1], [], []>} : vector<4x2xbf16>, vector<2x256xbf16>, vector<4x256xf32> -> vector<4x256xf32>
    %c0_4 = arith.constant 0 : index
    %c0_5 = arith.constant 0 : index
    %5 = vector.load %arg5[%c0_4, %c0_5] : memref<4x1xf32, #tpu.memory_space<vmem>>, vector<4x1xf32>
    %6 = vector.broadcast %5 : vector<4x1xf32> to vector<4x256xf32>
    %7 = arith.addf %4, %6 : vector<4x256xf32>
    %c0_6 = arith.constant 0 : index
    %c0_7 = arith.constant 0 : index
    %c0_8 = arith.constant 0 : index
    %8 = vector.load %arg3[%c0_6, %c0_7, %c0_8] : memref<1x4x256xf32, #tpu.memory_space<vmem>>, vector<1x4x256xf32>
    %9 = vector.shape_cast %8 : vector<1x4x256xf32> to vector<4x256xf32>
    %10 = arith.addf %7, %9 : vector<4x256xf32>
    %c0_9 = arith.constant 0 : index
    %c0_10 = arith.constant 0 : index
    %c0_11 = arith.constant 0 : index
    %11 = vector.load %arg6[%c0_9, %c0_10, %c0_11] : memref<1x4x256xf32, #tpu.memory_space<vmem>>, vector<1x4x256xf32>
    %12 = vector.shape_cast %11 : vector<1x4x256xf32> to vector<4x256xf32>
    %13 = vector.shape_cast %10 : vector<4x256xf32> to vector<1x4x256xf32>
    tpu.vector_store %arg6[%c0_9, %c0_10, %c0_11], %13 {strides = array<i32>} : memref<1x4x256xf32, #tpu.memory_space<vmem>>, vector<1x4x256xf32>,
    return
  }
  func.func @transform_0(%arg0: i32, %arg1: i32) -> (i32, i32, i32) {
    %c0_i32 = arith.constant 0 : i32
    %c0_i32_0 = arith.constant 0 : i32
    return %arg0, %c0_i32, %arg1 : i32, i32, i32
  }
  func.func @transform_1(%arg0: i32, %arg1: i32) -> (i32, i32, i32) {
    %c0_i32 = arith.constant 0 : i32
    %c0_i32_0 = arith.constant 0 : i32
    return %arg0, %c0_i32, %arg1 : i32, i32, i32
  }
  func.func @transform_2(%arg0: i32, %arg1: i32) -> (i32, i32) {
    %c0_i32 = arith.constant 0 : i32
    %c0_i32_0 = arith.constant 0 : i32
    %c0_i32_1 = arith.constant 0 : i32
    return %c0_i32, %c0_i32_0 : i32, i32
  }
  func.func @transform_3(%arg0: i32, %arg1: i32) -> (i32, i32) {
    %c0_i32 = arith.constant 0 : i32
    %c0_i32_0 = arith.constant 0 : i32
    %c0_i32_1 = arith.constant 0 : i32
    return %c0_i32, %c0_i32_0 : i32, i32
  }
  func.func @transform_4(%arg0: i32, %arg1: i32) -> (i32, i32, i32) {
    %c0_i32 = arith.constant 0 : i32
    %c0_i32_0 = arith.constant 0 : i32
    return %arg0, %c0_i32, %arg1 : i32, i32, i32
  }
}

</mosaic_0001>

<bundles_post_ra>
// kernel: _lambda_.4
= control target key start
LH: loop header
LB: loop body
LE: loop exit
PB: predicated region body
PF: predicated region fallthrough
CT: control target
= control target key end

     0   :  { %s437_s12 = smov 0   ;;  %s439_s13 = smov 0   ;;  %s480_s0 = inlined_call_operand.vmem [shape: f32[2,4,256], index: 0, kind: input, shape index: {}]   ;;  %s481_s1 = inlined_call_operand.vmem [shape: f32[2,4], index: 1, kind: input, shape index: {}]   ;;  %s482_s2 = inlined_call_operand.vmem [shape: f32[2,1], index: 2, kind: input, shape index: {}]   ;;  %s483_s3 = inlined_call_operand.vmem [shape: bf16[2,2,256], index: 3, kind: output, shape index: {}]  }
   0x1   :  { %s441_s14 = smov 0  }
   0x2 LB: > { %s25_s15 = sadd.s32 1, %s410_s13  ;;  %p357_p0 = scmp.ge.s32.totalorder %s414_s14, 1  ;;  %s414_s14 = sphi %s441_s14, %s13_s14   ;;  %s410_s13 = sphi %s439_s13, %s485_s13   ;;  %s406_s12 = sphi %s437_s12, %s484_s12  }
   0x3   : > { %p27_p1 = scmp.ge.s32.totalorder %s25_s15, 2  ;;  %p158_p2 = scmp.lt.s32.totalorder %s414_s14, 3 }
   0x5   : > { %s487_s15 = smov (%p27_p1, %s25_s15), 0  ;;  %p159_p3 = pnand %p357_p0, %p158_p2 }
   0x6   : > { %p190_p4 = scmp.lt.s32.totalorder (!%p159_p3), %s406_s12, 1 }
   0x7   : > { %162 = sbr.rel (%p159_p3) target bundleno = 164 (0xa4), region = 32 }
   0xc   : > { %v416_v0 = vmov 0   ;;  %v220_v1 = vld [vmem:[%s482_s2] sm:$0x3]  ;;  %s489_s12 = smov (!%p190_p4, %s406_s12), 1  ;;  %vm230_vm0 = vcmask 1041408   ;;  %vm226_vm1 = vcmask 31744  }
   0xd   : > { %391 = vset.pattern.permute.xlu0 %v416_v0  ;;  %s365_s18 = sshll.u32 %s489_s12, 3  ;;  %v218_v3 = vld [vmem:[%s481_s1] sm:$0x3]  ;;  %s360_s24 = sshll.u32 %s489_s12, 1  ;;  %vm266_vm2 = vcmask 1040384  }
   0xe   : > { %223 = vperm.xlu0 %391, %v220_v1   ;;  %s197_s21 = scalar_lea.vmem %s480_s0, %s365_s18  ;;  %v219_v10 = vpack.c.bf16 %v218_v3, %v218_v3  ;;  %s206_s27 = scalar_lea.vmem %s483_s3, %s360_s24 }
   0xf   : > { %v209_v2 = vld [vmem:[%s197_s21] sm:$0xff] }
  0x10   : > { %211 = vst [vmem:[#allocation1] ss:$2 sm:$0xff] %v209_v2 }
  0x17   : > { %v212_v4 = vld.sshfl [vmem:[#allocation1] sm:$0xff pattern:$0x75316420]  ;;  %v213_v5 = vld.sshfl [vmem:[#allocation1 + $0x8] sm:$0xff pattern:$0x75316420] }
  0x18   : > { %v216_v6 = vpack.c.bf16 %v212_v4, %v212_v4  ;;  %v217_v7 = vpack.c.bf16 %v213_v5, %v213_v5 }
  0x1a   : > { %v232_v8 = vsel %vm230_vm0, %v216_v6, 0  ;;  %v235_v9 = vsel %vm230_vm0, %v217_v7, 0 }
  0x1b   : > { %244 = vmatpush.bf16.msra.mxu0 %v232_v8  ;;  %257 = vmatpush.bf16.msra.mxu1 %v235_v9 }
  0x1e   : > { %361 = vmatmul.msk.bf16.vlgmr.msra.gmra.mxu0 %vm226_vm1, %v219_v10  ;;  %362 = vmatmul.msk.bf16.vlgmr.msra.gmra.mxu1 %vm226_vm1, %v219_v10 }
  0x80   : > { %v224_v11 = vpop.permute.xlu0 %223 }
  0x9b   : > { %v246_v12 = vpop.f32.mrf.mxu0  ;;  %v259_v13 = vpop.f32.mrf.mxu1 }
  0x9c   : > { %v247_v14 = vadd.f32 %v246_v12, %v224_v11  ;;  %v260_v15 = vadd.f32 %v259_v13, %v224_v11 }
  0x9e   : > { %v263_v16 = vpack.c.bf16 %v260_v15, %v247_v14 }
  0xa0   : > { %v265_v17 = vrot.slane %v263_v16, 3 }
  0xa2   : > { %v269_v18 = vsel %vm266_vm2, %v263_v16, %v265_v17 }
  0xa3   : > { %271 = vst [vmem:[%s206_s27] sm:$0x3] %v269_v18  ;;  %v248_v19 = vpop.f32.mrf.mxu0  ;;  %v261_v20 = vpop.f32.mrf.mxu1 }
  0xa4 PF: > { %s13_s14 = sadd.s32 1, %s414_s14   ;;  %s484_s12 = smov %s410_s13 }
  0xa5   : > { %p10_p5 = scmp.ge.s32.totalorder %s13_s14, 4   ;;  %s485_s13 = smov %s487_s15 }
  0xa7   :  { %12 = sbr.rel (!%p10_p5) target bundleno = 2 (0x2), region = 62 }

// kernel: _lambda_.5
= control target key start
LH: loop header
LB: loop body
LE: loop exit
PB: predicated region body
PF: predicated region fallthrough
CT: control target
= control target key end

     0   :  { %s1891_s27 = smov 0   ;;  %s1893_s28 = smov 0   ;;  %s2361_s0 = inlined_call_operand.vmem [shape: f32[2,4,16,16], index: 0, kind: input, shape index: {}]   ;;  %s2362_s1 = inlined_call_operand.vmem [shape: bf16[16,8], index: 1, kind: input, shape index: {}]   ;;  %s2363_s2 = inlined_call_operand.vmem [shape: bf16[16,8], index: 2, kind: input, shape index: {}]   ;;  %s2364_s3 = inlined_call_operand.vmem [shape: f32[2,4], index: 3, kind: input, shape index: {}]   ;;  %s2365_s4 = inlined_call_operand.vmem [shape: f32[2,1], index: 4, kind: input, shape index: {}]   ;;  %s2366_s5 = inlined_call_operand.vmem [shape: f32[2,4], index: 5, kind: input, shape index: {}]   ;;  %s2367_s6 = inlined_call_operand.vmem [shape: f32[2,1], index: 6, kind: input, shape index: {}]   ;;  %s2368_s7 = inlined_call_operand.vmem [shape: bf16[2,2,8,8], index: 7, kind: output, shape index: {0}]   ;;  %s2369_s8 = inlined_call_operand.vmem [shape: bf16[2,2,8,8], index: 8, kind: output, shape index: {1}]  }
   0x1   :  { %s1895_s29 = smov 0  }
   0x2 LB: > { %s31_s30 = sadd.s32 1, %s1838_s28  ;;  %p1723_p0 = scmp.ge.s32.totalorder %s1842_s29, 1  ;;  %s1842_s29 = sphi %s1895_s29, %s19_s29   ;;  %s1838_s28 = sphi %s1893_s28, %s2387_s28   ;;  %s1834_s27 = sphi %s1891_s27, %s2386_s27  }
   0x3   : > { %p33_p1 = scmp.ge.s32.totalorder %s31_s30, 2  ;;  %p288_p2 = scmp.lt.s32.totalorder %s1842_s29, 3 }
   0x5   : > { %s2389_s30 = smov (%p33_p1, %s31_s30), 0  ;;  %p289_p3 = pnand %p1723_p0, %p288_p2 }
   0x6   : > { %p338_p4 = scmp.lt.s32.totalorder (!%p289_p3), %s1834_s27, 1 }
   0x7   : > { %292 = sbr.rel (%p289_p3) target bundleno = 424 (0x1a8), region = 48 }
   0xc   : > { %v1912_v0 = vld [vmem:[%s2362_s1] sm:$0xff]  ;;  %s2391_s27 = smov (!%p338_p4, %s1834_s27), 1  ;;  %vm399_vm0 = vcmask 1041409   ;;  %vm402_vm1 = vcmask 1042434   ;;  %vm405_vm2 = vcmask 1043459   ;;  %vm414_vm3 = vcmask 130048  }
   0xd   : > { %v1917_v1 = vld [vmem:[%s2363_s2] sm:$0xff]  ;;  %425 = vmatpush.bf16.msra.mxu0 %v1912_v0  ;;  %s1788_s13 = sshll.u32 %s2391_s27, 6  ;;  %vm461_vm4 = vcmask 1041408   ;;  %vm457_vm5 = vcmask 31744   ;;  %s1789_s25 = sshll.u32 %s2391_s27, 3  ;;  %vm502_vm6 = vcmask 1040384  }
   0xe   : > { %444 = vmatpush.bf16.msra.mxu1 %v1917_v1  ;;  %s1929_s16 = scalar_lea.vmem %s2361_s0, %s1788_s13  ;;  %s2115_s10 = scalar_lea.vmem %s2368_s7, %s1789_s25  ;;  %vm521_vm7 = vcmask 57344   ;;  %vm522_vm8 = vsmask.f32 256  ;;  %vm669_vm10 = vsmask.f32 7938  ;;  %vm816_vm12 = vcmask 58369  }
   0xf   : > { %v374_v2 = vld [vmem:[%s1929_s16] sm:$0x1]  ;;  %v375_v3 = vld [vmem:[%s1929_s16 + $0x10] sm:$0x1]  ;;  %v378_v6 = vld [vmem:[%s1929_s16 + $0x1] sm:$0x1]  ;;  %s2120_s13 = scalar_lea.vmem %s2369_s8, %s1789_s25 }
  0x10   : > { %v376_v4 = vld [vmem:[%s1929_s16 + $0x20] sm:$0x1]  ;;  %v377_v5 = vld [vmem:[%s1929_s16 + $0x30] sm:$0x1]  ;;  %v379_v7 = vld [vmem:[%s1929_s16 + $0x11] sm:$0x1]  ;;  %v382_v10 = vmax.f32 %v374_v2, %v378_v6 }
  0x11   : > { %598 = vmatpush.bf16.msrb.mxu0 %v1912_v0  ;;  %v380_v8 = vld [vmem:[%s1929_s16 + $0x21] sm:$0x1]  ;;  %v381_v9 = vld [vmem:[%s1929_s16 + $0x31] sm:$0x1]  ;;  %v383_v11 = vmax.f32 %v375_v3, %v379_v7  ;;  %v557_v14 = vld [vmem:[%s1929_s16 + $0x2] sm:$0x1] }
  0x12   : > { %611 = vmatpush.bf16.msrb.mxu1 %v1917_v1  ;;  %v384_v12 = vmax.f32 %v376_v4, %v380_v8  ;;  %v385_v13 = vmax.f32 %v377_v5, %v381_v9  ;;  %v558_v15 = vld [vmem:[%s1929_s16 + $0x12] sm:$0x1]  ;;  %v559_v16 = vld [vmem:[%s1929_s16 + $0x22] sm:$0x1]  ;;  %v386_v17 = vpack.c.bf16 %v382_v10, %v382_v10  ;;  %v561_v19 = vld [vmem:[%s1929_s16 + $0x3] sm:$0x1] }
  0x13   : > { %v387_v18 = vpack.c.bf16 %v383_v11, %v383_v11  ;;  %v562_v20 = vld [vmem:[%s1929_s16 + $0x13] sm:$0x1]  ;;  %v563_v21 = vld [vmem:[%s1929_s16 + $0x23] sm:$0x1]  ;;  %v560_v24 = vld [vmem:[%s1929_s16 + $0x32] sm:$0x1]  ;;  %v565_v29 = vmax.f32 %v557_v14, %v561_v19 }
  0x14   : > { %v388_v22 = vpack.c.bf16 %v384_v12, %v384_v12  ;;  %v389_v23 = vpack.c.bf16 %v385_v13, %v385_v13  ;;  %v564_v25 = vld [vmem:[%s1929_s16 + $0x33] sm:$0x1]  ;;  %v566_v26 = vmax.f32 %v558_v15, %v562_v20  ;;  %v394_v27 = vunpack.c.l.b16 %v386_v17  ;;  %v705_v49 = vld [vmem:[%s1929_s16 + $0x14] sm:$0x1]  ;;  %v709_v50 = vld [vmem:[%s1929_s16 + $0x15] sm:$0x1] }
  0x15   : > { %v395_v28 = vunpack.c.l.b16 %v387_v18  ;;  %v567_v30 = vmax.f32 %v559_v16, %v563_v21  ;;  %v568_v35 = vmax.f32 %v560_v24, %v564_v25  ;;  %v569_v40 = vpack.c.bf16 %v565_v29, %v565_v29  ;;  %v706_v54 = vld [vmem:[%s1929_s16 + $0x24] sm:$0x1]  ;;  %v710_v55 = vld [vmem:[%s1929_s16 + $0x25] sm:$0x1]  ;;  %v707_v61 = vld [vmem:[%s1929_s16 + $0x34] sm:$0x1] }
  0x16   : > { %v396_v31 = vunpack.c.l.b16 %v388_v22  ;;  %v397_v32 = vunpack.c.l.b16 %v389_v23  ;;  %v570_v33 = vpack.c.bf16 %v566_v26, %v566_v26  ;;  %v713_v56 = vmax.f32 %v705_v49, %v709_v50  ;;  %v704_v57 = vld [vmem:[%s1929_s16 + $0x4] sm:$0x1]  ;;  %v708_v58 = vld [vmem:[%s1929_s16 + $0x5] sm:$0x1]  ;;  %v711_v62 = vld [vmem:[%s1929_s16 + $0x35] sm:$0x1] }
  0x17   : > { %v398_v34 = vrot.slane %v395_v28, 7  ;;  %v571_v38 = vpack.c.bf16 %v567_v30, %v567_v30  ;;  %v572_v44 = vpack.c.bf16 %v568_v35, %v568_v35  ;;  %v577_v47 = vunpack.c.l.b16 %v569_v40  ;;  %v853_v14 = vld [vmem:[%s1929_s16 + $0x16] sm:$0x1]  ;;  %v857_v15 = vld [vmem:[%s1929_s16 + $0x17] sm:$0x1]  ;;  %vm2125_vm9 = vmand %vm521_vm7, %vm522_vm8 }
  0x18   : > { %v401_v36 = vrot.slane %v396_v31, 6  ;;  %v404_v37 = vrot.slane %v397_v32, 5  ;;  %v578_v41 = vunpack.c.l.b16 %v570_v33  ;;  %v714_v63 = vmax.f32 %v706_v54, %v710_v55  ;;  %v854_v19 = vld [vmem:[%s1929_s16 + $0x26] sm:$0x1]  ;;  %v858_v20 = vld [vmem:[%s1929_s16 + $0x27] sm:$0x1]  ;;  %vm2154_vm11 = vmand %vm521_vm7, %vm669_vm10 }
  0x19   : > { %v400_v39 = vsel %vm399_vm0, %v398_v34, %v394_v27  ;;  %v579_v46 = vunpack.c.l.b16 %v571_v38  ;;  %v580_v51 = vunpack.c.l.b16 %v572_v44  ;;  %v712_v2 = vmax.f32 %v704_v57, %v708_v58  ;;  %v852_v22 = vld [vmem:[%s1929_s16 + $0x6] sm:$0x1]  ;;  %v856_v23 = vld [vmem:[%s1929_s16 + $0x7] sm:$0x1]  ;;  %v855_v26 = vld [vmem:[%s1929_s16 + $0x36] sm:$0x1] }
  0x1a   : > { %v403_v42 = vsel %vm402_vm1, %v401_v36, %v400_v39  ;;  %v581_v48 = vrot.slane %v578_v41, 7  ;;  %v717_v3 = vpack.c.bf16 %v713_v56, %v713_v56  ;;  %v715_v5 = vmax.f32 %v707_v61, %v711_v62  ;;  %v859_v27 = vld [vmem:[%s1929_s16 + $0x37] sm:$0x1]  ;;  %v1000_v41 = vld [vmem:[%s1929_s16 + $0x18] sm:$0x1] }
  0x1b   : > { %v406_v43 = vsel %vm405_vm2, %v404_v37, %v403_v42  ;;  %v583_v52 = vrot.slane %v579_v46, 6  ;;  %v585_v59 = vrot.slane %v580_v51, 5  ;;  %v718_v6 = vpack.c.bf16 %v714_v63, %v714_v63  ;;  %v1004_v42 = vld [vmem:[%s1929_s16 + $0x19] sm:$0x1]  ;;  %v1001_v46 = vld [vmem:[%s1929_s16 + $0x28] sm:$0x1] }
  0x1c   : > { %v407_v45 = vpack.c.b16 %v406_v43, %v406_v43  ;;  %v582_v53 = vsel %vm399_vm0, %v581_v48, %v577_v47  ;;  %v716_v7 = vpack.c.bf16 %v712_v2, %v712_v2  ;;  %v725_v8 = vunpack.c.l.b16 %v717_v3  ;;  %v1005_v47 = vld [vmem:[%s1929_s16 + $0x29] sm:$0x1]  ;;  %v999_v49 = vld [vmem:[%s1929_s16 + $0x8] sm:$0x1]  ;;  %v1006_v54 = vld [vmem:[%s1929_s16 + $0x39] sm:$0x1] }
  0x1d   : > { %v584_v60 = vsel %vm402_vm1, %v583_v52, %v582_v53  ;;  %v719_v10 = vpack.c.bf16 %v715_v5, %v715_v5  ;;  %v726_v11 = vunpack.c.l.b16 %v718_v6  ;;  %v861_v21 = vmax.f32 %v853_v14, %v857_v15  ;;  %v1003_v50 = vld [vmem:[%s1929_s16 + $0x9] sm:$0x1]  ;;  %v1002_v53 = vld [vmem:[%s1929_s16 + $0x38] sm:$0x1]  ;;  %v1148_v6 = vld [vmem:[%s1929_s16 + $0x1a] sm:$0x1] }
  0x1e   : > { %1734 = vmatmul.msk.bf16.vlgmr.msra.gmra.mxu0 %vm414_vm3, %v407_v45  ;;  %1739 = vmatmul.msk.bf16.vlgmr.msra.gmra.mxu1 %vm414_vm3, %v407_v45  ;;  %v586_v4 = vsel %vm405_vm2, %v585_v59, %v584_v60  ;;  %v724_v12 = vunpack.c.l.b16 %v716_v7  ;;  %v728_v13 = vrot.slane %v725_v8, 7  ;;  %v862_v28 = vmax.f32 %v854_v19, %v858_v20  ;;  %v1152_v7 = vld [vmem:[%s1929_s16 + $0x1b] sm:$0x1]  ;;  %v1147_v14 = vld [vmem:[%s1929_s16 + $0xa] sm:$0x1] }
  0x1f   : > { %745 = vmatpush.bf16.msra.mxu0 %v1912_v0  ;;  %758 = vmatpush.bf16.msra.mxu1 %v1917_v1  ;;  %v587_v9 = vpack.c.b16 %v586_v4, %v586_v4  ;;  %v727_v16 = vunpack.c.l.b16 %v719_v10  ;;  %v730_v17 = vrot.slane %v726_v11, 6  ;;  %v860_v29 = vmax.f32 %v852_v22, %v856_v23  ;;  %v1149_v11 = vld [vmem:[%s1929_s16 + $0x2a] sm:$0x1]  ;;  %v1151_v15 = vld [vmem:[%s1929_s16 + $0xb] sm:$0x1] }
  0x20   : > { %v729_v18 = vsel %vm399_vm0, %v728_v13, %v724_v12  ;;  %v865_v30 = vpack.c.bf16 %v861_v21, %v861_v21  ;;  %v863_v32 = vmax.f32 %v855_v26, %v859_v27  ;;  %v866_v33 = vpack.c.bf16 %v862_v28, %v862_v28  ;;  %v1153_v12 = vld [vmem:[%s1929_s16 + $0x2b] sm:$0x1]  ;;  %v1154_v19 = vld [vmem:[%s1929_s16 + $0x3b] sm:$0x1] }
  0x21   : > { %v732_v24 = vrot.slane %v727_v16, 5  ;;  %v731_v25 = vsel %vm402_vm1, %v730_v17, %v729_v18  ;;  %v864_v34 = vpack.c.bf16 %v860_v29, %v860_v29  ;;  %v1008_v48 = vmax.f32 %v1000_v41, %v1004_v42  ;;  %v1150_v18 = vld [vmem:[%s1929_s16 + $0x3a] sm:$0x1]  ;;  %v1294_v41 = vld [vmem:[%s1929_s16 + $0xc] sm:$0x1] }
  0x22   : > { %v873_v35 = vunpack.c.l.b16 %v865_v30  ;;  %v867_v37 = vpack.c.bf16 %v863_v32, %v863_v32  ;;  %v874_v38 = vunpack.c.l.b16 %v866_v33  ;;  %v1009_v55 = vmax.f32 %v1001_v46, %v1005_v47  ;;  %v1295_v33 = vld [vmem:[%s1929_s16 + $0x1c] sm:$0x1]  ;;  %v1298_v42 = vld [vmem:[%s1929_s16 + $0xd] sm:$0x1]  ;;  %v1301_v46 = vld [vmem:[%s1929_s16 + $0x3d] sm:$0x1] }
  0x23   : > { %v733_v31 = vsel %vm405_vm2, %v732_v24, %v731_v25  ;;  %v872_v39 = vunpack.c.l.b16 %v864_v34  ;;  %v1007_v56 = vmax.f32 %v999_v49, %v1003_v50  ;;  %v1012_v57 = vpack.c.bf16 %v1008_v48, %v1008_v48  ;;  %v1299_v34 = vld [vmem:[%s1929_s16 + $0x1d] sm:$0x1] }
  0x24   : > { %v734_v36 = vpack.c.b16 %v733_v31, %v733_v31  ;;  %v876_v40 = vrot.slane %v873_v35, 7  ;;  %v875_v43 = vunpack.c.l.b16 %v867_v37  ;;  %v878_v44 = vrot.slane %v874_v38, 6  ;;  %v1296_v38 = vld [vmem:[%s1929_s16 + $0x2c] sm:$0x1] }
  0x25   : > { %v1010_v59 = vmax.f32 %v1002_v53, %v1006_v54  ;;  %v1013_v60 = vpack.c.bf16 %v1009_v55, %v1009_v55  ;;  %v1011_v61 = vpack.c.bf16 %v1007_v56, %v1007_v56  ;;  %v1020_v62 = vunpack.c.l.b16 %v1012_v57 }
  0x26   : > { %v877_v45 = vsel %vm399_vm0, %v876_v40, %v872_v39  ;;  %v880_v51 = vrot.slane %v875_v43, 5  ;;  %v1156_v13 = vmax.f32 %v1148_v6, %v1152_v7  ;;  %v1157_v20 = vmax.f32 %v1149_v11, %v1153_v12  ;;  %v1300_v39 = vld [vmem:[%s1929_s16 + $0x2d] sm:$0x1]  ;;  %v1442_v6 = vld [vmem:[%s1929_s16 + $0xe] sm:$0x1] }
  0x27   : > { %v879_v52 = vsel %vm402_vm1, %v878_v44, %v877_v45  ;;  %v1014_v2 = vpack.c.bf16 %v1010_v59, %v1010_v59  ;;  %v1021_v3 = vunpack.c.l.b16 %v1013_v60  ;;  %v1019_v4 = vunpack.c.l.b16 %v1011_v61  ;;  %v1297_v45 = vld [vmem:[%s1929_s16 + $0x3c] sm:$0x1]  ;;  %v1443_v60 = vld [vmem:[%s1929_s16 + $0x1e] sm:$0x1]  ;;  %v1447_v61 = vld [vmem:[%s1929_s16 + $0x1f] sm:$0x1] }
  0x28   : > { %v881_v58 = vsel %vm405_vm2, %v880_v51, %v879_v52  ;;  %v1023_v5 = vrot.slane %v1020_v62, 7  ;;  %v1155_v21 = vmax.f32 %v1147_v14, %v1151_v15  ;;  %v1160_v22 = vpack.c.bf16 %v1156_v13, %v1156_v13  ;;  %v1446_v7 = vld [vmem:[%s1929_s16 + $0xf] sm:$0x1]  ;;  %v1449_v11 = vld [vmem:[%s1929_s16 + $0x3f] sm:$0x1] }
  0x29   : > { %v882_v63 = vpack.c.b16 %v881_v58, %v881_v58  ;;  %v1022_v8 = vunpack.c.l.b16 %v1014_v2  ;;  %v1158_v24 = vmax.f32 %v1150_v18, %v1154_v19  ;;  %v1161_v25 = vpack.c.bf16 %v1157_v20, %v1157_v20 }
  0x2a   : > { %v1024_v10 = vsel %vm399_vm0, %v1023_v5, %v1019_v4  ;;  %v1159_v26 = vpack.c.bf16 %v1155_v21, %v1155_v21  ;;  %v1168_v27 = vunpack.c.l.b16 %v1160_v22  ;;  %v1303_v40 = vmax.f32 %v1295_v33, %v1299_v34  ;;  %v1448_v4 = vld [vmem:[%s1929_s16 + $0x2f] sm:$0x1] }
  0x2b   : > { %v1027_v16 = vrot.slane %v1022_v8, 5  ;;  %v1162_v29 = vpack.c.bf16 %v1158_v24, %v1158_v24  ;;  %v1169_v30 = vunpack.c.l.b16 %v1161_v25  ;;  %v1304_v47 = vmax.f32 %v1296_v38, %v1300_v39 }
  0x2c   : > { %v1167_v31 = vunpack.c.l.b16 %v1159_v26  ;;  %v1171_v32 = vrot.slane %v1168_v27, 7  ;;  %v1302_v48 = vmax.f32 %v1294_v41, %v1298_v42  ;;  %v1307_v49 = vpack.c.bf16 %v1303_v40, %v1303_v40 }
  0x2d   : > { %v1170_v35 = vunpack.c.l.b16 %v1162_v29  ;;  %v1305_v51 = vmax.f32 %v1297_v45, %v1301_v46  ;;  %v1308_v52 = vpack.c.bf16 %v1304_v47, %v1304_v47  ;;  %v1451_v5 = vmax.f32 %v1443_v60, %v1447_v61 }
  0x2e   : > { %1744 = vmatmul.msk.bf16.vlgmr.msrb.gmra.mxu0 %vm414_vm3, %v587_v9  ;;  %1745 = vmatmul.msk.bf16.vlgmr.msrb.gmra.mxu1 %vm414_vm3, %v587_v9  ;;  %v1025_v9 = vrot.slane %v1021_v3, 6  ;;  %v1172_v37 = vsel %vm399_vm0, %v1171_v32, %v1167_v31  ;;  %v1306_v53 = vpack.c.bf16 %v1302_v48, %v1302_v48  ;;  %v1315_v54 = vunpack.c.l.b16 %v1307_v49  ;;  %v1444_v3 = vld [vmem:[%s1929_s16 + $0x2e] sm:$0x1]  ;;  %v372_v31 = vld [vmem:[%s2365_s4] sm:$0x3] }
  0x2f   : > { %893 = vmatpush.bf16.msrb.mxu0 %v1912_v0  ;;  %906 = vmatpush.bf16.msrb.mxu1 %v1917_v1  ;;  %v1175_v43 = vrot.slane %v1170_v35, 5  ;;  %v1309_v56 = vpack.c.bf16 %v1305_v51, %v1305_v51  ;;  %v1316_v57 = vunpack.c.l.b16 %v1308_v52  ;;  %v1452_v12 = vmax.f32 %v1444_v3, %v1448_v4  ;;  %v373_v32 = vld [vmem:[%s2367_s6] sm:$0x3] }
  0x30   : > { %v1026_v17 = vsel %vm402_vm1, %v1025_v9, %v1024_v10  ;;  %v1314_v58 = vunpack.c.l.b16 %v1306_v53  ;;  %v1318_v59 = vrot.slane %v1315_v54, 7  ;;  %v1445_v10 = vld [vmem:[%s1929_s16 + $0x3e] sm:$0x1]  ;;  %v1450_v13 = vmax.f32 %v1442_v6, %v1446_v7 }
  0x31   : > { %v1028_v23 = vsel %vm405_vm2, %v1027_v16, %v1026_v17  ;;  %v1317_v62 = vunpack.c.l.b16 %v1309_v56  ;;  %v1455_v14 = vpack.c.bf16 %v1451_v5, %v1451_v5  ;;  %v1453_v15 = vmax.f32 %v1445_v10, %v1449_v11 }
  0x32   : > { %v1029_v28 = vpack.c.b16 %v1028_v23, %v1028_v23  ;;  %v1319_v2 = vsel %vm399_vm0, %v1318_v59, %v1314_v58  ;;  %v1454_v16 = vpack.c.bf16 %v1450_v13, %v1450_v13  ;;  %vm817_vm13 = vsmask.f32 1280 }
  0x33   : > { %v1322_v8 = vrot.slane %v1317_v62, 5  ;;  %v1463_v17 = vunpack.c.l.b16 %v1455_v14  ;;  %v1457_v19 = vpack.c.bf16 %v1453_v15, %v1453_v15  ;;  %vm2183_vm14 = vmand %vm816_vm12, %vm817_vm13  ;;  %vm964_vm15 = vsmask.f32 7942 }
  0x34   : > { %v1462_v21 = vunpack.c.l.b16 %v1454_v16  ;;  %vm1406_vm7 = vcmask 60419   ;;  %vm1407_vm8 = vsmask.f32 3328  ;;  %vm1554_vm10 = vsmask.f32 7950 }
  0x35   : > { %v1466_v22 = vrot.slane %v1463_v17, 7  ;;  %v1465_v23 = vunpack.c.l.b16 %v1457_v19 }
  0x37   : > { %v1467_v25 = vsel %vm399_vm0, %v1466_v22, %v1462_v21  ;;  %v1470_v26 = vrot.slane %v1465_v23, 5  ;;  %vm2212_vm0 = vmand %vm816_vm12, %vm964_vm15 }
  0x3e   : > { %1750 = vmatmul.msk.bf16.vlgmr.msra.gmra.mxu0 %vm414_vm3, %v734_v36  ;;  %1751 = vmatmul.msk.bf16.vlgmr.msra.gmra.mxu1 %vm414_vm3, %v734_v36  ;;  %v1173_v36 = vrot.slane %v1169_v30, 6  ;;  %v1844_v30 = vmov 0  }
  0x3f   : > { %1040 = vmatpush.bf16.msra.mxu0 %v1912_v0  ;;  %1053 = vmatpush.bf16.msra.mxu1 %v1917_v1 }
  0x40   : > { %v1174_v44 = vsel %vm402_vm1, %v1173_v36, %v1172_v37  ;;  %1819 = vset.pattern.permute.xlu0 %v1844_v30  ;;  %v368_v36 = vld [vmem:[%s2364_s3] sm:$0x3] }
  0x41   : > { %v1176_v50 = vsel %vm405_vm2, %v1175_v43, %v1174_v44  ;;  %454 = vperm.xlu0 %1819, %v372_v31   ;;  %v370_v37 = vld [vmem:[%s2366_s5] sm:$0x3]  ;;  %v2060_v40 = vpack.c.bf16 %v368_v36, %v368_v36 }
  0x42   : > { %v1177_v55 = vpack.c.b16 %v1176_v50, %v1176_v50  ;;  %v2062_v41 = vpack.c.bf16 %v370_v37, %v370_v37 }
  0x49   : > { %480 = vperm.xlu0 %1819, %v373_v32  }
  0x4e   : > { %1756 = vmatmul.msk.bf16.vlgmr.msrb.gmra.mxu0 %vm414_vm3, %v882_v63  ;;  %1757 = vmatmul.msk.bf16.vlgmr.msrb.gmra.mxu1 %vm414_vm3, %v882_v63  ;;  %v1320_v63 = vrot.slane %v1316_v57, 6 }
  0x4f   : > { %1188 = vmatpush.bf16.msrb.mxu0 %v1912_v0  ;;  %1201 = vmatpush.bf16.msrb.mxu1 %v1917_v1 }
  0x50   : > { %v1321_v9 = vsel %vm402_vm1, %v1320_v63, %v1319_v2 }
  0x5e   : > { %1762 = vmatmul.msk.bf16.vlgmr.msra.gmra.mxu0 %vm414_vm3, %v1029_v28  ;;  %1763 = vmatmul.msk.bf16.vlgmr.msra.gmra.mxu1 %vm414_vm3, %v1029_v28 }
  0x5f   : > { %1335 = vmatpush.bf16.msra.mxu0 %v1912_v0  ;;  %1348 = vmatpush.bf16.msra.mxu1 %v1917_v1 }
  0x6e   : > { %1768 = vmatmul.msk.bf16.vlgmr.msrb.gmra.mxu0 %vm414_vm3, %v1177_v55  ;;  %1769 = vmatmul.msk.bf16.vlgmr.msrb.gmra.mxu1 %vm414_vm3, %v1177_v55 }
  0x6f   : > { %1483 = vmatpush.bf16.msrb.mxu0 %v1912_v0  ;;  %1496 = vmatpush.bf16.msrb.mxu1 %v1917_v1  ;;  %v1323_v0 = vsel %vm405_vm2, %v1322_v8, %v1321_v9  ;;  %v1456_v1 = vpack.c.bf16 %v1452_v12, %v1452_v12 }
  0x70   : > { %v1324_v18 = vpack.c.b16 %v1323_v0, %v1323_v0 }
  0x71   : > { %v1464_v20 = vunpack.c.l.b16 %v1456_v1 }
  0x73   : > { %v1468_v24 = vrot.slane %v1464_v20, 6 }
  0x75   : > { %v1469_v27 = vsel %vm402_vm1, %v1468_v24, %v1467_v25  ;;  %vm1111_vm1 = vcmask 59394  }
  0x76   : > { %v1471_v28 = vsel %vm405_vm2, %v1470_v26, %v1469_v27  ;;  %vm1112_vm2 = vsmask.f32 2304 }
  0x77   : > { %v1472_v29 = vpack.c.b16 %v1471_v28, %v1471_v28 }
  0x7e   : > { %1774 = vmatmul.msk.bf16.vlgmr.msra.gmra.mxu0 %vm414_vm3, %v1324_v18  ;;  %1775 = vmatmul.msk.bf16.vlgmr.msra.gmra.mxu1 %vm414_vm3, %v1324_v18 }
  0x8e   : > { %1780 = vmatmul.msk.bf16.vlgmr.msrb.gmra.mxu0 %vm414_vm3, %v1472_v29  ;;  %1781 = vmatmul.msk.bf16.vlgmr.msrb.gmra.mxu1 %vm414_vm3, %v1472_v29  ;;  %vm2241_vm3 = vmand %vm1111_vm1, %vm1112_vm2 }
  0x9b   : > { %v427_v33 = vpop.f32.mrf.mxu0  ;;  %v446_v34 = vpop.f32.mrf.mxu1 }
  0x9c   : > { %v450_v35 = vmax.f32 %v427_v33, %v446_v34 }
  0x9e   : > { %v451_v38 = vpack.c.bf16 %v450_v35, %v450_v35  ;;  %v1845_v35 = vmov 286326784  }
  0x9f   : > { %v512_v36 = vunpack.c.l.s4 %v1845_v35 }
  0xa0   : > { %v463_v39 = vsel %vm461_vm4, %v451_v38, 0 }
  0xa1   : > { %472 = vmatpush.bf16.msra.mxu2 %v463_v39  ;;  %493 = vmatpush.bf16.msra.mxu3 %v463_v39 }
  0xa3   : > { %v429_v42 = vpop.f32.mrf.mxu0  ;;  %v448_v43 = vpop.f32.mrf.mxu1 }
  0xa4   : > { %1740 = vmatmul.msk.bf16.vlgmr.msra.gmra.mxu2 %vm457_vm5, %v2060_v40  ;;  %1741 = vmatmul.msk.bf16.vlgmr.msra.gmra.mxu3 %vm457_vm5, %v2062_v41  ;;  %v2110_v42 = vunpack.c.0.s8 %v512_v36 }
  0xab   : > { %v600_v44 = vpop.f32.mrf.mxu0  ;;  %v613_v45 = vpop.f32.mrf.mxu1 }
  0xac   : > { %v617_v46 = vmax.f32 %v600_v44, %v613_v45 }
  0xae   : > { %v618_v47 = vpack.c.bf16 %v617_v46, %v617_v46 }
  0xb0   : > { %v620_v48 = vsel %vm461_vm4, %v618_v47, 0 }
  0xb1   : > { %629 = vmatpush.bf16.msrb.mxu2 %v620_v48  ;;  %642 = vmatpush.bf16.msrb.mxu3 %v620_v48 }
  0xb3   : > { %v602_v49 = vpop.f32.mrf.mxu0  ;;  %v615_v50 = vpop.f32.mrf.mxu1 }
  0xb4   : > { %1746 = vmatmul.msk.bf16.vlgmr.msrb.gmra.mxu2 %vm457_vm5, %v2060_v40  ;;  %1747 = vmatmul.msk.bf16.vlgmr.msrb.gmra.mxu3 %vm457_vm5, %v2062_v41  ;;  %v2103_v29 = vpop.permute.xlu0 %454 }
  0xbb   : > { %v747_v51 = vpop.f32.mrf.mxu0  ;;  %v760_v52 = vpop.f32.mrf.mxu1 }
  0xbc   : > { %v764_v53 = vmax.f32 %v747_v51, %v760_v52  ;;  %v2105_v30 = vpop.permute.xlu0 %480  ;;  %v524_v51 = vld [vmem:[%s2115_s10] sm:$0x1] }
  0xbd   : > { %v551_v52 = vld [vmem:[%s2120_s13] sm:$0x1] }
  0xbe   : > { %v765_v54 = vpack.c.bf16 %v764_v53, %v764_v53 }
  0xc0   : > { %v767_v55 = vsel %vm461_vm4, %v765_v54, 0 }
  0xc1   : > { %776 = vmatpush.bf16.msra.mxu2 %v767_v55  ;;  %789 = vmatpush.bf16.msra.mxu3 %v767_v55 }
  0xc3   : > { %v749_v56 = vpop.f32.mrf.mxu0  ;;  %v762_v57 = vpop.f32.mrf.mxu1 }
  0xc4   : > { %1752 = vmatmul.msk.bf16.vlgmr.msra.gmra.mxu2 %vm457_vm5, %v2060_v40  ;;  %1753 = vmatmul.msk.bf16.vlgmr.msra.gmra.mxu3 %vm457_vm5, %v2062_v41  ;;  %v527_v57 = vld [vmem:[%s2115_s10 + $0x4] sm:$0x1] }
  0xcb   : > { %v895_v58 = vpop.f32.mrf.mxu0  ;;  %v908_v59 = vpop.f32.mrf.mxu1 }
  0xcc   : > { %v912_v60 = vmax.f32 %v895_v58, %v908_v59  ;;  %v554_v58 = vld [vmem:[%s2120_s13 + $0x4] sm:$0x1] }
  0xce   : > { %v913_v61 = vpack.c.bf16 %v912_v60, %v912_v60 }
  0xd0   : > { %v915_v62 = vsel %vm461_vm4, %v913_v61, 0 }
  0xd1   : > { %924 = vmatpush.bf16.msrb.mxu2 %v915_v62  ;;  %937 = vmatpush.bf16.msrb.mxu3 %v915_v62 }
  0xd3   : > { %v897_v63 = vpop.f32.mrf.mxu0  ;;  %v910_v2 = vpop.f32.mrf.mxu1 }
  0xd4   : > { %1758 = vmatmul.msk.bf16.vlgmr.msrb.gmra.mxu2 %vm457_vm5, %v2060_v40  ;;  %1759 = vmatmul.msk.bf16.vlgmr.msrb.gmra.mxu3 %vm457_vm5, %v2062_v41 }
  0xdb   : > { %v1042_v3 = vpop.f32.mrf.mxu0  ;;  %v1055_v4 = vpop.f32.mrf.mxu1 }
  0xdc   : > { %v1059_v5 = vmax.f32 %v1042_v3, %v1055_v4 }
  0xde   : > { %v1060_v6 = vpack.c.bf16 %v1059_v5, %v1059_v5 }
  0xe0   : > { %v1062_v7 = vsel %vm461_vm4, %v1060_v6, 0 }
  0xe1   : > { %1071 = vmatpush.bf16.msra.mxu2 %v1062_v7  ;;  %1084 = vmatpush.bf16.msra.mxu3 %v1062_v7 }
  0xe3   : > { %v1044_v8 = vpop.f32.mrf.mxu0  ;;  %v1057_v9 = vpop.f32.mrf.mxu1 }
  0xe4   : > { %1764 = vmatmul.msk.bf16.vlgmr.msra.gmra.mxu2 %vm457_vm5, %v2060_v40  ;;  %1765 = vmatmul.msk.bf16.vlgmr.msra.gmra.mxu3 %vm457_vm5, %v2062_v41 }
  0xeb   : > { %v1190_v10 = vpop.f32.mrf.mxu0  ;;  %v1203_v11 = vpop.f32.mrf.mxu1 }
  0xec   : > { %v1207_v12 = vmax.f32 %v1190_v10, %v1203_v11 }
  0xee   : > { %v1208_v13 = vpack.c.bf16 %v1207_v12, %v1207_v12 }
  0xf0   : > { %v1210_v14 = vsel %vm461_vm4, %v1208_v13, 0 }
  0xf1   : > { %1219 = vmatpush.bf16.msrb.mxu2 %v1210_v14  ;;  %1232 = vmatpush.bf16.msrb.mxu3 %v1210_v14 }
  0xf3   : > { %v1192_v0 = vpop.f32.mrf.mxu0  ;;  %v1205_v15 = vpop.f32.mrf.mxu1 }
  0xf4   : > { %1770 = vmatmul.msk.bf16.vlgmr.msrb.gmra.mxu2 %vm457_vm5, %v2060_v40  ;;  %1771 = vmatmul.msk.bf16.vlgmr.msrb.gmra.mxu3 %vm457_vm5, %v2062_v41 }
  0xfb   : > { %v1337_v1 = vpop.f32.mrf.mxu0  ;;  %v1350_v16 = vpop.f32.mrf.mxu1 }
  0xfc   : > { %v1354_v17 = vmax.f32 %v1337_v1, %v1350_v16 }
  0xfe   : > { %v1355_v18 = vpack.c.bf16 %v1354_v17, %v1354_v17 }
 0x100   : > { %v1357_v19 = vsel %vm461_vm4, %v1355_v18, 0 }
 0x101   : > { %1366 = vmatpush.bf16.msra.mxu2 %v1357_v19  ;;  %1379 = vmatpush.bf16.msra.mxu3 %v1357_v19 }
 0x103   : > { %v1339_v20 = vpop.f32.mrf.mxu0  ;;  %v1352_v21 = vpop.f32.mrf.mxu1 }
 0x104   : > { %1776 = vmatmul.msk.bf16.vlgmr.msra.gmra.mxu2 %vm457_vm5, %v2060_v40  ;;  %1777 = vmatmul.msk.bf16.vlgmr.msra.gmra.mxu3 %vm457_vm5, %v2062_v41 }
 0x10b   : > { %v1485_v22 = vpop.f32.mrf.mxu0  ;;  %v1498_v23 = vpop.f32.mrf.mxu1 }
 0x10c   : > { %v1502_v24 = vmax.f32 %v1485_v22, %v1498_v23 }
 0x10e   : > { %v1503_v25 = vpack.c.bf16 %v1502_v24, %v1502_v24 }
 0x110   : > { %v1505_v26 = vsel %vm461_vm4, %v1503_v25, 0  ;;  %vm1259_vm4 = vsmask.f32 7946 }
 0x111   : > { %1514 = vmatpush.bf16.msrb.mxu2 %v1505_v26  ;;  %1527 = vmatpush.bf16.msrb.mxu3 %v1505_v26 }
 0x113   : > { %v1487_v27 = vpop.f32.mrf.mxu0  ;;  %v1500_v28 = vpop.f32.mrf.mxu1 }
 0x114   : > { %1782 = vmatmul.msk.bf16.vlgmr.msrb.gmra.mxu2 %vm457_vm5, %v2060_v40  ;;  %1783 = vmatmul.msk.bf16.vlgmr.msrb.gmra.mxu3 %vm457_vm5, %v2062_v41  ;;  %vm2270_vm5 = vmand %vm1111_vm1, %vm1259_vm4 }
 0x127   : > { %v474_v31 = vpop.f32.mrf.mxu2  ;;  %v495_v32 = vpop.f32.mrf.mxu3 }
 0x128   : > { %v475_v33 = vadd.f32 %v474_v31, %v2103_v29  ;;  %v496_v34 = vadd.f32 %v495_v32, %v2105_v30 }
 0x12a   : > { %v499_v37 = vpack.c.bf16 %v475_v33, %v475_v33  ;;  %v530_v38 = vpack.c.bf16 %v496_v34, %v496_v34 }
 0x12c   : > { %v501_v39 = vrot.slane %v499_v37, 3  ;;  %v532_v40 = vrot.slane %v530_v38, 3 }
 0x12e   : > { %v505_v41 = vsel %vm502_vm6, %v499_v37, %v501_v39  ;;  %v535_v43 = vsel %vm502_vm6, %v530_v38, %v532_v40 }
 0x12f   : > { %v508_v44 = vunpack.i.h.s16 %v505_v41  ;;  %v1742_v45 = vpack.i.b16 %v505_v41, %v505_v41  ;;  %v476_v46 = vpop.f32.mrf.mxu2  ;;  %v497_v47 = vpop.f32.mrf.mxu3  ;;  %v538_v48 = vunpack.i.h.s16 %v535_v43  ;;  %v1743_v49 = vpack.i.b16 %v535_v43, %v535_v43 }
 0x131   : > { %v510_v53 = vpack.i.b16 %v508_v44, %v508_v44  ;;  %v540_v54 = vpack.i.b16 %v538_v48, %v538_v48  ;;  %v544_v55 = vperm.slane %v1743_v49, %v2110_v42  ;;  %v514_v56 = vperm.slane %v1742_v45, %v2110_v42 }
 0x133   : > { %v548_v59 = vperm.slane %v540_v54, %v2110_v42  ;;  %v518_v60 = vperm.slane %v510_v53, %v2110_v42  ;;  %v525_v61 = vsel %vm2125_vm9, %v514_v56, %v524_v51  ;;  %v552_v62 = vsel %vm2125_vm9, %v544_v55, %v551_v52  ;;  %v819_v52 = vld [vmem:[%s2115_s10] sm:$0x2] }
 0x134   : > { %526 = vst [vmem:[%s2115_s10] sm:$0x1] %v525_v61  ;;  %v846_v53 = vld [vmem:[%s2120_s13] sm:$0x2] }
 0x135   : > { %v528_v63 = vsel %vm2125_vm9, %v518_v60, %v527_v57  ;;  %553 = vst [vmem:[%s2120_s13] sm:$0x1] %v552_v62  ;;  %v555_v2 = vsel %vm2125_vm9, %v548_v59, %v554_v58  ;;  %v822_v58 = vld [vmem:[%s2115_s10 + $0x4] sm:$0x2]  ;;  %vm2299_vm9 = vmand %vm1406_vm7, %vm1407_vm8 }
 0x136   : > { %529 = vst [vmem:[%s2115_s10 + $0x4] sm:$0x1] %v528_v63  ;;  %v849_v59 = vld [vmem:[%s2120_s13 + $0x4] sm:$0x2] }
 0x137   : > { %556 = vst [vmem:[%s2120_s13 + $0x4] sm:$0x1] %v555_v2  ;;  %v631_v3 = vpop.f32.mrf.mxu2  ;;  %v644_v4 = vpop.f32.mrf.mxu3 }
 0x138   : > { %v632_v5 = vadd.f32 %v631_v3, %v2103_v29  ;;  %v645_v6 = vadd.f32 %v644_v4, %v2105_v30 }
 0x13a   : > { %v648_v7 = vpack.c.bf16 %v632_v5, %v632_v5  ;;  %v677_v8 = vpack.c.bf16 %v645_v6, %v645_v6 }
 0x13b   : > { %v671_v22 = vld [vmem:[%s2115_s10] sm:$0x1] }
 0x13c   : > { %v650_v9 = vrot.slane %v648_v7, 3  ;;  %v679_v10 = vrot.slane %v677_v8, 3  ;;  %v698_v23 = vld [vmem:[%s2120_s13] sm:$0x1] }
 0x13d   : > { %v674_v28 = vld [vmem:[%s2115_s10 + $0x4] sm:$0x1] }
 0x13e   : > { %v653_v11 = vsel %vm502_vm6, %v648_v7, %v650_v9  ;;  %v682_v12 = vsel %vm502_vm6, %v677_v8, %v679_v10  ;;  %v701_v31 = vld [vmem:[%s2120_s13 + $0x4] sm:$0x1] }
 0x13f   : > { %v656_v13 = vunpack.i.h.s16 %v653_v11  ;;  %v1748_v14 = vpack.i.b16 %v653_v11, %v653_v11  ;;  %v685_v0 = vunpack.i.h.s16 %v682_v12  ;;  %v1749_v15 = vpack.i.b16 %v682_v12, %v682_v12  ;;  %v633_v1 = vpop.f32.mrf.mxu2  ;;  %v646_v16 = vpop.f32.mrf.mxu3 }
 0x141   : > { %v658_v18 = vpack.i.b16 %v656_v13, %v656_v13  ;;  %v662_v19 = vperm.slane %v1748_v14, %v2110_v42  ;;  %v687_v20 = vpack.i.b16 %v685_v0, %v685_v0  ;;  %v691_v21 = vperm.slane %v1749_v15, %v2110_v42 }
 0x143   : > { %v666_v24 = vperm.slane %v658_v18, %v2110_v42  ;;  %v672_v25 = vsel %vm2154_vm11, %v662_v19, %v671_v22  ;;  %v695_v26 = vperm.slane %v687_v20, %v2110_v42  ;;  %v699_v27 = vsel %vm2154_vm11, %v691_v21, %v698_v23 }
 0x144   : > { %673 = vst [vmem:[%s2115_s10] sm:$0x1] %v672_v25 }
 0x145   : > { %v675_v32 = vsel %vm2154_vm11, %v666_v24, %v674_v28  ;;  %700 = vst [vmem:[%s2120_s13] sm:$0x1] %v699_v27  ;;  %v702_v33 = vsel %vm2154_vm11, %v695_v26, %v701_v31  ;;  %vm2328_vm11 = vmand %vm1406_vm7, %vm1554_vm10 }
 0x146   : > { %676 = vst [vmem:[%s2115_s10 + $0x4] sm:$0x1] %v675_v32 }
 0x147   : > { %703 = vst [vmem:[%s2120_s13 + $0x4] sm:$0x1] %v702_v33  ;;  %v778_v34 = vpop.f32.mrf.mxu2  ;;  %v791_v35 = vpop.f32.mrf.mxu3 }
 0x148   : > { %v779_v36 = vadd.f32 %v778_v34, %v2103_v29  ;;  %v792_v37 = vadd.f32 %v791_v35, %v2105_v30 }
 0x14a   : > { %v795_v38 = vpack.c.bf16 %v779_v36, %v779_v36  ;;  %v825_v39 = vpack.c.bf16 %v792_v37, %v792_v37 }
 0x14c   : > { %v797_v40 = vrot.slane %v795_v38, 3  ;;  %v827_v41 = vrot.slane %v825_v39, 3 }
 0x14e   : > { %v800_v43 = vsel %vm502_vm6, %v795_v38, %v797_v40  ;;  %v830_v44 = vsel %vm502_vm6, %v825_v39, %v827_v41 }
 0x14f   : > { %v803_v45 = vunpack.i.h.s16 %v800_v43  ;;  %v1754_v46 = vpack.i.b16 %v800_v43, %v800_v43  ;;  %v833_v47 = vunpack.i.h.s16 %v830_v44  ;;  %v1755_v48 = vpack.i.b16 %v830_v44, %v830_v44  ;;  %v780_v49 = vpop.f32.mrf.mxu2  ;;  %v793_v50 = vpop.f32.mrf.mxu3 }
 0x151   : > { %v805_v54 = vpack.i.b16 %v803_v45, %v803_v45  ;;  %v809_v55 = vperm.slane %v1754_v46, %v2110_v42  ;;  %v835_v56 = vpack.i.b16 %v833_v47, %v833_v47  ;;  %v839_v57 = vperm.slane %v1755_v48, %v2110_v42 }
 0x153   : > { %v813_v60 = vperm.slane %v805_v54, %v2110_v42  ;;  %v820_v61 = vsel %vm2183_vm14, %v809_v55, %v819_v52  ;;  %v843_v62 = vperm.slane %v835_v56, %v2110_v42  ;;  %v847_v63 = vsel %vm2183_vm14, %v839_v57, %v846_v53  ;;  %v1114_v53 = vld [vmem:[%s2115_s10] sm:$0x4] }
 0x154   : > { %821 = vst [vmem:[%s2115_s10] sm:$0x2] %v820_v61  ;;  %v1141_v54 = vld [vmem:[%s2120_s13] sm:$0x4] }
 0x155   : > { %v823_v2 = vsel %vm2183_vm14, %v813_v60, %v822_v58  ;;  %848 = vst [vmem:[%s2120_s13] sm:$0x2] %v847_v63  ;;  %v850_v3 = vsel %vm2183_vm14, %v843_v62, %v849_v59  ;;  %v1117_v59 = vld [vmem:[%s2115_s10 + $0x4] sm:$0x4] }
 0x156   : > { %824 = vst [vmem:[%s2115_s10 + $0x4] sm:$0x2] %v823_v2  ;;  %v1144_v60 = vld [vmem:[%s2120_s13 + $0x4] sm:$0x4] }
 0x157   : > { %851 = vst [vmem:[%s2120_s13 + $0x4] sm:$0x2] %v850_v3  ;;  %v926_v4 = vpop.f32.mrf.mxu2  ;;  %v939_v5 = vpop.f32.mrf.mxu3 }
 0x158   : > { %v927_v6 = vadd.f32 %v926_v4, %v2103_v29  ;;  %v940_v7 = vadd.f32 %v939_v5, %v2105_v30 }
 0x15a   : > { %v943_v8 = vpack.c.bf16 %v927_v6, %v927_v6  ;;  %v972_v9 = vpack.c.bf16 %v940_v7, %v940_v7 }
 0x15b   : > { %v966_v23 = vld [vmem:[%s2115_s10] sm:$0x2] }
 0x15c   : > { %v945_v10 = vrot.slane %v943_v8, 3  ;;  %v974_v11 = vrot.slane %v972_v9, 3  ;;  %v993_v24 = vld [vmem:[%s2120_s13] sm:$0x2] }
 0x15d   : > { %v969_v31 = vld [vmem:[%s2115_s10 + $0x4] sm:$0x2] }
 0x15e   : > { %v948_v12 = vsel %vm502_vm6, %v943_v8, %v945_v10  ;;  %v977_v13 = vsel %vm502_vm6, %v972_v9, %v974_v11  ;;  %v996_v32 = vld [vmem:[%s2120_s13 + $0x4] sm:$0x2] }
 0x15f   : > { %v951_v14 = vunpack.i.h.s16 %v948_v12  ;;  %v1760_v0 = vpack.i.b16 %v948_v12, %v948_v12  ;;  %v980_v15 = vunpack.i.h.s16 %v977_v13  ;;  %v1761_v1 = vpack.i.b16 %v977_v13, %v977_v13  ;;  %v928_v16 = vpop.f32.mrf.mxu2  ;;  %v941_v17 = vpop.f32.mrf.mxu3 }
 0x161   : > { %v953_v19 = vpack.i.b16 %v951_v14, %v951_v14  ;;  %v957_v20 = vperm.slane %v1760_v0, %v2110_v42  ;;  %v982_v21 = vpack.i.b16 %v980_v15, %v980_v15  ;;  %v986_v22 = vperm.slane %v1761_v1, %v2110_v42 }
 0x163   : > { %v961_v25 = vperm.slane %v953_v19, %v2110_v42  ;;  %v967_v26 = vsel %vm2212_vm0, %v957_v20, %v966_v23  ;;  %v990_v27 = vperm.slane %v982_v21, %v2110_v42  ;;  %v994_v28 = vsel %vm2212_vm0, %v986_v22, %v993_v24 }
 0x164   : > { %968 = vst [vmem:[%s2115_s10] sm:$0x2] %v967_v26 }
 0x165   : > { %v970_v33 = vsel %vm2212_vm0, %v961_v25, %v969_v31  ;;  %995 = vst [vmem:[%s2120_s13] sm:$0x2] %v994_v28  ;;  %v997_v34 = vsel %vm2212_vm0, %v990_v27, %v996_v32 }
 0x166   : > { %971 = vst [vmem:[%s2115_s10 + $0x4] sm:$0x2] %v970_v33 }
 0x167   : > { %998 = vst [vmem:[%s2120_s13 + $0x4] sm:$0x2] %v997_v34  ;;  %v1073_v35 = vpop.f32.mrf.mxu2  ;;  %v1086_v36 = vpop.f32.mrf.mxu3 }
 0x168   : > { %v1074_v37 = vadd.f32 %v1073_v35, %v2103_v29  ;;  %v1087_v38 = vadd.f32 %v1086_v36, %v2105_v30 }
 0x16a   : > { %v1090_v39 = vpack.c.bf16 %v1074_v37, %v1074_v37  ;;  %v1120_v40 = vpack.c.bf16 %v1087_v38, %v1087_v38 }
 0x16c   : > { %v1092_v41 = vrot.slane %v1090_v39, 3  ;;  %v1122_v43 = vrot.slane %v1120_v40, 3 }
 0x16e   : > { %v1095_v44 = vsel %vm502_vm6, %v1090_v39, %v1092_v41  ;;  %v1125_v45 = vsel %vm502_vm6, %v1120_v40, %v1122_v43 }
 0x16f   : > { %v1098_v46 = vunpack.i.h.s16 %v1095_v44  ;;  %v1766_v47 = vpack.i.b16 %v1095_v44, %v1095_v44  ;;  %v1128_v48 = vunpack.i.h.s16 %v1125_v45  ;;  %v1767_v49 = vpack.i.b16 %v1125_v45, %v1125_v45  ;;  %v1075_v50 = vpop.f32.mrf.mxu2  ;;  %v1088_v51 = vpop.f32.mrf.mxu3 }
 0x171   : > { %v1100_v55 = vpack.i.b16 %v1098_v46, %v1098_v46  ;;  %v1104_v56 = vperm.slane %v1766_v47, %v2110_v42  ;;  %v1130_v57 = vpack.i.b16 %v1128_v48, %v1128_v48  ;;  %v1134_v58 = vperm.slane %v1767_v49, %v2110_v42 }
 0x173   : > { %v1108_v61 = vperm.slane %v1100_v55, %v2110_v42  ;;  %v1115_v62 = vsel %vm2241_vm3, %v1104_v56, %v1114_v53  ;;  %v1138_v63 = vperm.slane %v1130_v57, %v2110_v42  ;;  %v1142_v2 = vsel %vm2241_vm3, %v1134_v58, %v1141_v54  ;;  %v1409_v54 = vld [vmem:[%s2115_s10] sm:$0x8] }
 0x174   : > { %1116 = vst [vmem:[%s2115_s10] sm:$0x4] %v1115_v62  ;;  %v1436_v55 = vld [vmem:[%s2120_s13] sm:$0x8] }
 0x175   : > { %v1118_v3 = vsel %vm2241_vm3, %v1108_v61, %v1117_v59  ;;  %1143 = vst [vmem:[%s2120_s13] sm:$0x4] %v1142_v2  ;;  %v1145_v4 = vsel %vm2241_vm3, %v1138_v63, %v1144_v60  ;;  %v1412_v60 = vld [vmem:[%s2115_s10 + $0x4] sm:$0x8] }
 0x176   : > { %1119 = vst [vmem:[%s2115_s10 + $0x4] sm:$0x4] %v1118_v3  ;;  %v1439_v61 = vld [vmem:[%s2120_s13 + $0x4] sm:$0x8] }
 0x177   : > { %1146 = vst [vmem:[%s2120_s13 + $0x4] sm:$0x4] %v1145_v4  ;;  %v1221_v5 = vpop.f32.mrf.mxu2  ;;  %v1234_v6 = vpop.f32.mrf.mxu3 }
 0x178   : > { %v1222_v7 = vadd.f32 %v1221_v5, %v2103_v29  ;;  %v1235_v8 = vadd.f32 %v1234_v6, %v2105_v30 }
 0x17a   : > { %v1238_v9 = vpack.c.bf16 %v1222_v7, %v1222_v7  ;;  %v1267_v10 = vpack.c.bf16 %v1235_v8, %v1235_v8 }
 0x17b   : > { %v1261_v24 = vld [vmem:[%s2115_s10] sm:$0x4] }
 0x17c   : > { %v1240_v11 = vrot.slane %v1238_v9, 3  ;;  %v1269_v12 = vrot.slane %v1267_v10, 3  ;;  %v1288_v25 = vld [vmem:[%s2120_s13] sm:$0x4] }
 0x17d   : > { %v1264_v32 = vld [vmem:[%s2115_s10 + $0x4] sm:$0x4] }
 0x17e   : > { %v1243_v13 = vsel %vm502_vm6, %v1238_v9, %v1240_v11  ;;  %v1272_v14 = vsel %vm502_vm6, %v1267_v10, %v1269_v12  ;;  %v1291_v33 = vld [vmem:[%s2120_s13 + $0x4] sm:$0x4] }
 0x17f   : > { %v1246_v0 = vunpack.i.h.s16 %v1243_v13  ;;  %v1772_v15 = vpack.i.b16 %v1243_v13, %v1243_v13  ;;  %v1275_v1 = vunpack.i.h.s16 %v1272_v14  ;;  %v1773_v16 = vpack.i.b16 %v1272_v14, %v1272_v14  ;;  %v1223_v17 = vpop.f32.mrf.mxu2  ;;  %v1236_v18 = vpop.f32.mrf.mxu3 }
 0x181   : > { %v1248_v20 = vpack.i.b16 %v1246_v0, %v1246_v0  ;;  %v1252_v21 = vperm.slane %v1772_v15, %v2110_v42  ;;  %v1277_v22 = vpack.i.b16 %v1275_v1, %v1275_v1  ;;  %v1281_v23 = vperm.slane %v1773_v16, %v2110_v42 }
 0x183   : > { %v1256_v26 = vperm.slane %v1248_v20, %v2110_v42  ;;  %v1262_v27 = vsel %vm2270_vm5, %v1252_v21, %v1261_v24  ;;  %v1285_v28 = vperm.slane %v1277_v22, %v2110_v42  ;;  %v1289_v31 = vsel %vm2270_vm5, %v1281_v23, %v1288_v25 }
 0x184   : > { %1263 = vst [vmem:[%s2115_s10] sm:$0x4] %v1262_v27 }
 0x185   : > { %v1265_v34 = vsel %vm2270_vm5, %v1256_v26, %v1264_v32  ;;  %1290 = vst [vmem:[%s2120_s13] sm:$0x4] %v1289_v31  ;;  %v1292_v35 = vsel %vm2270_vm5, %v1285_v28, %v1291_v33 }
 0x186   : > { %1266 = vst [vmem:[%s2115_s10 + $0x4] sm:$0x4] %v1265_v34 }
 0x187   : > { %1293 = vst [vmem:[%s2120_s13 + $0x4] sm:$0x4] %v1292_v35  ;;  %v1368_v36 = vpop.f32.mrf.mxu2  ;;  %v1381_v37 = vpop.f32.mrf.mxu3 }
 0x188   : > { %v1369_v38 = vadd.f32 %v1368_v36, %v2103_v29  ;;  %v1382_v39 = vadd.f32 %v1381_v37, %v2105_v30 }
 0x18a   : > { %v1385_v40 = vpack.c.bf16 %v1369_v38, %v1369_v38  ;;  %v1415_v41 = vpack.c.bf16 %v1382_v39, %v1382_v39 }
 0x18c   : > { %v1387_v43 = vrot.slane %v1385_v40, 3  ;;  %v1417_v44 = vrot.slane %v1415_v41, 3 }
 0x18e   : > { %v1390_v45 = vsel %vm502_vm6, %v1385_v40, %v1387_v43  ;;  %v1420_v46 = vsel %vm502_vm6, %v1415_v41, %v1417_v44 }
 0x18f   : > { %v1393_v47 = vunpack.i.h.s16 %v1390_v45  ;;  %v1778_v48 = vpack.i.b16 %v1390_v45, %v1390_v45  ;;  %v1423_v49 = vunpack.i.h.s16 %v1420_v46  ;;  %v1779_v50 = vpack.i.b16 %v1420_v46, %v1420_v46  ;;  %v1370_v51 = vpop.f32.mrf.mxu2  ;;  %v1383_v52 = vpop.f32.mrf.mxu3 }
 0x191   : > { %v1395_v56 = vpack.i.b16 %v1393_v47, %v1393_v47  ;;  %v1399_v57 = vperm.slane %v1778_v48, %v2110_v42  ;;  %v1425_v58 = vpack.i.b16 %v1423_v49, %v1423_v49  ;;  %v1429_v59 = vperm.slane %v1779_v50, %v2110_v42 }
 0x193   : > { %v1403_v62 = vperm.slane %v1395_v56, %v2110_v42  ;;  %v1410_v63 = vsel %vm2299_vm9, %v1399_v57, %v1409_v54  ;;  %v1433_v2 = vperm.slane %v1425_v58, %v2110_v42  ;;  %v1437_v3 = vsel %vm2299_vm9, %v1429_v59, %v1436_v55 }
 0x194   : > { %1411 = vst [vmem:[%s2115_s10] sm:$0x8] %v1410_v63 }
 0x195   : > { %v1413_v4 = vsel %vm2299_vm9, %v1403_v62, %v1412_v60  ;;  %1438 = vst [vmem:[%s2120_s13] sm:$0x8] %v1437_v3  ;;  %v1440_v5 = vsel %vm2299_vm9, %v1433_v2, %v1439_v61 }
 0x196   : > { %1414 = vst [vmem:[%s2115_s10 + $0x4] sm:$0x8] %v1413_v4 }
 0x197   : > { %1441 = vst [vmem:[%s2120_s13 + $0x4] sm:$0x8] %v1440_v5  ;;  %v1516_v6 = vpop.f32.mrf.mxu2  ;;  %v1529_v7 = vpop.f32.mrf.mxu3 }
 0x198   : > { %v1517_v8 = vadd.f32 %v1516_v6, %v2103_v29  ;;  %v1530_v9 = vadd.f32 %v1529_v7, %v2105_v30 }
 0x19a   : > { %v1533_v10 = vpack.c.bf16 %v1517_v8, %v1517_v8  ;;  %v1562_v11 = vpack.c.bf16 %v1530_v9, %v1530_v9 }
 0x19b   : > { %v1556_v23 = vld [vmem:[%s2115_s10] sm:$0x8] }
 0x19c   : > { %v1535_v12 = vrot.slane %v1533_v10, 3  ;;  %v1564_v13 = vrot.slane %v1562_v11, 3  ;;  %v1583_v24 = vld [vmem:[%s2120_s13] sm:$0x8] }
 0x19d   : > { %v1559_v31 = vld [vmem:[%s2115_s10 + $0x4] sm:$0x8] }
 0x19e   : > { %v1538_v14 = vsel %vm502_vm6, %v1533_v10, %v1535_v12  ;;  %v1567_v0 = vsel %vm502_vm6, %v1562_v11, %v1564_v13  ;;  %v1586_v32 = vld [vmem:[%s2120_s13 + $0x4] sm:$0x8] }
 0x19f   : > { %v1541_v15 = vunpack.i.h.s16 %v1538_v14  ;;  %v1784_v1 = vpack.i.b16 %v1538_v14, %v1538_v14  ;;  %v1570_v16 = vunpack.i.h.s16 %v1567_v0  ;;  %v1785_v17 = vpack.i.b16 %v1567_v0, %v1567_v0  ;;  %v1518_v29 = vpop.f32.mrf.mxu2  ;;  %v1531_v30 = vpop.f32.mrf.mxu3 }
 0x1a1   : > { %v1543_v19 = vpack.i.b16 %v1541_v15, %v1541_v15  ;;  %v1547_v20 = vperm.slane %v1784_v1, %v2110_v42  ;;  %v1572_v21 = vpack.i.b16 %v1570_v16, %v1570_v16  ;;  %v1576_v22 = vperm.slane %v1785_v17, %v2110_v42 }
 0x1a3   : > { %v1551_v25 = vperm.slane %v1543_v19, %v2110_v42  ;;  %v1557_v26 = vsel %vm2328_vm11, %v1547_v20, %v1556_v23  ;;  %v1580_v27 = vperm.slane %v1572_v21, %v2110_v42  ;;  %v1584_v28 = vsel %vm2328_vm11, %v1576_v22, %v1583_v24 }
 0x1a4   : > { %1558 = vst [vmem:[%s2115_s10] sm:$0x8] %v1557_v26 }
 0x1a5   : > { %v1560_v33 = vsel %vm2328_vm11, %v1551_v25, %v1559_v31  ;;  %1585 = vst [vmem:[%s2120_s13] sm:$0x8] %v1584_v28  ;;  %v1587_v34 = vsel %vm2328_vm11, %v1580_v27, %v1586_v32 }
 0x1a6   : > { %1561 = vst [vmem:[%s2115_s10 + $0x4] sm:$0x8] %v1560_v33 }
 0x1a7   : > { %1588 = vst [vmem:[%s2120_s13 + $0x4] sm:$0x8] %v1587_v34 }
 0x1a8 PF: > { %s19_s29 = sadd.s32 1, %s1842_s29   ;;  %s2386_s27 = smov %s1838_s28 }
 0x1a9   : > { %p16_p5 = scmp.ge.s32.totalorder %s19_s29, 4   ;;  %s2387_s28 = smov %s2389_s30 }
 0x1ab   :  { %18 = sbr.rel (!%p16_p5) target bundleno = 2 (0x2), region = 90 }

// kernel: _lambda_.7
= control target key start
LH: loop header
LB: loop body
LE: loop exit
PB: predicated region body
PF: predicated region fallthrough
CT: control target
= control target key end

     0   :  { %s529_s15 = smov 0   ;;  %s531_s16 = smov 0   ;;  %s575_s0 = inlined_call_operand.vmem [shape: bf16[2,2,256], index: 0, kind: input, shape index: {}]   ;;  %s576_s1 = inlined_call_operand.vmem [shape: f32[2,4,256], index: 1, kind: input, shape index: {}]   ;;  %s577_s2 = inlined_call_operand.vmem [shape: f32[4,2], index: 2, kind: input, shape index: {}]   ;;  %s578_s3 = inlined_call_operand.vmem [shape: f32[4,1], index: 3, kind: input, shape index: {}]   ;;  %s579_s4 = inlined_call_operand.vmem [shape: f32[2,4,256], index: 4, kind: output, shape index: {}]  }
   0x1   :  { %s533_s17 = smov 0  }
   0x2 LB: > { %s26_s18 = sadd.s32 1, %s497_s16  ;;  %p441_p0 = scmp.ge.s32.totalorder %s501_s17, 1  ;;  %s501_s17 = sphi %s533_s17, %s14_s17   ;;  %s497_s16 = sphi %s531_s16, %s581_s16   ;;  %s493_s15 = sphi %s529_s15, %s580_s15  }
   0x3   : > { %p28_p1 = scmp.ge.s32.totalorder %s26_s18, 2  ;;  %p199_p2 = scmp.lt.s32.totalorder %s501_s17, 3 }
   0x5   : > { %s583_s18 = smov (%p28_p1, %s26_s18), 0  ;;  %p200_p3 = pnand %p441_p0, %p199_p2 }
   0x6   : > { %p242_p4 = scmp.lt.s32.totalorder (!%p200_p3), %s493_s15, 1 }
   0x7   : > { %203 = sbr.rel (%p200_p3) target bundleno = 162 (0xa2), region = 36 }
   0xc   : > { %v503_v0 = vmov 0   ;;  %v274_v1 = vld [vmem:[%s578_s3] sm:$0xf]  ;;  %s585_s15 = smov (!%p242_p4, %s493_s15), 1  ;;  %vm288_vm0 = vcmask 1040384   ;;  %vm284_vm1 = vcmask 15360  }
   0xd   : > { %478 = vset.pattern.permute.xlu0 %v503_v0  ;;  %s442_s21 = sshll.u32 %s585_s15, 1  ;;  %s451_s25 = sshll.u32 %s585_s15, 3  ;;  %v271_v4 = vld [vmem:[%s577_s2] sm:$0xf]  ;;  %vm331_vm2 = vcmask 1043456  }
   0xe   : > { %277 = vperm.xlu0 %478, %v274_v1   ;;  %s248_s24 = scalar_lea.vmem %s575_s0, %s442_s21  ;;  %s258_s28 = scalar_lea.vmem %s576_s1, %s451_s25  ;;  %v272_v9 = vpack.c.bf16 %v271_v4, %v271_v4 }
   0xf   : > { %v273_v2 = vld [vmem:[%s248_s24] sm:$0x3]  ;;  %s268_s7 = scalar_lea.vmem %s579_s4, %s451_s25 }
  0x10   : > { %281 = vst [vmem:[#allocation1] ss:$9 sm:$0xff] %v273_v2  ;;  %v319_v3 = vld [vmem:[%s258_s28] sm:$0xff] }
  0x17   : > { %v282_v5 = vld [vmem:[#allocation1] sm:$0xff]  ;;  %v283_v6 = vld [vmem:[#allocation1 + $0x9] sm:$0xff] }
  0x18   : > { %v289_v7 = vsel %vm288_vm0, %v282_v5, 0  ;;  %v291_v8 = vsel %vm288_vm0, %v283_v6, 0  ;;  %321 = vst [vmem:[#allocation1] ss:$2 sm:$0xff] %v319_v3 }
  0x19   : > { %300 = vmatpush.bf16.msra.mxu0 %v289_v7  ;;  %313 = vmatpush.bf16.msra.mxu1 %v291_v8 }
  0x1c   : > { %447 = vmatmul.msk.bf16.vlgmr.msra.gmra.mxu0 %vm284_vm1, %v272_v9  ;;  %448 = vmatmul.msk.bf16.vlgmr.msra.gmra.mxu1 %vm284_vm1, %v272_v9 }
  0x1f   : > { %v323_v13 = vld.sshfl [vmem:[#allocation1 + $0x8] sm:$0xff pattern:$0x75316420]  ;;  %v322_v16 = vld.sshfl [vmem:[#allocation1] sm:$0xff pattern:$0x75316420] }
  0x80   : > { %v278_v10 = vpop.permute.xlu0 %277 }
  0x99   : > { %v302_v11 = vpop.f32.mrf.mxu0  ;;  %v315_v12 = vpop.f32.mrf.mxu1 }
  0x9a   : > { %v303_v14 = vadd.f32 %v302_v11, %v278_v10  ;;  %v316_v15 = vadd.f32 %v315_v12, %v278_v10 }
  0x9c   : > { %v327_v17 = vadd.f32 %v323_v13, %v316_v15  ;;  %v326_v18 = vadd.f32 %v322_v16, %v303_v14 }
  0x9e   : > { %v330_v19 = vrot.slane %v327_v17, 4 }
  0xa0   : > { %v332_v20 = vsel %vm331_vm2, %v326_v18, %v330_v19 }
  0xa1   : > { %334 = vst [vmem:[%s268_s7] sm:$0xff] %v332_v20  ;;  %v304_v21 = vpop.f32.mrf.mxu0  ;;  %v317_v22 = vpop.f32.mrf.mxu1 }
  0xa2 PF: > { %s14_s17 = sadd.s32 1, %s501_s17   ;;  %s580_s15 = smov %s497_s16 }
  0xa3   : > { %p11_p5 = scmp.ge.s32.totalorder %s14_s17, 4   ;;  %s581_s16 = smov %s583_s18 }
  0xa5   :  { %13 = sbr.rel (!%p11_p5) target bundleno = 2 (0x2), region = 69 }

// kernel: _lambda_.6
= control target key start
LH: loop header
LB: loop body
LE: loop exit
PB: predicated region body
PF: predicated region fallthrough
CT: control target
= control target key end

     0   :  { %s2537_s12 = smov 0   ;;  %s2539_s13 = smov 0   ;;  %s3732_s0 = inlined_call_operand.vmem [shape: bf16[2,2,256], index: 0, kind: input, shape index: {}]   ;;  %s3733_s1 = inlined_call_operand.vmem [shape: bf16[2,2,64], index: 1, kind: input, shape index: {}]   ;;  %s3734_s2 = inlined_call_operand.vmem [shape: bf16[2,2,64], index: 2, kind: input, shape index: {}]   ;;  %s3735_s3 = inlined_call_operand.vmem [shape: bf16[2,256,2], index: 3, kind: output, shape index: {}]  }
   0x1   :  { %s2541_s14 = smov 0  }
   0x2 LB: > { %s32_s15 = sadd.s32 1, %s2508_s13  ;;  %p2227_p0 = scmp.ge.s32.totalorder %s2512_s14, 1  ;;  %s2512_s14 = sphi %s2541_s14, %s13_s14   ;;  %s2508_s13 = sphi %s2539_s13, %s3867_s13   ;;  %s2504_s12 = sphi %s2537_s12, %s3866_s12  }
   0x3   : > { %p34_p1 = scmp.ge.s32.totalorder %s32_s15, 2  ;;  %p190_p2 = scmp.lt.s32.totalorder %s2512_s14, 3 }
   0x5   : > { %s3869_s15 = smov (%p34_p1, %s32_s15), 0  ;;  %p191_p3 = pnand %p2227_p0, %p190_p2 }
   0x7   : > { %194 = sbr.rel (%p191_p3) target bundleno = 1222 (0x4c6), region = 32 }
   0xc   : > { %p234_p4 = scmp.lt.s32.totalorder %s2504_s12, 1  ;;  %vm448_vm0 = vcmask 1040384   ;;  %vm334_vm1 = vcmask 15360   ;;  %vm573_vm2 = vcmask 523264   ;;  %vm269_vm3 = vcmask 7168  }
   0xd   : > { %v2514_v53 = vmov -inf   ;;  %vm2079_vm4 = vcmask 11264  }
   0xe   : > { %s3871_s12 = smov (!%p234_p4, %s2504_s12), 1  ;;  %270 = vst.msk [vmem:[#allocation2] sm:$0xff] %vm269_vm3, %v2514_v53 }
   0xf   : > { %s2228_s16 = sshll.u32 %s3871_s12, 1  ;;  %s247_s22 = scalar_lea.vmem %s3733_s1, %s3871_s12  ;;  %271 = vst.msk [vmem:[#allocation2 + $0x8] sm:$0xff] %vm269_vm3, %v2514_v53 }
  0x10   : > { %s240_s19 = scalar_lea.vmem %s3732_s0, %s2228_s16  ;;  %v368_v1 = vld [vmem:[%s247_s22] sm:$0x1]  ;;  %272 = vst.msk [vmem:[#allocation2 + $0x10] sm:$0xff] %vm269_vm3, %v2514_v53  ;;  %s253_s25 = scalar_lea.vmem %s3734_s2, %s3871_s12 }
  0x11   : > { %v367_v0 = vld [vmem:[%s240_s19] sm:$0x3]  ;;  %v450_v2 = vsel %vm448_vm0, %v368_v1, 0  ;;  %273 = vst.msk [vmem:[#allocation2 + $0x18] sm:$0xff] %vm269_vm3, %v2514_v53  ;;  %s2265_s26 = sshll.u32 %s3871_s12, 7 }
  0x12   : > { %370 = vst [vmem:[#allocation1] ss:$9 sm:$0xff] %v367_v0  ;;  %459 = vmatpush.bf16.msra.mxu0 %v450_v2  ;;  %2266 = vmatpush.bf16.msra.mxu3 %v450_v2  ;;  %s3589_s29 = scalar_lea.vmem %s3735_s3, %s2265_s26 }
  0x13   : > { %274 = vst.msk [vmem:[#allocation2 + $0x20] sm:$0xff] %vm269_vm3, %v2514_v53 }
  0x14   : > { %275 = vst.msk [vmem:[#allocation2 + $0x28] sm:$0xff] %vm269_vm3, %v2514_v53 }
  0x15   : > { %276 = vst.msk [vmem:[#allocation2 + $0x30] sm:$0xff] %vm269_vm3, %v2514_v53 }
  0x16   : > { %277 = vst.msk [vmem:[#allocation2 + $0x38] sm:$0xff] %vm269_vm3, %v2514_v53 }
  0x17   : > { %278 = vst.msk [vmem:[#allocation2 + $0x40] sm:$0xff] %vm269_vm3, %v2514_v53 }
  0x18   : > { %279 = vst.msk [vmem:[#allocation2 + $0x48] sm:$0xff] %vm269_vm3, %v2514_v53 }
  0x19   : > { %v371_v3 = vld [vmem:[#allocation1] sm:$0xff]  ;;  %v372_v4 = vld [vmem:[#allocation1 + $0x9] sm:$0xff]  ;;  %280 = vst.msk [vmem:[#allocation2 + $0x50] sm:$0xff] %vm269_vm3, %v2514_v53 }
  0x1a   : > { %375 = vxpose.binary.xlu0.c.b16.start.end [1/2] (short) %v372_v4, %v371_v3, 128  ;;  %281 = vst.msk [vmem:[#allocation2 + $0x58] sm:$0xff] %vm269_vm3, %v2514_v53 }
  0x1b   : > { %282 = vst.msk [vmem:[#allocation2 + $0x60] sm:$0xff] %vm269_vm3, %v2514_v53 }
  0x1c   : > { %283 = vst.msk [vmem:[#allocation2 + $0x68] sm:$0xff] %vm269_vm3, %v2514_v53 }
  0x1d   : > { %284 = vst.msk [vmem:[#allocation2 + $0x70] sm:$0xff] %vm269_vm3, %v2514_v53 }
  0x1e   : > { %285 = vst.msk [vmem:[#allocation2 + $0x78] sm:$0xff] %vm269_vm3, %v2514_v53 }
  0x1f   : > { %286 = vst.msk [vmem:[#allocation2 + $0x80] sm:$0xff] %vm269_vm3, %v2514_v53 }
  0x20   : > { %287 = vst.msk [vmem:[#allocation2 + $0x88] sm:$0xff] %vm269_vm3, %v2514_v53 }
  0x21   : > { %288 = vst.msk [vmem:[#allocation2 + $0x90] sm:$0xff] %vm269_vm3, %v2514_v53 }
  0x22   : > { %289 = vst.msk [vmem:[#allocation2 + $0x98] sm:$0xff] %vm269_vm3, %v2514_v53 }
  0x23   : > { %290 = vst.msk [vmem:[#allocation2 + $0xa0] sm:$0xff] %vm269_vm3, %v2514_v53 }
  0x24   : > { %291 = vst.msk [vmem:[#allocation2 + $0xa8] sm:$0xff] %vm269_vm3, %v2514_v53 }
  0x25   : > { %292 = vst.msk [vmem:[#allocation2 + $0xb0] sm:$0xff] %vm269_vm3, %v2514_v53 }
  0x26   : > { %293 = vst.msk [vmem:[#allocation2 + $0xb8] sm:$0xff] %vm269_vm3, %v2514_v53 }
  0x27   : > { %294 = vst.msk [vmem:[#allocation2 + $0xc0] sm:$0xff] %vm269_vm3, %v2514_v53 }
  0x28   : > { %295 = vst.msk [vmem:[#allocation2 + $0xc8] sm:$0xff] %vm269_vm3, %v2514_v53 }
  0x29   : > { %296 = vst.msk [vmem:[#allocation2 + $0xd0] sm:$0xff] %vm269_vm3, %v2514_v53 }
  0x2a   : > { %297 = vst.msk [vmem:[#allocation2 + $0xd8] sm:$0xff] %vm269_vm3, %v2514_v53 }
  0x2b   : > { %298 = vst.msk [vmem:[#allocation2 + $0xe0] sm:$0xff] %vm269_vm3, %v2514_v53 }
  0x2c   : > { %299 = vst.msk [vmem:[#allocation2 + $0xe8] sm:$0xff] %vm269_vm3, %v2514_v53 }
  0x2d   : > { %300 = vst.msk [vmem:[#allocation2 + $0xf0] sm:$0xff] %vm269_vm3, %v2514_v53 }
  0x2e   : > { %301 = vst.msk [vmem:[#allocation2 + $0xf8] sm:$0xff] %vm269_vm3, %v2514_v53 }
  0xc6   : > { %v383_v5 = vpop.trf.xlu0 }
  0xc7   : > { %2231 = vmatmul.msk.bf16.vlgmr.msra.gmra.mxu0 %vm334_vm1, %v383_v5  ;;  %v2515_v5 = vmov 0  }
  0xc8   : > { %2297 = vset.pattern.permute.xlu0 %v2515_v5  ;;  %2295 = vset.pattern.permute.xlu2 %v2515_v5 }
  0xc9   : > { %2296 = vset.pattern.permute.xlu1 %v2515_v5 }
  0xce   : > { %v384_v6 = vpop.trf.xlu0 }
  0xd6   : > { %v385_v7 = vpop.trf.xlu0 }
  0xd7   : > { %2232 = vmatmul.msk.bf16.gmra.mxu0 %vm334_vm1, %v385_v7  ;;  %v2516_v7 = vmov 0.0  }
  0xd8   : > { %336 = vst.msk [vmem:[#allocation4 + $0x8] sm:$0xff] %vm334_vm1, %v2516_v7 }
  0xd9   : > { %302 = vst.msk [vmem:[#allocation3] sm:$0xff] %vm269_vm3, %v2516_v7 }
  0xda   : > { %303 = vst.msk [vmem:[#allocation3 + $0x8] sm:$0xff] %vm269_vm3, %v2516_v7 }
  0xdb   : > { %304 = vst.msk [vmem:[#allocation3 + $0x10] sm:$0xff] %vm269_vm3, %v2516_v7 }
  0xdc   : > { %305 = vst.msk [vmem:[#allocation3 + $0x18] sm:$0xff] %vm269_vm3, %v2516_v7 }
  0xdd   : > { %306 = vst.msk [vmem:[#allocation3 + $0x20] sm:$0xff] %vm269_vm3, %v2516_v7 }
  0xde   : > { %v386_v8 = vpop.trf.xlu0  ;;  %307 = vst.msk [vmem:[#allocation3 + $0x28] sm:$0xff] %vm269_vm3, %v2516_v7 }
  0xdf   : > { %2240 = vmatmul.msk.bf16.vlgmr.msra.gmra.mxu3 %vm334_vm1, %v386_v8  ;;  %308 = vst.msk [vmem:[#allocation3 + $0x30] sm:$0xff] %vm269_vm3, %v2516_v7 }
  0xe0   : > { %309 = vst.msk [vmem:[#allocation3 + $0x38] sm:$0xff] %vm269_vm3, %v2516_v7 }
  0xe1   : > { %310 = vst.msk [vmem:[#allocation3 + $0x40] sm:$0xff] %vm269_vm3, %v2516_v7 }
  0xe2   : > { %311 = vst.msk [vmem:[#allocation3 + $0x48] sm:$0xff] %vm269_vm3, %v2516_v7 }
  0xe3   : > { %312 = vst.msk [vmem:[#allocation3 + $0x50] sm:$0xff] %vm269_vm3, %v2516_v7 }
  0xe4   : > { %313 = vst.msk [vmem:[#allocation3 + $0x58] sm:$0xff] %vm269_vm3, %v2516_v7 }
  0xe5   : > { %314 = vst.msk [vmem:[#allocation3 + $0x60] sm:$0xff] %vm269_vm3, %v2516_v7 }
  0xe6   : > { %v387_v9 = vpop.trf.xlu0  ;;  %315 = vst.msk [vmem:[#allocation3 + $0x68] sm:$0xff] %vm269_vm3, %v2516_v7 }
  0xe7   : > { %2233 = vmatmul.msk.bf16.gmra.mxu0 %vm334_vm1, %v387_v9  ;;  %316 = vst.msk [vmem:[#allocation3 + $0x70] sm:$0xff] %vm269_vm3, %v2516_v7 }
  0xe8   : > { %317 = vst.msk [vmem:[#allocation3 + $0x78] sm:$0xff] %vm269_vm3, %v2516_v7 }
  0xe9   : > { %318 = vst.msk [vmem:[#allocation3 + $0x80] sm:$0xff] %vm269_vm3, %v2516_v7 }
  0xea   : > { %319 = vst.msk [vmem:[#allocation3 + $0x88] sm:$0xff] %vm269_vm3, %v2516_v7 }
  0xeb   : > { %320 = vst.msk [vmem:[#allocation3 + $0x90] sm:$0xff] %vm269_vm3, %v2516_v7 }
  0xec   : > { %321 = vst.msk [vmem:[#allocation3 + $0x98] sm:$0xff] %vm269_vm3, %v2516_v7 }
  0xed   : > { %322 = vst.msk [vmem:[#allocation3 + $0xa0] sm:$0xff] %vm269_vm3, %v2516_v7 }
  0xee   : > { %v388_v10 = vpop.trf.xlu0  ;;  %323 = vst.msk [vmem:[#allocation3 + $0xa8] sm:$0xff] %vm269_vm3, %v2516_v7 }
  0xef   : > { %2241 = vmatmul.msk.bf16.gmra.mxu3 %vm334_vm1, %v388_v10  ;;  %324 = vst.msk [vmem:[#allocation3 + $0xb0] sm:$0xff] %vm269_vm3, %v2516_v7 }
  0xf0   : > { %325 = vst.msk [vmem:[#allocation3 + $0xb8] sm:$0xff] %vm269_vm3, %v2516_v7 }
  0xf1   : > { %326 = vst.msk [vmem:[#allocation3 + $0xc0] sm:$0xff] %vm269_vm3, %v2516_v7 }
  0xf2   : > { %327 = vst.msk [vmem:[#allocation3 + $0xc8] sm:$0xff] %vm269_vm3, %v2516_v7 }
  0xf3   : > { %328 = vst.msk [vmem:[#allocation3 + $0xd0] sm:$0xff] %vm269_vm3, %v2516_v7 }
  0xf4   : > { %329 = vst.msk [vmem:[#allocation3 + $0xd8] sm:$0xff] %vm269_vm3, %v2516_v7 }
  0xf5   : > { %330 = vst.msk [vmem:[#allocation3 + $0xe0] sm:$0xff] %vm269_vm3, %v2516_v7 }
  0xf6   : > { %v389_v11 = vpop.trf.xlu0  ;;  %331 = vst.msk [vmem:[#allocation3 + $0xe8] sm:$0xff] %vm269_vm3, %v2516_v7 }
  0xf7   : > { %2234 = vmatmul.msk.bf16.gmra.mxu0 %vm334_vm1, %v389_v11  ;;  %v2725_v11 = vld [vmem:[#allocation2] sm:$0xff]  ;;  %332 = vst.msk [vmem:[#allocation3 + $0xf0] sm:$0xff] %vm269_vm3, %v2516_v7 }
  0xf8   : > { %333 = vst.msk [vmem:[#allocation3 + $0xf8] sm:$0xff] %vm269_vm3, %v2516_v7 }
  0xf9   : > { %335 = vst.msk [vmem:[#allocation4] sm:$0xff] %vm334_vm1, %v2516_v7 }
  0xfa   : > { %337 = vst.msk [vmem:[#allocation4 + $0x10] sm:$0xff] %vm334_vm1, %v2516_v7 }
  0xfb   : > { %338 = vst.msk [vmem:[#allocation4 + $0x18] sm:$0xff] %vm334_vm1, %v2516_v7 }
  0xfc   : > { %339 = vst.msk [vmem:[#allocation4 + $0x20] sm:$0xff] %vm334_vm1, %v2516_v7 }
  0xfd   : > { %340 = vst.msk [vmem:[#allocation4 + $0x28] sm:$0xff] %vm334_vm1, %v2516_v7 }
  0xfe   : > { %v390_v12 = vpop.trf.xlu0  ;;  %341 = vst.msk [vmem:[#allocation4 + $0x30] sm:$0xff] %vm334_vm1, %v2516_v7 }
  0xff   : > { %2242 = vmatmul.msk.bf16.gmra.mxu3 %vm334_vm1, %v390_v12  ;;  %342 = vst.msk [vmem:[#allocation4 + $0x38] sm:$0xff] %vm334_vm1, %v2516_v7 }
 0x100   : > { %343 = vst.msk [vmem:[#allocation4 + $0x40] sm:$0xff] %vm334_vm1, %v2516_v7 }
 0x101   : > { %344 = vst.msk [vmem:[#allocation4 + $0x48] sm:$0xff] %vm334_vm1, %v2516_v7 }
 0x102   : > { %345 = vst.msk [vmem:[#allocation4 + $0x50] sm:$0xff] %vm334_vm1, %v2516_v7 }
 0x103   : > { %346 = vst.msk [vmem:[#allocation4 + $0x58] sm:$0xff] %vm334_vm1, %v2516_v7 }
 0x104   : > { %347 = vst.msk [vmem:[#allocation4 + $0x60] sm:$0xff] %vm334_vm1, %v2516_v7 }
 0x105   : > { %348 = vst.msk [vmem:[#allocation4 + $0x68] sm:$0xff] %vm334_vm1, %v2516_v7 }
 0x106   : > { %v391_v13 = vpop.trf.xlu0  ;;  %349 = vst.msk [vmem:[#allocation4 + $0x70] sm:$0xff] %vm334_vm1, %v2516_v7 }
 0x107   : > { %2235 = vmatmul.msk.bf16.gmra.mxu0 %vm334_vm1, %v391_v13  ;;  %350 = vst.msk [vmem:[#allocation4 + $0x78] sm:$0xff] %vm334_vm1, %v2516_v7 }
 0x108   : > { %351 = vst.msk [vmem:[#allocation4 + $0x80] sm:$0xff] %vm334_vm1, %v2516_v7 }
 0x109   : > { %352 = vst.msk [vmem:[#allocation4 + $0x88] sm:$0xff] %vm334_vm1, %v2516_v7 }
 0x10a   : > { %353 = vst.msk [vmem:[#allocation4 + $0x90] sm:$0xff] %vm334_vm1, %v2516_v7 }
 0x10b   : > { %354 = vst.msk [vmem:[#allocation4 + $0x98] sm:$0xff] %vm334_vm1, %v2516_v7 }
 0x10c   : > { %355 = vst.msk [vmem:[#allocation4 + $0xa0] sm:$0xff] %vm334_vm1, %v2516_v7 }
 0x10d   : > { %356 = vst.msk [vmem:[#allocation4 + $0xa8] sm:$0xff] %vm334_vm1, %v2516_v7 }
 0x10e   : > { %v392_v14 = vpop.trf.xlu0  ;;  %357 = vst.msk [vmem:[#allocation4 + $0xb0] sm:$0xff] %vm334_vm1, %v2516_v7 }
 0x10f   : > { %2243 = vmatmul.msk.bf16.gmra.mxu3 %vm334_vm1, %v392_v14  ;;  %358 = vst.msk [vmem:[#allocation4 + $0xb8] sm:$0xff] %vm334_vm1, %v2516_v7 }
 0x110   : > { %359 = vst.msk [vmem:[#allocation4 + $0xc0] sm:$0xff] %vm334_vm1, %v2516_v7 }
 0x111   : > { %360 = vst.msk [vmem:[#allocation4 + $0xc8] sm:$0xff] %vm334_vm1, %v2516_v7 }
 0x112   : > { %361 = vst.msk [vmem:[#allocation4 + $0xd0] sm:$0xff] %vm334_vm1, %v2516_v7 }
 0x113   : > { %362 = vst.msk [vmem:[#allocation4 + $0xd8] sm:$0xff] %vm334_vm1, %v2516_v7 }
 0x114   : > { %363 = vst.msk [vmem:[#allocation4 + $0xe0] sm:$0xff] %vm334_vm1, %v2516_v7 }
 0x115   : > { %364 = vst.msk [vmem:[#allocation4 + $0xe8] sm:$0xff] %vm334_vm1, %v2516_v7 }
 0x116   : > { %v393_v15 = vpop.trf.xlu0  ;;  %365 = vst.msk [vmem:[#allocation4 + $0xf0] sm:$0xff] %vm334_vm1, %v2516_v7 }
 0x117   : > { %2236 = vmatmul.msk.bf16.gmra.mxu0 %vm334_vm1, %v393_v15  ;;  %366 = vst.msk [vmem:[#allocation4 + $0xf8] sm:$0xff] %vm334_vm1, %v2516_v7  ;;  %v550_v7 = vld [vmem:[#allocation2 + $0x48] sm:$0xff] }
 0x11e   : > { %v394_v16 = vpop.trf.xlu0 }
 0x11f   : > { %2244 = vmatmul.msk.bf16.gmra.mxu3 %vm334_vm1, %v394_v16 }
 0x126   : > { %v395_v17 = vpop.trf.xlu0 }
 0x127   : > { %2237 = vmatmul.msk.bf16.gmra.mxu0 %vm334_vm1, %v395_v17 }
 0x12e   : > { %v396_v18 = vpop.trf.xlu0 }
 0x12f   : > { %2245 = vmatmul.msk.bf16.gmra.mxu3 %vm334_vm1, %v396_v18  ;;  %v542_v18 = vld [vmem:[#allocation2 + $0x8] sm:$0xff] }
 0x136   : > { %v397_v19 = vpop.trf.xlu0 }
 0x137   : > { %2238 = vmatmul.msk.bf16.gmra.mxu0 %vm334_vm1, %v397_v19 }
 0x13e   : > { %v398_v24 = vpop.trf.xlu0 }
 0x13f   : > { %2246 = vmatmul.msk.bf16.gmra.mxu3 %vm334_vm1, %v398_v24 }
 0x144   : > { %v2579_v20 = vpop.f32.mrf.mxu0 }
 0x145   : > { %v574_v21 = vsel %vm573_vm2, %v2579_v20, -inf }
 0x146   : > { %575 = vmax.xlane.f32.xlu0 %v574_v21 }
 0x147   : > { %2239 = vmatmul.msk.bf16.gmra.mxu0 %vm334_vm1, %v384_v6 }
 0x14c   : > { %v2584_v22 = vpop.f32.mrf.mxu0 }
 0x14d   : > { %v577_v23 = vsel %vm573_vm2, %v2584_v22, -inf }
 0x14e   : > { %578 = vmax.xlane.f32.xlu1 %v577_v23 }
 0x154   : > { %v2589_v25 = vpop.f32.mrf.mxu0 }
 0x155   : > { %v580_v26 = vsel %vm573_vm2, %v2589_v25, -inf }
 0x156   : > { %581 = vmax.xlane.f32.xlu1 %v580_v26 }
 0x15c   : > { %v2593_v27 = vpop.f32.mrf.mxu0 }
 0x15d   : > { %v583_v28 = vsel %vm573_vm2, %v2593_v27, -inf }
 0x15e   : > { %584 = vmax.xlane.f32.xlu2 %v583_v28 }
 0x162   : > { %v2597_v29 = vpop.f32.mrf.mxu3 }
 0x163   : > { %v628_v31 = vsel %vm573_vm2, %v2597_v29, -inf }
 0x164   : > { %v2599_v30 = vpop.f32.mrf.mxu0 }
 0x165   : > { %v586_v35 = vsel %vm573_vm2, %v2599_v30, -inf }
 0x166   : > { %629 = vmax.xlane.f32.xlu2 %v628_v31  ;;  %v2773_v31 = vld [vmem:[#allocation2 + $0x10] sm:$0xff] }
 0x16a   : > { %v2603_v32 = vpop.f32.mrf.mxu3 }
 0x16b   : > { %v631_v33 = vsel %vm573_vm2, %v2603_v32, -inf }
 0x16c   : > { %632 = vmax.xlane.f32.xlu1 %v631_v33  ;;  %v2607_v34 = vpop.f32.mrf.mxu0 }
 0x16d   : > { %v589_v37 = vsel %vm573_vm2, %v2607_v34, -inf }
 0x16e   : > { %587 = vmax.xlane.f32.xlu2 %v586_v35 }
 0x172   : > { %v2611_v36 = vpop.f32.mrf.mxu3 }
 0x173   : > { %v634_v39 = vsel %vm573_vm2, %v2611_v36, -inf }
 0x174   : > { %590 = vmax.xlane.f32.xlu1 %v589_v37  ;;  %v2615_v38 = vpop.f32.mrf.mxu0 }
 0x175   : > { %v592_v43 = vsel %vm573_vm2, %v2615_v38, -inf }
 0x176   : > { %635 = vmax.xlane.f32.xlu2 %v634_v39  ;;  %v544_v39 = vld [vmem:[#allocation2 + $0x18] sm:$0xff] }
 0x17a   : > { %v2619_v40 = vpop.f32.mrf.mxu3 }
 0x17b   : > { %v637_v41 = vsel %vm573_vm2, %v2619_v40, -inf }
 0x17c   : > { %638 = vmax.xlane.f32.xlu1 %v637_v41  ;;  %v2623_v42 = vpop.f32.mrf.mxu0 }
 0x17d   : > { %v595_v45 = vsel %vm573_vm2, %v2623_v42, -inf }
 0x17e   : > { %593 = vmax.xlane.f32.xlu2 %v592_v43 }
 0x182   : > { %v2627_v44 = vpop.f32.mrf.mxu3 }
 0x183   : > { %v640_v47 = vsel %vm573_vm2, %v2627_v44, -inf }
 0x184   : > { %596 = vmax.xlane.f32.xlu1 %v595_v45  ;;  %v2631_v46 = vpop.f32.mrf.mxu0 }
 0x185   : > { %v598_v51 = vsel %vm573_vm2, %v2631_v46, -inf }
 0x186   : > { %641 = vmax.xlane.f32.xlu2 %v640_v47 }
 0x18a   : > { %v2635_v48 = vpop.f32.mrf.mxu3 }
 0x18b   : > { %v643_v49 = vsel %vm573_vm2, %v2635_v48, -inf }
 0x18c   : > { %644 = vmax.xlane.f32.xlu1 %v643_v49  ;;  %v2639_v50 = vpop.f32.mrf.mxu0  ;;  %v2817_v49 = vld [vmem:[#allocation2 + $0x90] sm:$0xff] }
 0x18d   : > { %v601_v54 = vsel %vm573_vm2, %v2639_v50, -inf }
 0x18e   : > { %599 = vmax.xlane.f32.xlu2 %v598_v51 }
 0x192   : > { %v2643_v52 = vpop.f32.mrf.mxu3 }
 0x193   : > { %v646_v56 = vsel %vm573_vm2, %v2643_v52, -inf }
 0x194   : > { %602 = vmax.xlane.f32.xlu1 %v601_v54  ;;  %v2649_v55 = vpop.f32.mrf.mxu0  ;;  %v2834_v54 = vld [vmem:[#allocation2 + $0x98] sm:$0xff] }
 0x195   : > { %v604_v60 = vsel %vm573_vm2, %v2649_v55, -inf }
 0x196   : > { %647 = vmax.xlane.f32.xlu2 %v646_v56 }
 0x19a   : > { %v2659_v57 = vpop.f32.mrf.mxu3 }
 0x19b   : > { %3774 = vst [vmem:[#allocation5_spill] sm:$0xff] %v2659_v57  ;;  %v649_v58 = vsel %vm573_vm2, %v2659_v57, -inf  ;;  %v2972_v57 = vld [vmem:[#allocation2 + $0xc0] sm:$0xff] }
 0x19c   : > { %650 = vmax.xlane.f32.xlu1 %v649_v58  ;;  %v2665_v59 = vpop.f32.mrf.mxu0 }
 0x19d   : > { %v607_v62 = vsel %vm573_vm2, %v2665_v59, -inf }
 0x19e   : > { %605 = vmax.xlane.f32.xlu2 %v604_v60  ;;  %v2843_v60 = vld [vmem:[#allocation2 + $0x20] sm:$0xff] }
 0x1a2   : > { %v2675_v61 = vpop.f32.mrf.mxu3 }
 0x1a3   : > { %3775 = vst [vmem:[#allocation6_spill] sm:$0xff] %v2675_v61  ;;  %v652_v0 = vsel %vm573_vm2, %v2675_v61, -inf }
 0x1a4   : > { %608 = vmax.xlane.f32.xlu1 %v607_v62  ;;  %v2681_v63 = vpop.f32.mrf.mxu0 }
 0x1a5   : > { %3776 = vst [vmem:[#allocation7_spill] sm:$0xff] %v2681_v63  ;;  %v610_v4 = vsel %vm573_vm2, %v2681_v63, -inf }
 0x1a6   : > { %653 = vmax.xlane.f32.xlu2 %v652_v0 }
 0x1aa   : > { %v2691_v1 = vpop.f32.mrf.mxu3 }
 0x1ab   : > { %3777 = vst [vmem:[#allocation8_spill] sm:$0xff] %v2691_v1  ;;  %v655_v2 = vsel %vm573_vm2, %v2691_v1, -inf }
 0x1ac   : > { %656 = vmax.xlane.f32.xlu1 %v655_v2  ;;  %v2697_v3 = vpop.f32.mrf.mxu0 }
 0x1ad   : > { %3778 = vst [vmem:[#allocation9_spill] sm:$0xff] %v2697_v3  ;;  %v613_v8 = vsel %vm573_vm2, %v2697_v3, -inf }
 0x1ae   : > { %611 = vmax.xlane.f32.xlu2 %v610_v4  ;;  %v2863_v4 = vld [vmem:[#allocation2 + $0x28] sm:$0xff] }
 0x1b2   : > { %v2707_v6 = vpop.f32.mrf.mxu3 }
 0x1b3   : > { %3779 = vst [vmem:[#allocation10_spill] sm:$0xff] %v2707_v6  ;;  %v658_v9 = vsel %vm573_vm2, %v2707_v6, -inf  ;;  %v3013_v6 = vld [vmem:[#allocation2 + $0xd0] sm:$0xff] }
 0x1b4   : > { %614 = vmax.xlane.f32.xlu1 %v613_v8  ;;  %v2721_v10 = vpop.f32.mrf.mxu0  ;;  %v2869_v8 = vld [vmem:[#allocation2 + $0xa0] sm:$0xff]  ;;  %3796 = vst [vmem:[#allocation26_spill] sm:$0xff] %v3013_v6 }
 0x1b5   : > { %3780 = vst [vmem:[#allocation11_spill] sm:$0xff] %v2721_v10  ;;  %v616_v17 = vsel %vm573_vm2, %v2721_v10, -inf }
 0x1b6   : > { %659 = vmax.xlane.f32.xlu2 %v658_v9  ;;  %3785 = vst [vmem:[#allocation16_spill] sm:$0xff] %v2869_v8 }
 0x1b9   : > { %v576_v12 = vpop.xlane.xlu0 %575 }
 0x1ba   : > { %v2734_v13 = vmax.f32 %v2725_v11, %v576_v12  ;;  %v2736_v14 = vpop.f32.mrf.mxu3 }
 0x1bb   : > { %3781 = vst [vmem:[#allocation12_spill] sm:$0xff] %v2736_v14  ;;  %v661_v15 = vsel %vm573_vm2, %v2736_v14, -inf }
 0x1bc   : > { %1724 = vst.msk [vmem:[#allocation2] sm:$0xff] %vm269_vm3, %v2734_v13  ;;  %662 = vmax.xlane.f32.xlu1 %v661_v15  ;;  %v2756_v19 = vpop.f32.mrf.mxu0 }
 0x1bd   : > { %3782 = vst [vmem:[#allocation13_spill] sm:$0xff] %v2756_v19  ;;  %v619_v24 = vsel %vm573_vm2, %v2756_v19, -inf }
 0x1be   : > { %617 = vmax.xlane.f32.xlu2 %v616_v17  ;;  %v2889_v17 = vld [vmem:[#allocation2 + $0xa8] sm:$0xff] }
 0x1c1   : > { %v579_v21 = vpop.xlane.xlu1 %578 }
 0x1c2   : > { %v671_v23 = vmax.f32 %v542_v18, %v579_v21  ;;  %v547_v21 = vld [vmem:[#allocation2 + $0x30] sm:$0xff] }
 0x1c4   : > { %v703_v26 = vsub.f32 %v542_v18, %v671_v23  ;;  %1725 = vst.msk [vmem:[#allocation2 + $0x8] sm:$0xff] %vm269_vm3, %v671_v23  ;;  %620 = vmax.xlane.f32.xlu1 %v619_v24 }
 0x1c6   : > { %v736_v28 = vmul.f32 1.442695, %v703_v26 }
 0x1c8   : > { %2298 = vpow2.f32 %v736_v28 }
 0x1c9   : > { %v582_v33 = vpop.xlane.xlu1 %581 }
 0x1ca   : > { %v2782_v35 = vmax.f32 %v2773_v31, %v582_v33  ;;  %v2913_v33 = vld [vmem:[#allocation2 + $0x38] sm:$0xff] }
 0x1cc   : > { %1726 = vst.msk [vmem:[#allocation2 + $0x10] sm:$0xff] %vm269_vm3, %v2782_v35 }
 0x1ce   : > { %v2792_v37 = vpop.eup %2298 }
 0x1cf   : > { %3783 = vst [vmem:[#allocation14_spill] sm:$0xff] %v2792_v37  ;;  %1475 = vperm.xlu0 %2297, %v2792_v37  }
 0x1d1   : > { %v585_v41 = vpop.xlane.xlu2 %584 }
 0x1d2   : > { %v2803_v43 = vmax.f32 %v544_v39, %v585_v41 }
 0x1d4   : > { %v705_v45 = vsub.f32 %v544_v39, %v2803_v43  ;;  %1727 = vst.msk [vmem:[#allocation2 + $0x18] sm:$0xff] %vm269_vm3, %v2803_v43 }
 0x1d6   : > { %v740_v47 = vmul.f32 1.442695, %v705_v45  ;;  %800 = vperm.xlu2 %2295, %v2734_v13   ;;  %v2919_v45 = vld [vmem:[#allocation2 + $0xb0] sm:$0xff] }
 0x1d7   : > { %3786 = vst [vmem:[#allocation17_spill] sm:$0xff] %v2919_v45 }
 0x1d8   : > { %2300 = vpow2.f32 %v740_v47 }
 0x1d9   : > { %v630_v51 = vpop.xlane.xlu2 %629 }
 0x1da   : > { %v2826_v53 = vmax.f32 %v2817_v49, %v630_v51  ;;  %v2928_v51 = vpop.f32.mrf.mxu3 }
 0x1db   : > { %3787 = vst [vmem:[#allocation18_spill] sm:$0xff] %v2928_v51 }
 0x1dc   : > { %1742 = vst.msk [vmem:[#allocation2 + $0x90] sm:$0xff] %vm269_vm3, %v2826_v53 }
 0x1dd   : > { %805 = vperm.xlu1 %2296, %v671_v23  }
 0x1de   : > { %v2838_v56 = vpop.eup %2300 }
 0x1df   : > { %3784 = vst [vmem:[#allocation15_spill] sm:$0xff] %v2838_v56  ;;  %1485 = vperm.xlu0 %2297, %v2838_v56   ;;  %v633_v58 = vpop.xlane.xlu1 %632 }
 0x1e0   : > { %v2848_v62 = vmax.f32 %v2834_v54, %v633_v58 }
 0x1e1   : > { %v588_v0 = vpop.xlane.xlu2 %587 }
 0x1e2   : > { %1743 = vst.msk [vmem:[#allocation2 + $0x98] sm:$0xff] %vm269_vm3, %v2848_v62  ;;  %v2857_v2 = vmax.f32 %v2843_v60, %v588_v0  ;;  %v2964_v16 = vpop.f32.mrf.mxu3 }
 0x1e3   : > { %3791 = vst [vmem:[#allocation22_spill] sm:$0xff] %v2964_v16 }
 0x1e4   : > { %1728 = vst.msk [vmem:[#allocation2 + $0x20] sm:$0xff] %vm269_vm3, %v2857_v2  ;;  %v706_v3 = vsub.f32 %v2843_v60, %v2857_v2 }
 0x1e7   : > { %v591_v5 = vpop.xlane.xlu1 %590 }
 0x1e8   : > { %v2874_v9 = vmax.f32 %v2863_v4, %v591_v5  ;;  %v664_v5 = vsel %vm573_vm2, %v2928_v51, -inf }
 0x1e9   : > { %v636_v12 = vpop.xlane.xlu2 %635 }
 0x1ea   : > { %1729 = vst.msk [vmem:[#allocation2 + $0x28] sm:$0xff] %vm269_vm3, %v2874_v9  ;;  %v2883_v15 = vmax.f32 %v2869_v8, %v636_v12  ;;  %v2943_v12 = vld [vmem:[#allocation2 + $0xb8] sm:$0xff]  ;;  %v742_v8 = vmul.f32 1.442695, %v706_v3  ;;  %v707_v60 = vsub.f32 %v2863_v4, %v2874_v9 }
 0x1eb   : > { %3788 = vst [vmem:[#allocation19_spill] sm:$0xff] %v2943_v12 }
 0x1ec   : > { %1744 = vst.msk [vmem:[#allocation2 + $0xa0] sm:$0xff] %vm269_vm3, %v2883_v15 }
 0x1ef   : > { %v639_v18 = vpop.xlane.xlu1 %638 }
 0x1f0   : > { %v2898_v23 = vmax.f32 %v2889_v17, %v639_v18 }
 0x1f1   : > { %v594_v24 = vpop.xlane.xlu2 %593 }
 0x1f2   : > { %1745 = vst.msk [vmem:[#allocation2 + $0xa8] sm:$0xff] %vm269_vm3, %v2898_v23  ;;  %v2906_v26 = vmax.f32 %v547_v21, %v594_v24  ;;  %v2952_v24 = vld [vmem:[#allocation2 + $0x40] sm:$0xff] }
 0x1f4   : > { %v708_v28 = vsub.f32 %v547_v21, %v2906_v26  ;;  %1730 = vst.msk [vmem:[#allocation2 + $0x30] sm:$0xff] %vm269_vm3, %v2906_v26 }
 0x1f6   : > { %v746_v39 = vmul.f32 1.442695, %v708_v28 }
 0x1f7   : > { %v597_v41 = vpop.xlane.xlu1 %596 }
 0x1f8   : > { %2302 = vpow2.f32 %v746_v39  ;;  %v2924_v47 = vmax.f32 %v2913_v33, %v597_v41  ;;  %v2957_v39 = vpop.f32.mrf.mxu0 }
 0x1f9   : > { %v642_v58 = vpop.xlane.xlu2 %641  ;;  %3790 = vst [vmem:[#allocation21_spill] sm:$0xff] %v2957_v39 }
 0x1fa   : > { %1731 = vst.msk [vmem:[#allocation2 + $0x38] sm:$0xff] %vm269_vm3, %v2924_v47  ;;  %v2935_v0 = vmax.f32 %v2919_v45, %v642_v58 }
 0x1fc   : > { %1746 = vst.msk [vmem:[#allocation2 + $0xb0] sm:$0xff] %vm269_vm3, %v2935_v0 }
 0x1fe   : > { %v2947_v18 = vpop.eup %2302 }
 0x1ff   : > { %3789 = vst [vmem:[#allocation20_spill] sm:$0xff] %v2947_v18  ;;  %1500 = vperm.xlu0 %2297, %v2947_v18   ;;  %v645_v21 = vpop.xlane.xlu1 %644  ;;  %665 = vmax.xlane.f32.xlu2 %v664_v5  ;;  %v667_v5 = vsel %vm573_vm2, %v2964_v16, -inf }
 0x200   : > { %v2955_v28 = vmax.f32 %v2943_v12, %v645_v21  ;;  %v622_v21 = vsel %vm573_vm2, %v2957_v39, -inf  ;;  %v2982_v16 = vpop.f32.mrf.mxu0 }
 0x201   : > { %v600_v41 = vpop.xlane.xlu2 %599  ;;  %3792 = vst [vmem:[#allocation23_spill] sm:$0xff] %v2982_v16 }
 0x202   : > { %1747 = vst.msk [vmem:[#allocation2 + $0xb8] sm:$0xff] %vm269_vm3, %v2955_v28  ;;  %v2962_v58 = vmax.f32 %v2952_v24, %v600_v41 }
 0x204   : > { %1732 = vst.msk [vmem:[#allocation2 + $0x40] sm:$0xff] %vm269_vm3, %v2962_v58 }
 0x207   : > { %v603_v56 = vpop.xlane.xlu1 %602  ;;  %668 = vmax.xlane.f32.xlu1 %v667_v5  ;;  %623 = vmax.xlane.f32.xlu2 %v622_v21 }
 0x208   : > { %v2974_v37 = vmax.f32 %v550_v7, %v603_v56  ;;  %v2989_v56 = vld [vmem:[#allocation2 + $0xc8] sm:$0xff] }
 0x209   : > { %v648_v41 = vpop.xlane.xlu2 %647  ;;  %3793 = vst [vmem:[#allocation24_spill] sm:$0xff] %v2989_v56 }
 0x20a   : > { %v711_v18 = vsub.f32 %v550_v7, %v2974_v37  ;;  %1733 = vst.msk [vmem:[#allocation2 + $0x48] sm:$0xff] %vm269_vm3, %v2974_v37  ;;  %v2980_v14 = vmax.f32 %v2972_v57, %v648_v41  ;;  %v625_v7 = vsel %vm573_vm2, %v2982_v16, -inf  ;;  %v2993_v41 = vld [vmem:[#allocation2 + $0x50] sm:$0xff] }
 0x20c   : > { %v752_v10 = vmul.f32 1.442695, %v711_v18  ;;  %1748 = vst.msk [vmem:[#allocation2 + $0xc0] sm:$0xff] %vm269_vm3, %v2980_v14  ;;  %920 = vperm.xlu0 %2297, %v2980_v14  }
 0x20e   : > { %2304 = vpow2.f32 %v752_v10  ;;  %v3795_v10 = vsub.f32 %v2725_v11, %v2734_v13 }
 0x20f   : > { %v651_v21 = vpop.xlane.xlu1 %650  ;;  %626 = vmax.xlane.f32.xlu1 %v625_v7  ;;  %v3011_v7 = vld [vmem:[#allocation2 + $0x58] sm:$0xff] }
 0x210   : > { %v2996_v18 = vmax.f32 %v2989_v56, %v651_v21  ;;  %v734_v16 = vmul.f32 1.442695, %v3795_v10  ;;  %v704_v56 = vsub.f32 %v2773_v31, %v2782_v35  ;;  %v3027_v10 = vld [vmem:[#allocation2 + $0xd8] sm:$0xff] }
 0x211   : > { %v606_v39 = vpop.xlane.xlu2 %605 }
 0x212   : > { %1749 = vst.msk [vmem:[#allocation2 + $0xc8] sm:$0xff] %vm269_vm3, %v2996_v18  ;;  %v3001_v5 = vmax.f32 %v2993_v41, %v606_v39  ;;  %2306 = vpow2.f32 %v734_v16  ;;  %v738_v13 = vmul.f32 1.442695, %v704_v56 }
 0x214   : > { %v3003_v51 = vpop.eup %2304  ;;  %1734 = vst.msk [vmem:[#allocation2 + $0x50] sm:$0xff] %vm269_vm3, %v3001_v5  ;;  %2308 = vpow2.f32 %v738_v13  ;;  %v3047_v13 = vld [vmem:[#allocation2 + $0xe0] sm:$0xff] }
 0x215   : > { %3794 = vst [vmem:[#allocation25_spill] sm:$0xff] %v3003_v51  ;;  %1515 = vperm.xlu0 %2297, %v3003_v51   ;;  %v553_v51 = vld [vmem:[#allocation2 + $0x60] sm:$0xff] }
 0x216   : > { %3799 = vst [vmem:[#allocation29_spill] sm:$0xff] %v3047_v13 }
 0x217   : > { %v609_v21 = vpop.xlane.xlu1 %608 }
 0x218   : > { %v3016_v39 = vmax.f32 %v3011_v7, %v609_v21  ;;  %v3029_v16 = vpop.eup %2306 }
 0x219   : > { %v654_v19 = vpop.xlane.xlu2 %653  ;;  %3797 = vst [vmem:[#allocation27_spill] sm:$0xff] %v3029_v16 }
 0x21a   : > { %1735 = vst.msk [vmem:[#allocation2 + $0x58] sm:$0xff] %vm269_vm3, %v3016_v39  ;;  %v3023_v11 = vmax.f32 %v3013_v6, %v654_v19  ;;  %v3042_v6 = vld [vmem:[#allocation2 + $0x68] sm:$0xff] }
 0x21c   : > { %1750 = vst.msk [vmem:[#allocation2 + $0xd0] sm:$0xff] %vm269_vm3, %v3023_v11 }
 0x21f   : > { %v657_v21 = vpop.xlane.xlu1 %656  ;;  %1470 = vperm.xlu2 %2295, %v3029_v16   ;;  %v3044_v16 = vpop.eup %2308 }
 0x220   : > { %v3033_v31 = vmax.f32 %v3027_v10, %v657_v21  ;;  %3798 = vst [vmem:[#allocation28_spill] sm:$0xff] %v3044_v16 }
 0x221   : > { %v612_v12 = vpop.xlane.xlu2 %611 }
 0x222   : > { %1751 = vst.msk [vmem:[#allocation2 + $0xd8] sm:$0xff] %vm269_vm3, %v3033_v31  ;;  %v3037_v19 = vmax.f32 %v553_v51, %v612_v12 }
 0x224   : > { %v714_v56 = vsub.f32 %v553_v51, %v3037_v19  ;;  %1736 = vst.msk [vmem:[#allocation2 + $0x60] sm:$0xff] %vm269_vm3, %v3037_v19 }
 0x226   : > { %v758_v1 = vmul.f32 1.442695, %v714_v56 }
 0x227   : > { %v615_v45 = vpop.xlane.xlu1 %614  ;;  %810 = vperm.xlu2 %2295, %v2782_v35   ;;  %v3060_v35 = vld [vmem:[#allocation2 + $0xe8] sm:$0xff] }
 0x228   : > { %2310 = vpow2.f32 %v758_v1  ;;  %v3050_v21 = vmax.f32 %v3042_v6, %v615_v45  ;;  %1480 = vperm.xlu1 %2296, %v3044_v16   ;;  %3800 = vst [vmem:[#allocation30_spill] sm:$0xff] %v3060_v35  ;;  %v3066_v45 = vld [vmem:[#allocation2 + $0x70] sm:$0xff] }
 0x229   : > { %v660_v51 = vpop.xlane.xlu2 %659 }
 0x22a   : > { %1737 = vst.msk [vmem:[#allocation2 + $0x68] sm:$0xff] %vm269_vm3, %v3050_v21  ;;  %v3056_v12 = vmax.f32 %v3047_v13, %v660_v51 }
 0x22c   : > { %1752 = vst.msk [vmem:[#allocation2 + $0xe0] sm:$0xff] %vm269_vm3, %v3056_v12 }
 0x22e   : > { %v3062_v56 = vpop.eup %2310 }
 0x22f   : > { %3801 = vst [vmem:[#allocation31_spill] sm:$0xff] %v3062_v56  ;;  %1530 = vperm.xlu0 %2297, %v3062_v56   ;;  %v663_v1 = vpop.xlane.xlu1 %662  ;;  %815 = vperm.xlu2 %2295, %v2803_v43   ;;  %v556_v43 = vld [vmem:[#allocation2 + $0x78] sm:$0xff] }
 0x230   : > { %v3069_v16 = vmax.f32 %v3060_v35, %v663_v1  ;;  %890 = vperm.xlu1 %2296, %v2826_v53   ;;  %v1295_v56 = vld [vmem:[%s253_s25] sm:$0x1] }
 0x231   : > { %v618_v51 = vpop.xlane.xlu2 %617  ;;  %v1345_v1 = vsel %vm573_vm2, %v1295_v56, 0  ;;  %v720_v56 = vsub.f32 %v2817_v49, %v2826_v53 }
 0x232   : > { %1753 = vst.msk [vmem:[#allocation2 + $0xe8] sm:$0xff] %vm269_vm3, %v3069_v16  ;;  %v3075_v13 = vmax.f32 %v3066_v45, %v618_v51  ;;  %1354 = vmatpush.bf16.xpose.msra.mxu1 %v1345_v1  ;;  %2267 = vmatpush.bf16.xpose.msra.mxu2 %v1345_v1 }
 0x234   : > { %1738 = vst.msk [vmem:[#allocation2 + $0x70] sm:$0xff] %vm269_vm3, %v3075_v13 }
 0x237   : > { %v621_v35 = vpop.xlane.xlu1 %620  ;;  %895 = vperm.xlu2 %2295, %v2848_v62  }
 0x238   : > { %v3087_v51 = vmax.f32 %v556_v43, %v621_v35  ;;  %820 = vperm.xlu1 %2296, %v2857_v2   ;;  %v770_v2 = vmul.f32 1.442695, %v720_v56 }
 0x23a   : > { %v717_v61 = vsub.f32 %v556_v43, %v3087_v51  ;;  %1739 = vst.msk [vmem:[#allocation2 + $0x78] sm:$0xff] %vm269_vm3, %v3087_v51  ;;  %v744_v43 = vmul.f32 1.442695, %v707_v60 }
 0x23c   : > { %v764_v63 = vmul.f32 1.442695, %v717_v61  ;;  %v723_v61 = vsub.f32 %v2889_v17, %v2898_v23 }
 0x23e   : > { %2312 = vpow2.f32 %v764_v63  ;;  %v801_v63 = vpop.permute.xlu2 %800  ;;  %v776_v49 = vmul.f32 1.442695, %v723_v61  ;;  %v571_v61 = vld [vmem:[#allocation2 + $0xf0] sm:$0xff] }
 0x23f   : > { %825 = vperm.xlu2 %2295, %v2874_v9   ;;  %2314 = vpow2.f32 %v742_v8  ;;  %v958_v53 = vsub.f32 %v2579_v20, %v801_v63 }
 0x240   : > { %900 = vperm.xlu1 %2296, %v2883_v15   ;;  %2316 = vpow2.f32 %v770_v2  ;;  %v729_v2 = vsub.f32 %v3027_v10, %v3033_v31 }
 0x241   : > { %2318 = vpow2.f32 %v744_v43  ;;  %v990_v9 = vmul.f32 1.442695, %v958_v53 }
 0x242   : > { %2320 = vpow2.f32 %v776_v49 }
 0x243   : > { %2322 = vpow2.f32 %v990_v9 }
 0x244   : > { %v3099_v35 = vpop.eup %2312 }
 0x245   : > { %3802 = vst [vmem:[#allocation32_spill] sm:$0xff] %v3099_v35  ;;  %1545 = vperm.xlu0 %2297, %v3099_v35   ;;  %v3102_v3 = vpop.eup %2314 }
 0x246   : > { %3803 = vst [vmem:[#allocation33_spill] sm:$0xff] %v3102_v3  ;;  %v3109_v4 = vpop.eup %2316 }
 0x247   : > { %1490 = vperm.xlu2 %2295, %v3102_v3   ;;  %v3112_v8 = vpop.eup %2318 }
 0x248   : > { %830 = vperm.xlu1 %2296, %v2906_v26   ;;  %3804 = vst [vmem:[#allocation34_spill] sm:$0xff] %v3112_v8  ;;  %v3805_v26 = vsub.f32 %v2972_v57, %v2980_v14  ;;  %v3120_v60 = vpop.eup %2320  ;;  %v788_v57 = vmul.f32 1.442695, %v729_v2 }
 0x24a   : > { %v782_v56 = vmul.f32 1.442695, %v3805_v26 }
 0x24d   : > { %1560 = vperm.xlu0 %2297, %v3109_v4  }
 0x24f   : > { %v806_v1 = vpop.permute.xlu1 %805  ;;  %905 = vperm.xlu2 %2295, %v2898_v23  }
 0x250   : > { %v959_v17 = vsub.f32 %v2584_v22, %v806_v1  ;;  %1495 = vperm.xlu1 %2296, %v3112_v8   ;;  %v3127_v22 = vpop.eup %2322  ;;  %v3149_v1 = vld [vmem:[#allocation2 + $0xf8] sm:$0xff] }
 0x252   : > { %v992_v20 = vmul.f32 1.442695, %v959_v17 }
 0x254   : > { %2324 = vpow2.f32 %v992_v20 }
 0x255   : > { %1575 = vperm.xlu0 %2297, %v3120_v60   ;;  %2326 = vpow2.f32 %v782_v56 }
 0x256   : > { %2328 = vpow2.f32 %v788_v57 }
 0x257   : > { %835 = vperm.xlu2 %2295, %v2924_v47  }
 0x258   : > { %910 = vperm.xlu1 %2296, %v2935_v0  }
 0x25a   : > { %v3129_v23 = vpop.eup %2324 }
 0x25b   : > { %v1279_v14 = vpack.c.bf16 %v3129_v23, %v3127_v22  ;;  %v3133_v43 = vpop.eup %2326 }
 0x25c   : > { %v3139_v10 = vpop.eup %2328 }
 0x25d   : > { %1590 = vperm.xlu0 %2297, %v3133_v43   ;;  %2247 = vmatmul.msk.bf16.vlgmr.msra.gmra.mxu1 %vm573_vm2, %v1279_v14  ;;  %3806 = vst [vmem:[#allocation35_spill] sm:$0xff] %v3139_v10  ;;  %v3172_v14 = vld [vmem:[#allocation2 + $0x88] sm:$0xff] }
 0x25f   : > { %915 = vperm.xlu2 %2295, %v2955_v28  }
 0x260   : > { %840 = vperm.xlu1 %2296, %v2962_v58  }
 0x265   : > { %1605 = vperm.xlu0 %2297, %v3139_v10  }
 0x267   : > { %845 = vperm.xlu2 %2295, %v2974_v37   ;;  %v3151_v37 = vld [vmem:[#allocation2 + $0x80] sm:$0xff] }
 0x268   : > { %850 = vperm.xlu1 %2296, %v3001_v5  }
 0x26f   : > { %855 = vperm.xlu2 %2295, %v3016_v39  }
 0x270   : > { %925 = vperm.xlu1 %2296, %v2996_v18  }
 0x272   : > { %v666_v63 = vpop.xlane.xlu2 %665 }
 0x273   : > { %v700_v49 = vmax.f32 %v571_v61, %v666_v63 }
 0x275   : > { %v732_v53 = vsub.f32 %v571_v61, %v700_v49  ;;  %1754 = vst.msk [vmem:[#allocation2 + $0xf0] sm:$0xff] %vm269_vm3, %v700_v49 }
 0x277   : > { %v794_v9 = vmul.f32 1.442695, %v732_v53  ;;  %930 = vperm.xlu2 %2295, %v3023_v11  }
 0x278   : > { %860 = vperm.xlu1 %2296, %v3037_v19  }
 0x279   : > { %2330 = vpow2.f32 %v794_v9 }
 0x27a   : > { %v669_v17 = vpop.xlane.xlu1 %668  ;;  %v624_v26 = vpop.xlane.xlu2 %623 }
 0x27b   : > { %v3154_v56 = vmax.f32 %v3149_v1, %v669_v17  ;;  %v3157_v20 = vmax.f32 %v3151_v37, %v624_v26 }
 0x27d   : > { %1755 = vst.msk [vmem:[#allocation2 + $0xf8] sm:$0xff] %vm269_vm3, %v3154_v56 }
 0x27e   : > { %1740 = vst.msk [vmem:[#allocation2 + $0x80] sm:$0xff] %vm269_vm3, %v3157_v20 }
 0x27f   : > { %v3167_v57 = vpop.eup %2330  ;;  %865 = vperm.xlu2 %2295, %v3050_v21  }
 0x280   : > { %3807 = vst [vmem:[#allocation36_spill] sm:$0xff] %v3167_v57  ;;  %935 = vperm.xlu1 %2296, %v3033_v31   ;;  %1620 = vperm.xlu0 %2297, %v3167_v57  }
 0x282   : > { %v627_v61 = vpop.xlane.xlu1 %626  ;;  %v3174_v63 = vpop.permute.xlu2 %1470 }
 0x283   : > { %v3177_v53 = vmax.f32 %v3172_v14, %v627_v61 }
 0x285   : > { %1741 = vst.msk [vmem:[#allocation2 + $0x88] sm:$0xff] %vm269_vm3, %v3177_v53 }
 0x287   : > { %940 = vperm.xlu2 %2295, %v3056_v12  }
 0x288   : > { %870 = vperm.xlu1 %2296, %v3075_v13  }
 0x28a   : > { %v811_v9 = vpop.permute.xlu2 %810 }
 0x28b   : > { %v960_v31 = vsub.f32 %v2589_v25, %v811_v9 }
 0x28d   : > { %v994_v17 = vmul.f32 1.442695, %v960_v31 }
 0x28f   : > { %875 = vperm.xlu2 %2295, %v3087_v51   ;;  %2332 = vpow2.f32 %v994_v17 }
 0x290   : > { %945 = vperm.xlu1 %2296, %v3069_v16  }
 0x292   : > { %v816_v26 = vpop.permute.xlu2 %815 }
 0x293   : > { %v961_v2 = vsub.f32 %v2593_v27, %v816_v26 }
 0x295   : > { %v996_v61 = vmul.f32 1.442695, %v961_v2  ;;  %v2333_v3 = vpop.eup %2332 }
 0x296   : > { %v1124_v26 = vsel %vm573_vm2, %v2333_v3, 0.0 }
 0x297   : > { %2334 = vpow2.f32 %v996_v61  ;;  %950 = vperm.xlu2 %2295, %v700_v49  }
 0x298   : > { %880 = vperm.xlu1 %2296, %v3157_v20  }
 0x29a   : > { %v3188_v19 = vpop.permute.xlu1 %1480  ;;  %v896_v8 = vpop.permute.xlu2 %895 }
 0x29b   : > { %v977_v25 = vsub.f32 %v2603_v32, %v896_v8 }
 0x29d   : > { %v3190_v57 = vpop.eup %2334  ;;  %v1028_v27 = vmul.f32 1.442695, %v977_v25 }
 0x29e   : > { %v1280_v51 = vpack.c.bf16 %v3190_v57, %v2333_v3 }
 0x29f   : > { %2336 = vpow2.f32 %v1028_v27 }
 0x2a0   : > { %955 = vperm.xlu1 %2296, %v3154_v56   ;;  %2248 = vmatmul.msk.bf16.gmra.mxu1 %vm573_vm2, %v1280_v51 }
 0x2a2   : > { %v891_v2 = vpop.permute.xlu1 %890  ;;  %v826_v9 = vpop.permute.xlu2 %825 }
 0x2a3   : > { %v976_v49 = vsub.f32 %v2597_v29, %v891_v2  ;;  %v963_v17 = vsub.f32 %v2607_v34, %v826_v9  ;;  %v3210_v2 = vpop.permute.xlu0 %1475 }
 0x2a5   : > { %v1026_v31 = vmul.f32 1.442695, %v976_v49  ;;  %v1000_v61 = vmul.f32 1.442695, %v963_v17  ;;  %v3202_v51 = vpop.eup %2336 }
 0x2a7   : > { %2338 = vpow2.f32 %v1026_v31 }
 0x2a8   : > { %2340 = vpow2.f32 %v1000_v61 }
 0x2aa   : > { %v821_v32 = vpop.permute.xlu1 %820  ;;  %1125 = vadd.xlane.f32.xlu0 %v1124_v26  ;;  %v3199_v8 = vpop.permute.xlu2 %1490 }
 0x2ab   : > { %v962_v35 = vsub.f32 %v2599_v30, %v821_v32  ;;  %v3221_v32 = vpop.permute.xlu0 %1485 }
 0x2ad   : > { %v3204_v25 = vpop.eup %2338  ;;  %v998_v10 = vmul.f32 1.442695, %v962_v35 }
 0x2ae   : > { %3808 = vst [vmem:[#allocation37_spill] sm:$0xff] %v3204_v25  ;;  %v1172_v34 = vsel %vm573_vm2, %v3204_v25, 0.0  ;;  %v3214_v49 = vpop.eup %2340 }
 0x2af   : > { %2342 = vpow2.f32 %v998_v10 }
 0x2b2   : > { %v901_v3 = vpop.permute.xlu1 %900  ;;  %1173 = vadd.xlane.f32.xlu0 %v1172_v34  ;;  %v906_v27 = vpop.permute.xlu2 %905 }
 0x2b3   : > { %v978_v30 = vsub.f32 %v2611_v36, %v901_v3  ;;  %v979_v9 = vsub.f32 %v2619_v40, %v906_v27 }
 0x2b5   : > { %v3216_v35 = vpop.eup %2342  ;;  %v1030_v31 = vmul.f32 1.442695, %v978_v30  ;;  %v1032_v17 = vmul.f32 1.442695, %v979_v9  ;;  %v1118_v9 = vsel %vm573_vm2, %v3127_v22, 0.0 }
 0x2b6   : > { %v1281_v10 = vpack.c.bf16 %v3214_v49, %v3216_v35 }
 0x2b7   : > { %2344 = vpow2.f32 %v1030_v31 }
 0x2b8   : > { %2346 = vpow2.f32 %v1032_v17  ;;  %2249 = vmatmul.msk.bf16.gmra.mxu1 %vm573_vm2, %v1281_v10  ;;  %v3235_v10 = vpop.permute.xlu0 %1500 }
 0x2ba   : > { %v831_v26 = vpop.permute.xlu1 %830  ;;  %v836_v61 = vpop.permute.xlu2 %835 }
 0x2bb   : > { %v964_v36 = vsub.f32 %v2615_v38, %v831_v26  ;;  %v965_v40 = vsub.f32 %v2623_v42, %v836_v61 }
 0x2bd   : > { %v3225_v34 = vpop.eup %2344  ;;  %v1002_v3 = vmul.f32 1.442695, %v964_v36  ;;  %v1004_v27 = vmul.f32 1.442695, %v965_v40  ;;  %v1121_v40 = vsel %vm573_vm2, %v3129_v23, 0.0  ;;  %v709_v23 = vsub.f32 %v2913_v33, %v2924_v47 }
 0x2be   : > { %v3227_v30 = vpop.eup %2346 }
 0x2bf   : > { %2348 = vpow2.f32 %v1002_v3 }
 0x2c0   : > { %2350 = vpow2.f32 %v1004_v27  ;;  %1119 = vadd.xlane.f32.xlu2 %v1118_v9  ;;  %v921_v31 = vpop.permute.xlu0 %920 }
 0x2c2   : > { %v3233_v17 = vpop.permute.xlu1 %1495  ;;  %v916_v38 = vpop.permute.xlu2 %915 }
 0x2c3   : > { %v981_v61 = vsub.f32 %v2635_v48, %v916_v38 }
 0x2c5   : > { %v2349_v42 = vpop.eup %2348  ;;  %v1036_v3 = vmul.f32 1.442695, %v981_v61 }
 0x2c6   : > { %v3237_v26 = vpop.eup %2350  ;;  %v1136_v36 = vsel %vm573_vm2, %v2349_v42, 0.0 }
 0x2c7   : > { %1137 = vadd.xlane.f32.xlu0 %v1136_v36  ;;  %v1282_v22 = vpack.c.bf16 %v3237_v26, %v2349_v42  ;;  %v982_v36 = vsub.f32 %v2643_v52, %v921_v31  ;;  %2352 = vpow2.f32 %v1036_v3  ;;  %v1181_v42 = vsel %vm573_vm2, %v3227_v30, 0.0 }
 0x2c8   : > { %v710_v52 = vsub.f32 %v2952_v24, %v2962_v58  ;;  %v3259_v31 = vpop.permute.xlu0 %1515  ;;  %v712_v24 = vsub.f32 %v2993_v41, %v3001_v5  ;;  %v1437_v5 = vld [vmem:[#allocation4 + $0x8] sm:$0xff] }
 0x2c9   : > { %2250 = vmatmul.msk.bf16.gmra.mxu1 %vm573_vm2, %v1282_v22  ;;  %v1038_v61 = vmul.f32 1.442695, %v982_v36 }
 0x2ca   : > { %v911_v27 = vpop.permute.xlu1 %910  ;;  %1122 = vadd.xlane.f32.xlu1 %v1121_v40  ;;  %v846_v9 = vpop.permute.xlu2 %845  ;;  %v750_v47 = vmul.f32 1.442695, %v710_v52 }
 0x2cb   : > { %v980_v29 = vsub.f32 %v2627_v44, %v911_v27  ;;  %v967_v25 = vsub.f32 %v2639_v50, %v846_v9  ;;  %v1436_v9 = vld [vmem:[#allocation4] sm:$0xff] }
 0x2cc   : > { %v1628_v58 = vmul.f32 %v3174_v63, %v1436_v9 }
 0x2cd   : > { %v1034_v48 = vmul.f32 1.442695, %v980_v29  ;;  %v1008_v38 = vmul.f32 1.442695, %v967_v25  ;;  %v3253_v50 = vpop.eup %2352  ;;  %v748_v29 = vmul.f32 1.442695, %v709_v23 }
 0x2cf   : > { %2354 = vpow2.f32 %v1034_v48  ;;  %1182 = vadd.xlane.f32.xlu0 %v1181_v42 }
 0x2d0   : > { %2356 = vpow2.f32 %v1008_v38  ;;  %v3276_v52 = vpop.permute.xlu0 %1530 }
 0x2d1   : > { %2358 = vpow2.f32 %v1038_v61  ;;  %v713_v61 = vsub.f32 %v3011_v7, %v3016_v39  ;;  %v715_v39 = vsub.f32 %v3042_v6, %v3050_v21 }
 0x2d2   : > { %v841_v22 = vpop.permute.xlu1 %840  ;;  %v856_v40 = vpop.permute.xlu2 %855 }
 0x2d3   : > { %v966_v44 = vsub.f32 %v2631_v46, %v841_v22  ;;  %v756_v9 = vmul.f32 1.442695, %v713_v61  ;;  %v969_v7 = vsub.f32 %v2665_v59, %v856_v40  ;;  %v716_v59 = vsub.f32 %v3066_v45, %v3075_v13  ;;  %v3809_v45 = vld [vmem:[#allocation7_spill] sm:$0xff] }
 0x2d4   : > { %v760_v6 = vmul.f32 1.442695, %v715_v39 }
 0x2d5   : > { %v3257_v25 = vpop.eup %2354  ;;  %v1006_v3 = vmul.f32 1.442695, %v966_v44  ;;  %v754_v44 = vmul.f32 1.442695, %v712_v24  ;;  %v1012_v40 = vmul.f32 1.442695, %v969_v7 }
 0x2d6   : > { %v2357_v27 = vpop.eup %2356 }
 0x2d7   : > { %2360 = vpow2.f32 %v1006_v3  ;;  %v1145_v46 = vsel %vm573_vm2, %v2357_v27, 0.0  ;;  %v3270_v23 = vpop.eup %2358 }
 0x2d8   : > { %1146 = vadd.xlane.f32.xlu0 %v1145_v46  ;;  %885 = vperm.xlu2 %2295, %v3177_v53   ;;  %2362 = vpow2.f32 %v748_v29  ;;  %v1190_v3 = vsel %vm573_vm2, %v3270_v23, 0.0  ;;  %v1629_v46 = vmul.f32 %v3210_v2, %v1437_v5  ;;  %v3298_v21 = vpop.permute.xlu0 %1545 }
 0x2d9   : > { %2364 = vpow2.f32 %v750_v47 }
 0x2da   : > { %v851_v48 = vpop.permute.xlu1 %850  ;;  %v1356_v38 = vpop.f32.mrf.mxu1  ;;  %2366 = vpow2.f32 %v754_v44 }
 0x2db   : > { %v1660_v36 = vadd.f32 %v1628_v58, %v1356_v38  ;;  %v3268_v42 = vpop.permute.xlu2 %930  ;;  %v968_v41 = vsub.f32 %v2649_v55, %v851_v48  ;;  %2368 = vpow2.f32 %v756_v9  ;;  %v762_v38 = vmul.f32 1.442695, %v716_v59  ;;  %v3812_v59 = vld [vmem:[#allocation9_spill] sm:$0xff] }
 0x2dd   : > { %v3274_v22 = vpop.eup %2360  ;;  %1692 = vst.msk [vmem:[#allocation4] sm:$0xff] %vm334_vm1, %v1660_v36  ;;  %v721_v36 = vsub.f32 %v2834_v54, %v2848_v62  ;;  %v3811_v54 = vld [vmem:[#allocation6_spill] sm:$0xff] }
 0x2de   : > { %v1283_v63 = vpack.c.bf16 %v2357_v27, %v3274_v22  ;;  %v3281_v29 = vpop.eup %2362  ;;  %v1010_v27 = vmul.f32 1.442695, %v968_v41  ;;  %v984_v62 = vsub.f32 %v3811_v54, %v3268_v42 }
 0x2df   : > { %v3291_v55 = vpop.eup %2364  ;;  %v772_v9 = vmul.f32 1.442695, %v721_v36 }
 0x2e0   : > { %1191 = vadd.xlane.f32.xlu0 %v1190_v3  ;;  %1505 = vperm.xlu2 %2295, %v3281_v29   ;;  %2370 = vpow2.f32 %v1010_v27  ;;  %v3301_v2 = vpop.eup %2366  ;;  %v3322_v27 = vpop.permute.xlu0 %1560 }
 0x2e1   : > { %2251 = vmatmul.msk.bf16.gmra.mxu1 %vm573_vm2, %v1283_v63  ;;  %2372 = vpow2.f32 %v1012_v40  ;;  %v3306_v61 = vpop.eup %2368  ;;  %v3810_v63 = vld [vmem:[#allocation16_spill] sm:$0xff] }
 0x2e2   : > { %v3293_v47 = vpop.permute.xlu1 %925  ;;  %v1358_v24 = vpop.f32.mrf.mxu1  ;;  %2374 = vpow2.f32 %v760_v6  ;;  %v722_v3 = vsub.f32 %v3810_v63, %v2883_v15  ;;  %v3813_v15 = vld [vmem:[#allocation17_spill] sm:$0xff] }
 0x2e3   : > { %v1661_v58 = vadd.f32 %v1629_v46, %v1358_v24  ;;  %v866_v48 = vpop.permute.xlu2 %865  ;;  %1510 = vperm.xlu1 %2296, %v3291_v55   ;;  %2376 = vpow2.f32 %v762_v38  ;;  %v724_v6 = vsub.f32 %v3813_v15, %v2935_v0  ;;  %v1042_v38 = vmul.f32 1.442695, %v984_v62  ;;  %v3817_v0 = vld [vmem:[#allocation13_spill] sm:$0xff] }
 0x2e4   : > { %v971_v40 = vsub.f32 %v3812_v59, %v866_v48  ;;  %v3816_v48 = vld [vmem:[#allocation19_spill] sm:$0xff] }
 0x2e5   : > { %1693 = vst.msk [vmem:[#allocation4 + $0x8] sm:$0xff] %vm334_vm1, %v1661_v58  ;;  %v774_v58 = vmul.f32 1.442695, %v722_v3  ;;  %v725_v63 = vsub.f32 %v3816_v48, %v2955_v28  ;;  %v3818_v28 = vld [vmem:[#allocation24_spill] sm:$0xff] }
 0x2e6   : > { %v3312_v41 = vpop.eup %2370  ;;  %v1016_v3 = vmul.f32 1.442695, %v971_v40 }
 0x2e7   : > { %v3316_v39 = vpop.eup %2372  ;;  %v780_v15 = vmul.f32 1.442695, %v725_v63  ;;  %v3820_v63 = vld [vmem:[#allocation10_spill] sm:$0xff] }
 0x2e8   : > { %1520 = vperm.xlu2 %2295, %v3301_v2   ;;  %v3320_v46 = vpop.eup %2374  ;;  %v1284_v24 = vpack.c.bf16 %v3316_v39, %v3312_v41  ;;  %v3344_v40 = vpop.permute.xlu0 %1575 }
 0x2e9   : > { %v3331_v42 = vpop.eup %2376 }
 0x2ea   : > { %v861_v13 = vpop.permute.xlu1 %860  ;;  %3814 = vst [vmem:[#allocation7_spill] sm:$0xff] %v3331_v42 }
 0x2eb   : > { %v970_v44 = vsub.f32 %v3809_v45, %v861_v13  ;;  %v3309_v5 = vpop.permute.xlu2 %940  ;;  %1525 = vperm.xlu1 %2296, %v3306_v61   ;;  %v3815_v13 = vld [vmem:[#allocation8_spill] sm:$0xff] }
 0x2ed   : > { %v1014_v7 = vmul.f32 1.442695, %v970_v44 }
 0x2ef   : > { %2378 = vpow2.f32 %v1014_v7  ;;  %v778_v7 = vmul.f32 1.442695, %v724_v6 }
 0x2f0   : > { %1535 = vperm.xlu2 %2295, %v3320_v46   ;;  %2380 = vpow2.f32 %v772_v9 }
 0x2f1   : > { %2252 = vmatmul.msk.bf16.gmra.mxu1 %vm573_vm2, %v1284_v24  ;;  %2382 = vpow2.f32 %v774_v58  ;;  %v727_v58 = vsub.f32 %v3818_v28, %v2996_v18 }
 0x2f2   : > { %v936_v36 = vpop.permute.xlu1 %935  ;;  %2384 = vpow2.f32 %v1042_v38 }
 0x2f3   : > { %v985_v45 = vsub.f32 %v3815_v13, %v936_v36  ;;  %v876_v44 = vpop.permute.xlu2 %875  ;;  %1540 = vperm.xlu1 %2296, %v3331_v42   ;;  %v3819_v13 = vld [vmem:[#allocation26_spill] sm:$0xff]  ;;  %v784_v18 = vmul.f32 1.442695, %v727_v58 }
 0x2f4   : > { %v973_v59 = vsub.f32 %v3817_v0, %v876_v44  ;;  %v1075_v42 = vld [vmem:[#allocation3 + $0xa8] sm:$0xff] }
 0x2f5   : > { %v2379_v9 = vpop.eup %2378  ;;  %v1044_v54 = vmul.f32 1.442695, %v985_v45  ;;  %v728_v45 = vsub.f32 %v3819_v13, %v3023_v11 }
 0x2f6   : > { %v1154_v24 = vsel %vm573_vm2, %v2379_v9, 0.0  ;;  %v3339_v62 = vpop.eup %2380  ;;  %v1020_v6 = vmul.f32 1.442695, %v973_v59 }
 0x2f7   : > { %2386 = vpow2.f32 %v1044_v54  ;;  %1155 = vadd.xlane.f32.xlu0 %v1154_v24  ;;  %v3346_v36 = vpop.eup %2382  ;;  %v3821_v54 = vld [vmem:[#allocation18_spill] sm:$0xff]  ;;  %v3822_v24 = vld [vmem:[#allocation11_spill] sm:$0xff]  ;;  %v786_v33 = vmul.f32 1.442695, %v728_v45  ;;  %v3374_v45 = vpop.permute.xlu0 %1590 }
 0x2f8   : > { %2388 = vpow2.f32 %v1016_v3  ;;  %1565 = vperm.xlu2 %2295, %v3339_v62   ;;  %v3351_v48 = vpop.eup %2384  ;;  %v986_v3 = vsub.f32 %v3820_v63, %v3309_v5  ;;  %3824 = vst [vmem:[#allocation16_spill] sm:$0xff] %v3374_v45  ;;  %v1439_v45 = vld [vmem:[#allocation4 + $0x18] sm:$0xff] }
 0x2f9   : > { %2390 = vpow2.f32 %v778_v7 }
 0x2fa   : > { %v871_v38 = vpop.permute.xlu1 %870  ;;  %2392 = vpow2.f32 %v780_v15  ;;  %v1046_v58 = vmul.f32 1.442695, %v986_v3  ;;  %v3826_v3 = vld [vmem:[#allocation30_spill] sm:$0xff] }
 0x2fb   : > { %v951_v44 = vpop.permute.xlu2 %950  ;;  %1570 = vperm.xlu1 %2296, %v3346_v36   ;;  %2394 = vpow2.f32 %v1020_v6  ;;  %v972_v28 = vsub.f32 %v3822_v24, %v871_v38  ;;  %v3823_v6 = vld [vmem:[#allocation29_spill] sm:$0xff] }
 0x2fc   : > { %v988_v0 = vsub.f32 %v3821_v54, %v951_v44  ;;  %2396 = vpow2.f32 %v784_v18  ;;  %v730_v44 = vsub.f32 %v3823_v6, %v3056_v12  ;;  %v731_v18 = vsub.f32 %v3826_v3, %v3069_v16 }
 0x2fd   : > { %v3355_v7 = vpop.eup %2386  ;;  %v1018_v54 = vmul.f32 1.442695, %v972_v28  ;;  %2398 = vpow2.f32 %v786_v33 }
 0x2fe   : > { %v3358_v59 = vpop.eup %2388  ;;  %v1199_v11 = vsel %vm573_vm2, %v3355_v7, 0.0  ;;  %v1050_v38 = vmul.f32 1.442695, %v988_v0  ;;  %2400 = vpow2.f32 %v1046_v58  ;;  %v790_v12 = vmul.f32 1.442695, %v730_v44 }
 0x2ff   : > { %v3365_v15 = vpop.eup %2390  ;;  %1200 = vadd.xlane.f32.xlu0 %v1199_v11  ;;  %v1285_v5 = vpack.c.bf16 %v3358_v59, %v2379_v9  ;;  %v3825_v11 = vld [vmem:[#allocation12_spill] sm:$0xff]  ;;  %v792_v33 = vmul.f32 1.442695, %v731_v18  ;;  %v3402_v3 = vpop.permute.xlu0 %1605 }
 0x300   : > { %1580 = vperm.xlu2 %2295, %v3365_v15   ;;  %v3372_v63 = vpop.eup %2392  ;;  %2402 = vpow2.f32 %v1050_v38  ;;  %v719_v38 = vsub.f32 %v3172_v14, %v3177_v53  ;;  %3828 = vst [vmem:[#allocation6_spill] sm:$0xff] %v3402_v3  ;;  %v3830_v53 = vld [vmem:[#allocation22_spill] sm:$0xff] }
 0x301   : > { %2253 = vmatmul.msk.bf16.gmra.mxu1 %vm573_vm2, %v1285_v5  ;;  %v2395_v13 = vpop.eup %2394  ;;  %2404 = vpow2.f32 %v1018_v54 }
 0x302   : > { %v946_v24 = vpop.permute.xlu1 %945  ;;  %v1163_v5 = vsel %vm573_vm2, %v2395_v13, 0.0  ;;  %v3381_v28 = vpop.eup %2396  ;;  %v768_v14 = vmul.f32 1.442695, %v719_v38 }
 0x303   : > { %v987_v9 = vsub.f32 %v3825_v11, %v946_v24  ;;  %1585 = vperm.xlu1 %2296, %v3372_v63   ;;  %v3384_v6 = vpop.eup %2398  ;;  %v3827_v11 = vsub.f32 %v3151_v37, %v3157_v20 }
 0x304   : > { %v3386_v24 = vpop.eup %2400 }
 0x305   : > { %v1048_v0 = vmul.f32 1.442695, %v987_v9  ;;  %v766_v9 = vmul.f32 1.442695, %v3827_v11  ;;  %v3831_v11 = vsub.f32 %v3149_v1, %v3154_v56 }
 0x306   : > { %v3390_v58 = vpop.eup %2402 }
 0x307   : > { %2406 = vpow2.f32 %v1048_v0  ;;  %1164 = vadd.xlane.f32.xlu0 %v1163_v5  ;;  %v3393_v44 = vpop.eup %2404  ;;  %v1208_v18 = vsel %vm573_vm2, %v3390_v58, 0.0 }
 0x308   : > { %1595 = vperm.xlu2 %2295, %v3381_v28   ;;  %2408 = vpow2.f32 %v790_v12  ;;  %v1286_v5 = vpack.c.bf16 %v2395_v13, %v3393_v44  ;;  %v3420_v12 = vpop.permute.xlu0 %1620 }
 0x309   : > { %2410 = vpow2.f32 %v792_v33  ;;  %3832 = vst [vmem:[#allocation17_spill] sm:$0xff] %v3420_v12 }
 0x30a   : > { %v3388_v16 = vpop.permute.xlu1 %880  ;;  %2412 = vpow2.f32 %v766_v9  ;;  %v1438_v9 = vld [vmem:[#allocation4 + $0x10] sm:$0xff] }
 0x30b   : > { %1600 = vperm.xlu1 %2296, %v3384_v6   ;;  %2414 = vpow2.f32 %v768_v14  ;;  %v1630_v14 = vmul.f32 %v3188_v19, %v1438_v9  ;;  %v1072_v19 = vld [vmem:[#allocation3 + $0x90] sm:$0xff]  ;;  %v1631_v9 = vmul.f32 %v3221_v32, %v1439_v45  ;;  %v3838_v45 = vld [vmem:[#allocation21_spill] sm:$0xff] }
 0x30c   : > { %v1060_v32 = vld [vmem:[#allocation3 + $0x30] sm:$0xff] }
 0x30d   : > { %v3397_v54 = vpop.eup %2406 }
 0x30e   : > { %v3408_v0 = vpop.eup %2408 }
 0x30f   : > { %1209 = vadd.xlane.f32.xlu0 %v1208_v18  ;;  %v3413_v37 = vpop.eup %2410  ;;  %v796_v18 = vmul.f32 1.442695, %v3831_v11 }
 0x310   : > { %1610 = vperm.xlu2 %2295, %v3408_v0   ;;  %3829 = vst [vmem:[#allocation9_spill] sm:$0xff] %v3413_v37  ;;  %v3422_v38 = vpop.eup %2412 }
 0x311   : > { %2254 = vmatmul.msk.bf16.gmra.mxu1 %vm573_vm2, %v1286_v5  ;;  %3833 = vst [vmem:[#allocation8_spill] sm:$0xff] %v3422_v38  ;;  %v1056_v5 = vld [vmem:[#allocation3 + $0x10] sm:$0xff]  ;;  %v3425_v3 = vpop.eup %2414 }
 0x312   : > { %v956_v20 = vpop.permute.xlu1 %955  ;;  %3834 = vst [vmem:[#allocation19_spill] sm:$0xff] %v3425_v3 }
 0x313   : > { %v989_v33 = vsub.f32 %v3830_v53, %v956_v20  ;;  %1615 = vperm.xlu1 %2296, %v3413_v37   ;;  %v3835_v20 = vld [vmem:[#allocation28_spill] sm:$0xff] }
 0x314   : > { %v1088_v1 = vmul.f32 %v3835_v20, %v1056_v5  ;;  %v1104_v5 = vmul.f32 %v3109_v4, %v1072_v19  ;;  %v974_v19 = vsub.f32 %v3838_v45, %v3388_v16 }
 0x315   : > { %v1052_v13 = vmul.f32 1.442695, %v989_v33 }
 0x317   : > { %2416 = vpow2.f32 %v1052_v13  ;;  %v3837_v13 = vld [vmem:[#allocation27_spill] sm:$0xff] }
 0x318   : > { %1550 = vperm.xlu2 %2295, %v3422_v38   ;;  %2418 = vpow2.f32 %v796_v18 }
 0x31b   : > { %1555 = vperm.xlu1 %2296, %v3425_v3  }
 0x31d   : > { %v3430_v56 = vpop.eup %2416  ;;  %v1361_v53 = vpop.f32.mrf.mxu1 }
 0x31e   : > { %v1126_v33 = vpop.xlane.xlu0 %1125  ;;  %v1662_v11 = vadd.f32 %v1630_v14, %v1361_v53  ;;  %v3434_v18 = vpop.eup %2418 }
 0x31f   : > { %v1216_v12 = vadd.f32 %v1126_v33, %v1088_v1  ;;  %3836 = vst [vmem:[#allocation13_spill] sm:$0xff] %v3434_v18  ;;  %v1054_v33 = vld [vmem:[#allocation3] sm:$0xff] }
 0x320   : > { %1694 = vst.msk [vmem:[#allocation4 + $0x10] sm:$0xff] %vm334_vm1, %v1662_v11  ;;  %1625 = vperm.xlu2 %2295, %v3434_v18   ;;  %v1440_v11 = vld [vmem:[#allocation4 + $0x20] sm:$0xff]  ;;  %v1086_v18 = vmul.f32 %v3837_v13, %v1054_v33  ;;  %v1022_v13 = vmul.f32 1.442695, %v974_v19 }
 0x321   : > { %1249 = vst.msk [vmem:[#allocation3 + $0x10] sm:$0xff] %vm269_vm3, %v1216_v12  ;;  %v1632_v12 = vmul.f32 %v3199_v8, %v1440_v11 }
 0x322   : > { %2420 = vpow2.f32 %v1022_v13 }
 0x325   : > { %v1363_v20 = vpop.f32.mrf.mxu1 }
 0x326   : > { %v1174_v14 = vpop.xlane.xlu0 %1173  ;;  %v1663_v1 = vadd.f32 %v1631_v9, %v1363_v20  ;;  %v1441_v9 = vld [vmem:[#allocation4 + $0x28] sm:$0xff] }
 0x327   : > { %v1232_v53 = vadd.f32 %v1174_v14, %v1104_v5  ;;  %v3839_v5 = vld [vmem:[#allocation20_spill] sm:$0xff]  ;;  %v1055_v14 = vld [vmem:[#allocation3 + $0x8] sm:$0xff]  ;;  %v1633_v8 = vmul.f32 %v3233_v17, %v1441_v9  ;;  %v1107_v17 = vmul.f32 %v3120_v60, %v1075_v42 }
 0x328   : > { %1695 = vst.msk [vmem:[#allocation4 + $0x18] sm:$0xff] %vm334_vm1, %v1663_v1  ;;  %v1092_v20 = vmul.f32 %v3839_v5, %v1060_v32  ;;  %v1442_v32 = vld [vmem:[#allocation4 + $0x30] sm:$0xff]  ;;  %v1130_v5 = vsel %vm573_vm2, %v3216_v35, 0.0  ;;  %v1063_v42 = vld [vmem:[#allocation3 + $0x48] sm:$0xff]  ;;  %v1443_v35 = vld [vmem:[#allocation4 + $0x38] sm:$0xff] }
 0x329   : > { %1265 = vst.msk [vmem:[#allocation3 + $0x90] sm:$0xff] %vm269_vm3, %v1232_v53 }
 0x333   : > { %v1120_v3 = vpop.xlane.xlu2 %1119 }
 0x334   : > { %v1214_v37 = vadd.f32 %v1120_v3, %v1086_v18  ;;  %v3840_v3 = vld [vmem:[#allocation23_spill] sm:$0xff] }
 0x335   : > { %v1366_v38 = vpop.f32.mrf.mxu1 }
 0x336   : > { %1247 = vst.msk [vmem:[#allocation3] sm:$0xff] %vm269_vm3, %v1214_v37  ;;  %v1664_v4 = vadd.f32 %v1632_v12, %v1366_v38  ;;  %v3841_v37 = vld [vmem:[#allocation14_spill] sm:$0xff] }
 0x337   : > { %v1087_v38 = vmul.f32 %v3841_v37, %v1055_v14  ;;  %v1634_v14 = vmul.f32 %v3235_v10, %v1442_v32 }
 0x338   : > { %1696 = vst.msk [vmem:[#allocation4 + $0x20] sm:$0xff] %vm334_vm1, %v1664_v4 }
 0x33a   : > { %v1138_v1 = vpop.xlane.xlu0 %1137 }
 0x33b   : > { %v1220_v53 = vadd.f32 %v1138_v1, %v1092_v20  ;;  %v886_v33 = vpop.permute.xlu2 %885  ;;  %v3459_v20 = vpop.eup %2420 }
 0x33c   : > { %v975_v18 = vsub.f32 %v3840_v3, %v886_v33  ;;  %v3842_v3 = vld [vmem:[#allocation25_spill] sm:$0xff] }
 0x33d   : > { %1253 = vst.msk [vmem:[#allocation3 + $0x30] sm:$0xff] %vm269_vm3, %v1220_v53  ;;  %v1123_v11 = vpop.xlane.xlu1 %1122  ;;  %v1368_v16 = vpop.f32.mrf.mxu1 }
 0x33e   : > { %v1024_v12 = vmul.f32 1.442695, %v975_v18  ;;  %v1215_v4 = vadd.f32 %v1123_v11, %v1087_v38  ;;  %v1665_v45 = vadd.f32 %v1633_v8, %v1368_v16  ;;  %v1127_v8 = vsel %vm573_vm2, %v3190_v57, 0.0 }
 0x33f   : > { %v1095_v18 = vmul.f32 %v3842_v3, %v1063_v42  ;;  %v1175_v11 = vsel %vm573_vm2, %v3202_v51, 0.0  ;;  %v1142_v3 = vsel %vm573_vm2, %v3274_v22, 0.0  ;;  %v3846_v22 = vpack.c.bf16 %v3227_v30, %v3225_v34  ;;  %v3848_v30 = vld [vmem:[#allocation35_spill] sm:$0xff] }
 0x340   : > { %2422 = vpow2.f32 %v1024_v12  ;;  %1248 = vst.msk [vmem:[#allocation3 + $0x8] sm:$0xff] %vm269_vm3, %v1215_v4 }
 0x341   : > { %1697 = vst.msk [vmem:[#allocation4 + $0x28] sm:$0xff] %vm334_vm1, %v1665_v45  ;;  %v1078_v45 = vld [vmem:[#allocation3 + $0xc0] sm:$0xff] }
 0x342   : > { %v1183_v19 = vpop.xlane.xlu0 %1182  ;;  %v1110_v32 = vmul.f32 %v3133_v43, %v1078_v45  ;;  %v3845_v43 = vld [vmem:[#allocation5_spill] sm:$0xff] }
 0x343   : > { %v1235_v9 = vadd.f32 %v1183_v19, %v1107_v17  ;;  %v1506_v10 = vpop.permute.xlu2 %1505  ;;  %v1133_v17 = vsel %vm573_vm2, %v3214_v49, 0.0  ;;  %v983_v42 = vsub.f32 %v3845_v43, %v3293_v47 }
 0x344   : > { %v1635_v16 = vmul.f32 %v1506_v10, %v1443_v35 }
 0x345   : > { %1268 = vst.msk [vmem:[#allocation3 + $0xa8] sm:$0xff] %vm269_vm3, %v1235_v9  ;;  %1131 = vadd.xlane.f32.xlu1 %v1130_v5  ;;  %v1139_v5 = vsel %vm573_vm2, %v3237_v26, 0.0  ;;  %v1184_v26 = vsel %vm573_vm2, %v3257_v25, 0.0  ;;  %v1040_v35 = vmul.f32 1.442695, %v983_v42  ;;  %v1157_v42 = vsel %vm573_vm2, %v3358_v59, 0.0 }
 0x346   : > { %v3463_v1 = vpop.eup %2422  ;;  %v1371_v13 = vpop.f32.mrf.mxu1  ;;  %v3850_v59 = vld [vmem:[#allocation32_spill] sm:$0xff] }
 0x347   : > { %v1666_v53 = vadd.f32 %v1634_v14, %v1371_v13  ;;  %v1287_v60 = vpack.c.bf16 %v3463_v1, %v3459_v20  ;;  %v1792_v33 = vld [vmem:[#allocation3 + $0x8] sm:$0xff]  ;;  %v1178_v14 = vsel %vm573_vm2, %v3225_v34, 0.0  ;;  %v3843_v13 = vld [vmem:[#allocation37_spill] sm:$0xff]  ;;  %v1151_v34 = vsel %vm573_vm2, %v3316_v39, 0.0 }
 0x348   : > { %2424 = vrcp.f32 %v1792_v33  ;;  %v3844_v49 = vpack.c.bf16 %v3202_v51, %v3843_v13  ;;  %v1445_v51 = vld [vmem:[#allocation4 + $0x48] sm:$0xff] }
 0x349   : > { %1698 = vst.msk [vmem:[#allocation4 + $0x30] sm:$0xff] %vm334_vm1, %v1666_v53  ;;  %1128 = vadd.xlane.f32.xlu2 %v1127_v8  ;;  %2255 = vmatmul.msk.bf16.vlgmr.msra.gmra.mxu2 %vm573_vm2, %v1287_v60  ;;  %v1444_v53 = vld [vmem:[#allocation4 + $0x40] sm:$0xff]  ;;  %2426 = vpow2.f32 %v1040_v35  ;;  %v1637_v47 = vmul.f32 %v3259_v31, %v1445_v51  ;;  %v1446_v31 = vld [vmem:[#allocation4 + $0x50] sm:$0xff] }
 0x34b   : > { %v1147_v37 = vpop.xlane.xlu0 %1146 }
 0x34c   : > { %v1223_v38 = vadd.f32 %v1147_v37, %v1095_v18  ;;  %v1148_v18 = vsel %vm573_vm2, %v3312_v41, 0.0  ;;  %v3847_v41 = vld [vmem:[#allocation31_spill] sm:$0xff] }
 0x34d   : > { %1176 = vadd.xlane.f32.xlu1 %v1175_v11 }
 0x34e   : > { %v2425_v12 = vpop.eup %2424  ;;  %1256 = vst.msk [vmem:[#allocation3 + $0x48] sm:$0xff] %vm269_vm3, %v1223_v38  ;;  %v1373_v57 = vpop.f32.mrf.mxu1  ;;  %v1066_v38 = vld [vmem:[#allocation3 + $0x60] sm:$0xff] }
 0x34f   : > { %v1667_v4 = vadd.f32 %v1635_v16, %v1373_v57  ;;  %1862 = vperm.xlu0 %2297, %v2425_v12   ;;  %v1187_v16 = vsel %vm573_vm2, %v3253_v50, 0.0  ;;  %v3500_v12 = vpop.eup %2426  ;;  %v1098_v57 = vmul.f32 %v3847_v41, %v1066_v38  ;;  %v1202_v38 = vsel %vm573_vm2, %v3386_v24, 0.0  ;;  %v1084_v41 = vld [vmem:[#allocation3 + $0xf0] sm:$0xff] }
 0x351   : > { %1699 = vst.msk [vmem:[#allocation4 + $0x38] sm:$0xff] %vm334_vm1, %v1667_v4  ;;  %1134 = vadd.xlane.f32.xlu2 %v1133_v17  ;;  %v1521_v4 = vpop.permute.xlu2 %1520 }
 0x353   : > { %v1192_v19 = vpop.xlane.xlu0 %1191 }
 0x354   : > { %v1238_v9 = vadd.f32 %v1192_v19, %v1110_v32  ;;  %v1193_v32 = vsel %vm573_vm2, %v3500_v12, 0.0  ;;  %v1638_v19 = vmul.f32 %v1521_v4, %v1446_v31  ;;  %v1449_v4 = vld [vmem:[#allocation4 + $0x68] sm:$0xff] }
 0x355   : > { %1140 = vadd.xlane.f32.xlu1 %v1139_v5  ;;  %v1511_v60 = vpop.permute.xlu1 %1510  ;;  %v1081_v5 = vld [vmem:[#allocation3 + $0xd8] sm:$0xff] }
 0x356   : > { %1271 = vst.msk [vmem:[#allocation3 + $0xc0] sm:$0xff] %vm269_vm3, %v1238_v9  ;;  %v1636_v33 = vmul.f32 %v1511_v60, %v1444_v53  ;;  %v1113_v13 = vmul.f32 %v3848_v30, %v1081_v5 }
 0x359   : > { %1179 = vadd.xlane.f32.xlu2 %v1178_v14  ;;  %2256 = vmatmul.msk.bf16.gmra.mxu2 %vm573_vm2, %v3844_v49  ;;  %v1447_v49 = vld [vmem:[#allocation4 + $0x58] sm:$0xff]  ;;  %v1536_v39 = vpop.permute.xlu2 %1535 }
 0x35d   : > { %1185 = vadd.xlane.f32.xlu1 %v1184_v26  ;;  %v1526_v53 = vpop.permute.xlu1 %1525 }
 0x35e   : > { %v1376_v8 = vpop.f32.mrf.mxu1  ;;  %v1639_v26 = vmul.f32 %v1526_v53, %v1447_v49 }
 0x35f   : > { %v1668_v10 = vadd.f32 %v1636_v33, %v1376_v8  ;;  %v1069_v8 = vld [vmem:[#allocation3 + $0x78] sm:$0xff] }
 0x360   : > { %v1101_v51 = vmul.f32 %v3850_v59, %v1069_v8 }
 0x361   : > { %1700 = vst.msk [vmem:[#allocation4 + $0x40] sm:$0xff] %vm334_vm1, %v1668_v10  ;;  %1143 = vadd.xlane.f32.xlu2 %v1142_v3  ;;  %v1196_v10 = vsel %vm573_vm2, %v3351_v48, 0.0  ;;  %v3849_v3 = vpack.c.bf16 %v3253_v50, %v3257_v25  ;;  %v1160_v50 = vsel %vm573_vm2, %v3393_v44, 0.0  ;;  %v3851_v25 = vld [vmem:[#allocation36_spill] sm:$0xff]  ;;  %v1291_v44 = vpack.c.bf16 %v3500_v12, %v3270_v23 }
 0x362   : > { %v1116_v31 = vmul.f32 %v3851_v25, %v1084_v41  ;;  %v1451_v23 = vld [vmem:[#allocation4 + $0x78] sm:$0xff]  ;;  %v3855_v41 = vpack.c.bf16 %v3430_v56, %v3390_v58 }
 0x365   : > { %1149 = vadd.xlane.f32.xlu1 %v1148_v18  ;;  %v1448_v18 = vld [vmem:[#allocation4 + $0x60] sm:$0xff] }
 0x366   : > { %v1378_v37 = vpop.f32.mrf.mxu1 }
 0x367   : > { %v1669_v11 = vadd.f32 %v1637_v47, %v1378_v37 }
 0x369   : > { %1701 = vst.msk [vmem:[#allocation4 + $0x48] sm:$0xff] %vm334_vm1, %v1669_v11  ;;  %1188 = vadd.xlane.f32.xlu2 %v1187_v16  ;;  %2257 = vmatmul.msk.bf16.gmra.mxu2 %vm573_vm2, %v3846_v22  ;;  %v1640_v11 = vmul.f32 %v3276_v52, %v1448_v18  ;;  %v1541_v16 = vpop.permute.xlu1 %1540 }
 0x36a   : > { %v1156_v45 = vpop.xlane.xlu0 %1155 }
 0x36b   : > { %v1226_v17 = vadd.f32 %v1156_v45, %v1098_v57  ;;  %v3534_v45 = vpop.permute.xlu2 %1565 }
 0x36d   : > { %1259 = vst.msk [vmem:[#allocation3 + $0x60] sm:$0xff] %vm269_vm3, %v1226_v17  ;;  %1194 = vadd.xlane.f32.xlu1 %v1193_v32  ;;  %v1166_v32 = vsel %vm573_vm2, %v3459_v20, 0.0  ;;  %v1450_v20 = vld [vmem:[#allocation4 + $0x70] sm:$0xff] }
 0x36e   : > { %v1381_v9 = vpop.f32.mrf.mxu1 }
 0x36f   : > { %v1670_v14 = vadd.f32 %v1638_v19, %v1381_v9  ;;  %v1641_v19 = vmul.f32 %v1536_v39, %v1449_v4 }
 0x371   : > { %1702 = vst.msk [vmem:[#allocation4 + $0x50] sm:$0xff] %vm334_vm1, %v1670_v14  ;;  %1152 = vadd.xlane.f32.xlu2 %v1151_v34  ;;  %v3541_v14 = vpop.permute.xlu1 %1570  ;;  %v1205_v34 = vsel %vm573_vm2, %v3397_v54, 0.0 }
 0x372   : > { %v1201_v60 = vpop.xlane.xlu0 %1200 }
 0x373   : > { %v1241_v43 = vadd.f32 %v1201_v60, %v1113_v13  ;;  %v3547_v30 = vpop.permute.xlu2 %1580  ;;  %v1642_v13 = vmul.f32 %v1541_v16, %v1450_v20  ;;  %v1169_v60 = vsel %vm573_vm2, %v3463_v1, 0.0  ;;  %v1057_v16 = vld [vmem:[#allocation3 + $0x18] sm:$0xff] }
 0x374   : > { %v1061_v20 = vld [vmem:[#allocation3 + $0x38] sm:$0xff] }
 0x375   : > { %1274 = vst.msk [vmem:[#allocation3 + $0xd8] sm:$0xff] %vm269_vm3, %v1241_v43  ;;  %1158 = vadd.xlane.f32.xlu1 %v1157_v42  ;;  %v1791_v43 = vld [vmem:[#allocation3] sm:$0xff]  ;;  %v1643_v42 = vmul.f32 %v3298_v21, %v1451_v23 }
 0x376   : > { %v1383_v33 = vpop.f32.mrf.mxu1  ;;  %2428 = vrcp.f32 %v1791_v43  ;;  %v1074_v43 = vld [vmem:[#allocation3 + $0xa0] sm:$0xff] }
 0x377   : > { %v1671_v35 = vadd.f32 %v1639_v26, %v1383_v33 }
 0x379   : > { %1703 = vst.msk [vmem:[#allocation4 + $0x58] sm:$0xff] %vm334_vm1, %v1671_v35  ;;  %1197 = vadd.xlane.f32.xlu2 %v1196_v10  ;;  %2258 = vmatmul.msk.bf16.gmra.mxu2 %vm573_vm2, %v3849_v3  ;;  %v3552_v12 = vpop.permute.xlu1 %1585  ;;  %v3852_v35 = vpack.c.bf16 %v3355_v7, %v3351_v48  ;;  %v1793_v10 = vld [vmem:[#allocation3 + $0x10] sm:$0xff] }
 0x37a   : > { %v1165_v47 = vpop.xlane.xlu0 %1164  ;;  %2430 = vrcp.f32 %v1793_v10 }
 0x37b   : > { %v1229_v37 = vadd.f32 %v1165_v47, %v1101_v51  ;;  %v3555_v26 = vpop.permute.xlu2 %1595  ;;  %v3853_v51 = vpack.c.bf16 %v3397_v54, %v3386_v24  ;;  %v1058_v47 = vld [vmem:[#allocation3 + $0x20] sm:$0xff]  ;;  %v3856_v24 = vld [vmem:[#allocation15_spill] sm:$0xff] }
 0x37c   : > { %v2429_v39 = vpop.eup %2428  ;;  %v1089_v54 = vmul.f32 %v3856_v24, %v1057_v16 }
 0x37d   : > { %1262 = vst.msk [vmem:[#allocation3 + $0x78] sm:$0xff] %vm269_vm3, %v1229_v37  ;;  %1203 = vadd.xlane.f32.xlu1 %v1202_v38  ;;  %v3854_v37 = vld [vmem:[#allocation33_spill] sm:$0xff] }
 0x37e   : > { %v1386_v22 = vpop.f32.mrf.mxu1  ;;  %v1090_v38 = vmul.f32 %v3854_v37, %v1058_v47 }
 0x37f   : > { %v1672_v57 = vadd.f32 %v1640_v11, %v1386_v22 }
 0x380   : > { %v2431_v59 = vpop.eup %2430 }
 0x381   : > { %1704 = vst.msk [vmem:[#allocation4 + $0x60] sm:$0xff] %vm334_vm1, %v1672_v57  ;;  %1161 = vadd.xlane.f32.xlu2 %v1160_v50  ;;  %v3562_v1 = vpop.permute.xlu1 %1600  ;;  %v1073_v50 = vld [vmem:[#allocation3 + $0x98] sm:$0xff] }
 0x382   : > { %v1210_v17 = vpop.xlane.xlu0 %1209 }
 0x383   : > { %v1244_v52 = vadd.f32 %v1210_v17, %v1116_v31  ;;  %v3564_v3 = vpop.permute.xlu2 %1610  ;;  %v1105_v31 = vmul.f32 %v3339_v62, %v1073_v50  ;;  %v1059_v17 = vld [vmem:[#allocation3 + $0x28] sm:$0xff] }
 0x385   : > { %1277 = vst.msk [vmem:[#allocation3 + $0xf0] sm:$0xff] %vm269_vm3, %v1244_v52  ;;  %1167 = vadd.xlane.f32.xlu1 %v1166_v32  ;;  %v1760_v32 = vld [vmem:[#allocation4 + $0x8] sm:$0xff] }
 0x386   : > { %v1388_v9 = vpop.f32.mrf.mxu1 }
 0x387   : > { %v1673_v5 = vadd.f32 %v1641_v19, %v1388_v9 }
 0x389   : > { %1705 = vst.msk [vmem:[#allocation4 + $0x68] sm:$0xff] %vm334_vm1, %v1673_v5  ;;  %1206 = vadd.xlane.f32.xlu2 %v1205_v34  ;;  %2259 = vmatmul.msk.bf16.gmra.mxu2 %vm573_vm2, %v1291_v44  ;;  %v3566_v21 = vpop.permute.xlu1 %1615  ;;  %v3857_v5 = vld [vmem:[#allocation34_spill] sm:$0xff] }
 0x38a   : > { %v1091_v44 = vmul.f32 %v3857_v5, %v1059_v17 }
 0x38b   : > { %v1551_v48 = vpop.permute.xlu2 %1550 }
 0x38e   : > { %v1391_v49 = vpop.f32.mrf.mxu1 }
 0x38f   : > { %v1674_v53 = vadd.f32 %v1642_v13, %v1391_v49  ;;  %v1093_v49 = vmul.f32 %v3281_v29, %v1061_v20  ;;  %v1076_v29 = vld [vmem:[#allocation3 + $0xb0] sm:$0xff] }
 0x390   : > { %v1108_v37 = vmul.f32 %v3365_v15, %v1076_v29  ;;  %v1064_v15 = vld [vmem:[#allocation3 + $0x50] sm:$0xff]  ;;  %v1067_v29 = vld [vmem:[#allocation3 + $0x68] sm:$0xff] }
 0x391   : > { %1706 = vst.msk [vmem:[#allocation4 + $0x70] sm:$0xff] %vm334_vm1, %v1674_v53  ;;  %1170 = vadd.xlane.f32.xlu2 %v1169_v60  ;;  %v3572_v7 = vpop.permute.xlu1 %1555  ;;  %v1211_v53 = vsel %vm573_vm2, %v3430_v56, 0.0  ;;  %v1452_v60 = vld [vmem:[#allocation4 + $0x80] sm:$0xff] }
 0x393   : > { %v3574_v18 = vpop.permute.xlu2 %1625 }
 0x396   : > { %v1393_v33 = vpop.f32.mrf.mxu1 }
 0x397   : > { %v1675_v8 = vadd.f32 %v1643_v42, %v1393_v33 }
 0x399   : > { %1707 = vst.msk [vmem:[#allocation4 + $0x78] sm:$0xff] %vm334_vm1, %v1675_v8  ;;  %2260 = vmatmul.msk.bf16.gmra.mxu2 %vm573_vm2, %v3852_v35  ;;  %v1644_v35 = vmul.f32 %v1551_v48, %v1452_v60 }
 0x39e   : > { %1857 = vperm.xlu1 %2296, %v2429_v39   ;;  %v1106_v39 = vmul.f32 %v3346_v36, %v1074_v43 }
 0x3a9   : > { %2261 = vmatmul.msk.bf16.gmra.mxu2 %vm573_vm2, %v3853_v51  ;;  %1867 = vperm.xlu2 %2295, %v2431_v59  }
 0x3b8   : > { %v1132_v11 = vpop.xlane.xlu1 %1131 }
 0x3b9   : > { %v1218_v22 = vadd.f32 %v1132_v11, %v1090_v38  ;;  %2262 = vmatmul.msk.bf16.gmra.mxu2 %vm573_vm2, %v3855_v41  ;;  %v1453_v38 = vld [vmem:[#allocation4 + $0x88] sm:$0xff]  ;;  %v1062_v11 = vld [vmem:[#allocation3 + $0x40] sm:$0xff] }
 0x3ba   : > { %v1645_v41 = vmul.f32 %v3572_v7, %v1453_v38  ;;  %v1094_v24 = vmul.f32 %v3291_v55, %v1062_v11 }
 0x3bb   : > { %1251 = vst.msk [vmem:[#allocation3 + $0x20] sm:$0xff] %vm269_vm3, %v1218_v22 }
 0x3bc   : > { %v1129_v57 = vpop.xlane.xlu2 %1128 }
 0x3bd   : > { %v1217_v25 = vadd.f32 %v1129_v57, %v1089_v54 }
 0x3bf   : > { %1250 = vst.msk [vmem:[#allocation3 + $0x18] sm:$0xff] %vm269_vm3, %v1217_v25 }
 0x3c0   : > { %v1177_v4 = vpop.xlane.xlu1 %1176 }
 0x3c1   : > { %v1233_v52 = vadd.f32 %v1177_v4, %v1105_v31  ;;  %v1863_v19 = vpop.permute.xlu0 %1862  ;;  %v1096_v4 = vmul.f32 %v3301_v2, %v1064_v15  ;;  %v1082_v15 = vld [vmem:[#allocation3 + $0xe0] sm:$0xff] }
 0x3c2   : > { %v2016_v58 = vmul.f32 %v1863_v19, %v1760_v32  ;;  %v1795_v9 = vld [vmem:[#allocation3 + $0x20] sm:$0xff]  ;;  %v1454_v32 = vld [vmem:[#allocation4 + $0x90] sm:$0xff]  ;;  %v1077_v19 = vld [vmem:[#allocation3 + $0xb8] sm:$0xff] }
 0x3c3   : > { %1266 = vst.msk [vmem:[#allocation3 + $0x98] sm:$0xff] %vm269_vm3, %v1233_v52  ;;  %2432 = vrcp.f32 %v1795_v9  ;;  %v1646_v5 = vmul.f32 %v3322_v27, %v1454_v32  ;;  %v1455_v27 = vld [vmem:[#allocation4 + $0x98] sm:$0xff] }
 0x3c4   : > { %v2048_v62 = vpack.c.bf16 %v2016_v58, %v2016_v58  ;;  %v1135_v34 = vpop.xlane.xlu2 %1134 }
 0x3c5   : > { %v1219_v13 = vadd.f32 %v1135_v34, %v1091_v44  ;;  %v1109_v44 = vmul.f32 %v3372_v63, %v1077_v19  ;;  %v1079_v34 = vld [vmem:[#allocation3 + $0xc8] sm:$0xff]  ;;  %v1065_v63 = vld [vmem:[#allocation3 + $0x58] sm:$0xff] }
 0x3c6   : > { %2081 = vst.msk [vmem:[%s3589_s29 + $0x4] sm:$0xf] %vm2079_vm4, %v2048_v62  ;;  %v1794_v52 = vld [vmem:[#allocation3 + $0x18] sm:$0xff] }
 0x3c7   : > { %1252 = vst.msk [vmem:[#allocation3 + $0x28] sm:$0xff] %vm269_vm3, %v1219_v13 }
 0x3c8   : > { %v1141_v23 = vpop.xlane.xlu1 %1140  ;;  %1212 = vadd.xlane.f32.xlu1 %v1211_v53  ;;  %v1111_v53 = vmul.f32 %v3381_v28, %v1079_v34  ;;  %v1097_v28 = vmul.f32 %v3306_v61, %v1065_v63  ;;  %v1080_v61 = vld [vmem:[#allocation3 + $0xd0] sm:$0xff] }
 0x3c9   : > { %v2433_v42 = vpop.eup %2432  ;;  %v1221_v33 = vadd.f32 %v1141_v23, %v1093_v49  ;;  %v1809_v23 = vld [vmem:[#allocation3 + $0x90] sm:$0xff] }
 0x3ca   : > { %1877 = vperm.xlu0 %2297, %v2433_v42   ;;  %v1810_v8 = vld [vmem:[#allocation3 + $0x98] sm:$0xff] }
 0x3cb   : > { %1254 = vst.msk [vmem:[#allocation3 + $0x38] sm:$0xff] %vm269_vm3, %v1221_v33  ;;  %2434 = vrcp.f32 %v1810_v8 }
 0x3cc   : > { %v1396_v10 = vpop.f32.mrf.mxu2  ;;  %v1180_v59 = vpop.xlane.xlu2 %1179 }
 0x3cd   : > { %v1676_v51 = vadd.f32 %v1644_v35, %v1396_v10  ;;  %v1234_v47 = vadd.f32 %v1180_v59, %v1106_v39  ;;  %v1647_v39 = vmul.f32 %v3534_v45, %v1455_v27  ;;  %v1456_v45 = vld [vmem:[#allocation4 + $0xa0] sm:$0xff] }
 0x3ce   : > { %v1796_v56 = vld [vmem:[#allocation3 + $0x28] sm:$0xff] }
 0x3cf   : > { %1708 = vst.msk [vmem:[#allocation4 + $0x80] sm:$0xff] %vm334_vm1, %v1676_v51  ;;  %2436 = vrcp.f32 %v1796_v56 }
 0x3d0   : > { %1267 = vst.msk [vmem:[#allocation3 + $0xa0] sm:$0xff] %vm269_vm3, %v1234_v47  ;;  %v1186_v48 = vpop.xlane.xlu1 %1185 }
 0x3d1   : > { %v2435_v16 = vpop.eup %2434  ;;  %v1236_v22 = vadd.f32 %v1186_v48, %v1108_v37  ;;  %v1099_v37 = vmul.f32 %v3320_v46, %v1067_v29  ;;  %v1797_v48 = vld [vmem:[#allocation3 + $0x30] sm:$0xff]  ;;  %v1112_v46 = vmul.f32 %v3384_v6, %v1080_v61 }
 0x3d2   : > { %1952 = vperm.xlu0 %2297, %v2435_v16   ;;  %v1798_v36 = vld [vmem:[#allocation3 + $0x38] sm:$0xff]  ;;  %v1068_v6 = vld [vmem:[#allocation3 + $0x70] sm:$0xff] }
 0x3d3   : > { %1269 = vst.msk [vmem:[#allocation3 + $0xb0] sm:$0xff] %vm269_vm3, %v1236_v22  ;;  %2438 = vrcp.f32 %v1798_v36  ;;  %v3861_v61 = vld [vmem:[#allocation19_spill] sm:$0xff] }
 0x3d4   : > { %v1398_v54 = vpop.f32.mrf.mxu2  ;;  %v1144_v57 = vpop.xlane.xlu2 %1143 }
 0x3d5   : > { %v2437_v50 = vpop.eup %2436  ;;  %v1677_v25 = vadd.f32 %v1645_v41, %v1398_v54  ;;  %v1222_v31 = vadd.f32 %v1144_v57, %v1094_v24  ;;  %v1648_v24 = vmul.f32 %v3541_v14, %v1456_v45  ;;  %v1457_v14 = vld [vmem:[#allocation4 + $0xa8] sm:$0xff] }
 0x3d6   : > { %1882 = vperm.xlu2 %2295, %v2437_v50  }
 0x3d7   : > { %1709 = vst.msk [vmem:[#allocation4 + $0x88] sm:$0xff] %vm334_vm1, %v1677_v25  ;;  %v1811_v17 = vld [vmem:[#allocation3 + $0xa0] sm:$0xff] }
 0x3d8   : > { %1255 = vst.msk [vmem:[#allocation3 + $0x40] sm:$0xff] %vm269_vm3, %v1222_v31  ;;  %v1150_v7 = vpop.xlane.xlu1 %1149  ;;  %2440 = vrcp.f32 %v1811_v17 }
 0x3d9   : > { %v2439_v55 = vpop.eup %2438  ;;  %v1224_v58 = vadd.f32 %v1150_v7, %v1096_v4  ;;  %2442 = vrcp.f32 %v1794_v52  ;;  %v1114_v4 = vmul.f32 %v3408_v0, %v1082_v15  ;;  %v1812_v52 = vld [vmem:[#allocation3 + $0xa8] sm:$0xff]  ;;  %v3858_v0 = vld [vmem:[#allocation7_spill] sm:$0xff] }
 0x3da   : > { %1892 = vperm.xlu0 %2297, %v2439_v55   ;;  %v1813_v9 = vld [vmem:[#allocation3 + $0xb0] sm:$0xff] }
 0x3db   : > { %1257 = vst.msk [vmem:[#allocation3 + $0x50] sm:$0xff] %vm269_vm3, %v1224_v58  ;;  %2444 = vrcp.f32 %v1813_v9  ;;  %v1649_v9 = vmul.f32 %v3344_v40, %v1457_v14  ;;  %v1458_v40 = vld [vmem:[#allocation4 + $0xb0] sm:$0xff] }
 0x3dc   : > { %v1401_v2 = vpop.f32.mrf.mxu2  ;;  %v1189_v62 = vpop.xlane.xlu2 %1188 }
 0x3dd   : > { %v1678_v20 = vadd.f32 %v1646_v5, %v1401_v2  ;;  %v1237_v13 = vadd.f32 %v1189_v62, %v1109_v44  ;;  %v1100_v5 = vmul.f32 %v3858_v0, %v1068_v6  ;;  %v1070_v62 = vld [vmem:[#allocation3 + $0x80] sm:$0xff] }
 0x3de   : > { %v2441_v49 = vpop.eup %2440 }
 0x3df   : > { %1710 = vst.msk [vmem:[#allocation4 + $0x90] sm:$0xff] %vm334_vm1, %v1678_v20  ;;  %1957 = vperm.xlu2 %2295, %v2441_v49   ;;  %v1799_v60 = vld [vmem:[#allocation3 + $0x40] sm:$0xff]  ;;  %v2443_v43 = vpop.eup %2442  ;;  %v3859_v49 = vld [vmem:[#allocation8_spill] sm:$0xff] }
 0x3e0   : > { %1270 = vst.msk [vmem:[#allocation3 + $0xb8] sm:$0xff] %vm269_vm3, %v1237_v13  ;;  %v1195_v42 = vpop.xlane.xlu1 %1194  ;;  %2446 = vrcp.f32 %v1799_v60 }
 0x3e1   : > { %v2445_v33 = vpop.eup %2444  ;;  %v1239_v8 = vadd.f32 %v1195_v42, %v1111_v53  ;;  %1872 = vperm.xlu1 %2296, %v2443_v43   ;;  %2448 = vrcp.f32 %v1809_v23  ;;  %v1102_v53 = vmul.f32 %v3859_v49, %v1070_v62  ;;  %v1800_v23 = vld [vmem:[#allocation3 + $0x48] sm:$0xff]  ;;  %v1806_v49 = vld [vmem:[#allocation3 + $0x78] sm:$0xff] }
 0x3e2   : > { %1967 = vperm.xlu0 %2297, %v2445_v33   ;;  %v1801_v35 = vld [vmem:[#allocation3 + $0x50] sm:$0xff]  ;;  %v1083_v42 = vld [vmem:[#allocation3 + $0xe8] sm:$0xff] }
 0x3e3   : > { %1272 = vst.msk [vmem:[#allocation3 + $0xc8] sm:$0xff] %vm269_vm3, %v1239_v8  ;;  %2450 = vrcp.f32 %v1801_v35  ;;  %v1650_v35 = vmul.f32 %v3547_v30, %v1458_v40  ;;  %v1071_v30 = vld [vmem:[#allocation3 + $0x88] sm:$0xff] }
 0x3e4   : > { %v1403_v10 = vpop.f32.mrf.mxu2  ;;  %v1153_v59 = vpop.xlane.xlu2 %1152 }
 0x3e5   : > { %v1679_v51 = vadd.f32 %v1647_v39, %v1403_v10  ;;  %v1225_v47 = vadd.f32 %v1153_v59, %v1097_v28  ;;  %v3860_v39 = vld [vmem:[#allocation9_spill] sm:$0xff] }
 0x3e6   : > { %v2447_v56 = vpop.eup %2446  ;;  %v1115_v28 = vmul.f32 %v3860_v39, %v1083_v42 }
 0x3e7   : > { %1711 = vst.msk [vmem:[#allocation4 + $0x98] sm:$0xff] %vm334_vm1, %v1679_v51  ;;  %1897 = vperm.xlu2 %2295, %v2447_v56   ;;  %v1814_v38 = vld [vmem:[#allocation3 + $0xb8] sm:$0xff]  ;;  %v2449_v11 = vpop.eup %2448 }
 0x3e8   : > { %1258 = vst.msk [vmem:[#allocation3 + $0x58] sm:$0xff] %vm269_vm3, %v1225_v47  ;;  %v1159_v16 = vpop.xlane.xlu1 %1158  ;;  %2452 = vrcp.f32 %v1814_v38 }
 0x3e9   : > { %v2451_v22 = vpop.eup %2450  ;;  %v1227_v36 = vadd.f32 %v1159_v16, %v1099_v37  ;;  %1947 = vperm.xlu1 %2296, %v2449_v11   ;;  %2454 = vrcp.f32 %v1797_v48  ;;  %v1815_v37 = vld [vmem:[#allocation3 + $0xc0] sm:$0xff]  ;;  %v1459_v48 = vld [vmem:[#allocation4 + $0xb8] sm:$0xff] }
 0x3ea   : > { %1907 = vperm.xlu0 %2297, %v2451_v22   ;;  %v1816_v41 = vld [vmem:[#allocation3 + $0xc8] sm:$0xff]  ;;  %v1651_v16 = vmul.f32 %v3552_v12, %v1459_v48  ;;  %v1103_v22 = vmul.f32 %v3861_v61, %v1071_v30  ;;  %v3862_v12 = vld [vmem:[#allocation16_spill] sm:$0xff] }
 0x3eb   : > { %1260 = vst.msk [vmem:[#allocation3 + $0x68] sm:$0xff] %vm269_vm3, %v1227_v36  ;;  %2456 = vrcp.f32 %v1816_v41 }
 0x3ec   : > { %v1406_v54 = vpop.f32.mrf.mxu2  ;;  %v1198_v57 = vpop.xlane.xlu2 %1197 }
 0x3ed   : > { %v1680_v50 = vadd.f32 %v1648_v24, %v1406_v54  ;;  %v1240_v25 = vadd.f32 %v1198_v57, %v1112_v46  ;;  %v1803_v57 = vld [vmem:[#allocation3 + $0x60] sm:$0xff] }
 0x3ee   : > { %v2453_v31 = vpop.eup %2452 }
 0x3ef   : > { %1712 = vst.msk [vmem:[#allocation4 + $0xa0] sm:$0xff] %vm334_vm1, %v1680_v50  ;;  %1972 = vperm.xlu2 %2295, %v2453_v31   ;;  %v1802_v17 = vld [vmem:[#allocation3 + $0x58] sm:$0xff]  ;;  %v2455_v32 = vpop.eup %2454  ;;  %v1460_v50 = vld [vmem:[#allocation4 + $0xc0] sm:$0xff] }
 0x3f0   : > { %1273 = vst.msk [vmem:[#allocation3 + $0xd0] sm:$0xff] %vm269_vm3, %v1240_v25  ;;  %v1204_v7 = vpop.xlane.xlu1 %1203  ;;  %2458 = vrcp.f32 %v1802_v17  ;;  %v1652_v31 = vmul.f32 %v3862_v12, %v1460_v50  ;;  %v1761_v17 = vld [vmem:[#allocation4 + $0x10] sm:$0xff]  ;;  %v1763_v50 = vld [vmem:[#allocation4 + $0x20] sm:$0xff] }
 0x3f1   : > { %v2457_v19 = vpop.eup %2456  ;;  %v1242_v55 = vadd.f32 %v1204_v7, %v1114_v4  ;;  %1887 = vperm.xlu1 %2296, %v2455_v32   ;;  %2460 = vrcp.f32 %v1812_v52 }
 0x3f2   : > { %1982 = vperm.xlu0 %2297, %v2457_v19   ;;  %v1804_v58 = vld [vmem:[#allocation3 + $0x68] sm:$0xff]  ;;  %v1818_v19 = vld [vmem:[#allocation3 + $0xd8] sm:$0xff] }
 0x3f3   : > { %1275 = vst.msk [vmem:[#allocation3 + $0xe0] sm:$0xff] %vm269_vm3, %v1242_v55  ;;  %2462 = vrcp.f32 %v1804_v58  ;;  %v1461_v58 = vld [vmem:[#allocation4 + $0xc8] sm:$0xff] }
 0x3f4   : > { %v1408_v44 = vpop.f32.mrf.mxu2  ;;  %v1162_v2 = vpop.xlane.xlu2 %1161 }
 0x3f5   : > { %v1681_v34 = vadd.f32 %v1649_v9, %v1408_v44  ;;  %v1228_v20 = vadd.f32 %v1162_v2, %v1100_v5  ;;  %v1759_v9 = vld [vmem:[#allocation4] sm:$0xff]  ;;  %v1653_v44 = vmul.f32 %v3555_v26, %v1461_v58 }
 0x3f6   : > { %v2459_v13 = vpop.eup %2458 }
 0x3f7   : > { %1713 = vst.msk [vmem:[#allocation4 + $0xa8] sm:$0xff] %vm334_vm1, %v1681_v34  ;;  %1912 = vperm.xlu2 %2295, %v2459_v13   ;;  %v1817_v60 = vld [vmem:[#allocation3 + $0xd0] sm:$0xff]  ;;  %v2461_v43 = vpop.eup %2460 }
 0x3f8   : > { %1261 = vst.msk [vmem:[#allocation3 + $0x70] sm:$0xff] %vm269_vm3, %v1228_v20  ;;  %v1168_v27 = vpop.xlane.xlu1 %1167  ;;  %2464 = vrcp.f32 %v1817_v60  ;;  %v1462_v60 = vld [vmem:[#allocation4 + $0xd0] sm:$0xff] }
 0x3f9   : > { %v2463_v63 = vpop.eup %2462  ;;  %v1230_v33 = vadd.f32 %v1168_v27, %v1102_v53  ;;  %1962 = vperm.xlu1 %2296, %v2461_v43   ;;  %2466 = vrcp.f32 %v1800_v23  ;;  %v1654_v23 = vmul.f32 %v3562_v1, %v1462_v60  ;;  %v1821_v27 = vld [vmem:[#allocation3 + $0xf0] sm:$0xff]  ;;  %v1464_v1 = vld [vmem:[#allocation4 + $0xe0] sm:$0xff] }
 0x3fa   : > { %1922 = vperm.xlu0 %2297, %v2463_v63   ;;  %v1819_v8 = vld [vmem:[#allocation3 + $0xe0] sm:$0xff]  ;;  %v1463_v63 = vld [vmem:[#allocation4 + $0xd8] sm:$0xff] }
 0x3fb   : > { %1263 = vst.msk [vmem:[#allocation3 + $0x80] sm:$0xff] %vm269_vm3, %v1230_v33  ;;  %2468 = vrcp.f32 %v1819_v8  ;;  %v3863_v33 = vld [vmem:[#allocation6_spill] sm:$0xff] }
 0x3fc   : > { %v1411_v10 = vpop.f32.mrf.mxu2  ;;  %v1207_v59 = vpop.xlane.xlu2 %1206  ;;  %v1655_v8 = vmul.f32 %v3863_v33, %v1463_v63 }
 0x3fd   : > { %v1682_v29 = vadd.f32 %v1650_v35, %v1411_v10  ;;  %v1243_v51 = vadd.f32 %v1207_v59, %v1115_v28  ;;  %v1656_v10 = vmul.f32 %v3564_v3, %v1464_v1  ;;  %v1466_v3 = vld [vmem:[#allocation4 + $0xf0] sm:$0xff] }
 0x3fe   : > { %v2465_v47 = vpop.eup %2464 }
 0x3ff   : > { %1714 = vst.msk [vmem:[#allocation4 + $0xb0] sm:$0xff] %vm334_vm1, %v1682_v29  ;;  %1987 = vperm.xlu2 %2295, %v2465_v47   ;;  %v1805_v56 = vld [vmem:[#allocation3 + $0x70] sm:$0xff]  ;;  %v2467_v38 = vpop.eup %2466  ;;  %v1764_v47 = vld [vmem:[#allocation4 + $0x28] sm:$0xff] }
 0x400   : > { %1276 = vst.msk [vmem:[#allocation3 + $0xe8] sm:$0xff] %vm269_vm3, %v1243_v51  ;;  %2470 = vrcp.f32 %v1805_v56  ;;  %v1465_v51 = vld [vmem:[#allocation4 + $0xe8] sm:$0xff] }
 0x401   : > { %v2469_v11 = vpop.eup %2468  ;;  %1902 = vperm.xlu1 %2296, %v2467_v38   ;;  %2472 = vrcp.f32 %v1815_v37  ;;  %v1657_v38 = vmul.f32 %v3566_v21, %v1465_v51 }
 0x402   : > { %1997 = vperm.xlu0 %2297, %v2469_v11   ;;  %v1807_v45 = vld [vmem:[#allocation3 + $0x80] sm:$0xff] }
 0x403   : > { %2474 = vrcp.f32 %v1807_v45  ;;  %v1085_v45 = vld [vmem:[#allocation3 + $0xf8] sm:$0xff] }
 0x404   : > { %v1413_v36 = vpop.f32.mrf.mxu2  ;;  %v1171_v41 = vpop.xlane.xlu2 %1170  ;;  %2476 = vrcp.f32 %v1803_v57 }
 0x405   : > { %v1683_v24 = vadd.f32 %v1651_v16, %v1413_v36  ;;  %v1231_v46 = vadd.f32 %v1171_v41, %v1103_v22  ;;  %v1779_v16 = vld [vmem:[#allocation4 + $0xa0] sm:$0xff] }
 0x406   : > { %v2471_v54 = vpop.eup %2470  ;;  %v3864_v36 = vld [vmem:[#allocation13_spill] sm:$0xff]  ;;  %v1781_v33 = vld [vmem:[#allocation4 + $0xb0] sm:$0xff] }
 0x407   : > { %1715 = vst.msk [vmem:[#allocation4 + $0xb8] sm:$0xff] %vm334_vm1, %v1683_v24  ;;  %1927 = vperm.xlu2 %2295, %v2471_v54   ;;  %v2473_v15 = vpop.eup %2472  ;;  %v1820_v20 = vld [vmem:[#allocation3 + $0xe8] sm:$0xff]  ;;  %v1117_v41 = vmul.f32 %v3864_v36, %v1085_v45  ;;  %v3865_v24 = vld [vmem:[#allocation17_spill] sm:$0xff]  ;;  %v1773_v45 = vld [vmem:[#allocation4 + $0x70] sm:$0xff] }
 0x408   : > { %1264 = vst.msk [vmem:[#allocation3 + $0x88] sm:$0xff] %vm269_vm3, %v1231_v46  ;;  %v1658_v46 = vmul.f32 %v3865_v24, %v1466_v3 }
 0x409   : > { %v2475_v25 = vpop.eup %2474  ;;  %1977 = vperm.xlu1 %2296, %v2473_v15  }
 0x40a   : > { %1937 = vperm.xlu0 %2297, %v2475_v25   ;;  %v2477_v55 = vpop.eup %2476 }
 0x40c   : > { %v1416_v4 = vpop.f32.mrf.mxu2  ;;  %v1868_v52 = vpop.permute.xlu2 %1867 }
 0x40d   : > { %v1684_v32 = vadd.f32 %v1652_v31, %v1416_v4  ;;  %v2017_v14 = vmul.f32 %v1868_v52, %v1761_v17  ;;  %v1467_v17 = vld [vmem:[#allocation4 + $0xf8] sm:$0xff]  ;;  %v1767_v52 = vld [vmem:[#allocation4 + $0x40] sm:$0xff] }
 0x40f   : > { %1716 = vst.msk [vmem:[#allocation4 + $0xc0] sm:$0xff] %vm334_vm1, %v1684_v32  ;;  %v2049_v7 = vpack.c.bf16 %v2017_v14, %v2017_v14  ;;  %v1808_v6 = vld [vmem:[#allocation3 + $0x88] sm:$0xff] }
 0x410   : > { %v1858_v0 = vpop.permute.xlu1 %1857  ;;  %2478 = vrcp.f32 %v1808_v6 }
 0x411   : > { %2082 = vst.msk [vmem:[%s3589_s29 + $0x8] sm:$0xf] %vm2079_vm4, %v2049_v7  ;;  %v2015_v5 = vmul.f32 %v1858_v0, %v1759_v9  ;;  %1917 = vperm.xlu1 %2296, %v2477_v55   ;;  %2480 = vrcp.f32 %v1818_v19  ;;  %v1659_v7 = vmul.f32 %v3574_v18, %v1467_v17  ;;  %v1778_v55 = vld [vmem:[#allocation4 + $0x98] sm:$0xff] }
 0x412   : > { %2482 = vrcp.f32 %v1820_v20  ;;  %v1766_v20 = vld [vmem:[#allocation4 + $0x38] sm:$0xff] }
 0x413   : > { %v2047_v2 = vpack.c.bf16 %v2015_v5, %v2015_v5  ;;  %2484 = vrcp.f32 %v1806_v49 }
 0x414   : > { %v1418_v62 = vpop.f32.mrf.mxu2  ;;  %2486 = vrcp.f32 %v1821_v27  ;;  %v1762_v27 = vld [vmem:[#allocation4 + $0x18] sm:$0xff] }
 0x415   : > { %2080 = vst.msk [vmem:[%s3589_s29] sm:$0xf] %vm2079_vm4, %v2047_v2  ;;  %v1685_v34 = vadd.f32 %v1653_v44, %v1418_v62  ;;  %v1782_v2 = vld [vmem:[#allocation4 + $0xb8] sm:$0xff] }
 0x416   : > { %v2479_v13 = vpop.eup %2478 }
 0x417   : > { %1717 = vst.msk [vmem:[#allocation4 + $0xc8] sm:$0xff] %vm334_vm1, %v1685_v34  ;;  %1942 = vperm.xlu2 %2295, %v2479_v13   ;;  %v2481_v53 = vpop.eup %2480 }
 0x418   : > { %v2483_v40 = vpop.eup %2482 }
 0x419   : > { %1992 = vperm.xlu1 %2296, %v2481_v53   ;;  %v2485_v42 = vpop.eup %2484 }
 0x41a   : > { %v2487_v28 = vpop.eup %2486 }
 0x41c   : > { %v1421_v43 = vpop.f32.mrf.mxu2 }
 0x41d   : > { %v1686_v26 = vadd.f32 %v1654_v23, %v1421_v43  ;;  %v1770_v23 = vld [vmem:[#allocation4 + $0x58] sm:$0xff] }
 0x41e   : > { %v1784_v24 = vld [vmem:[#allocation4 + $0xc8] sm:$0xff] }
 0x41f   : > { %1718 = vst.msk [vmem:[#allocation4 + $0xd0] sm:$0xff] %vm334_vm1, %v1686_v26  ;;  %2002 = vperm.xlu2 %2295, %v2483_v40  }
 0x421   : > { %1932 = vperm.xlu1 %2296, %v2485_v42  }
 0x424   : > { %v1423_v35 = vpop.f32.mrf.mxu2 }
 0x425   : > { %v1687_v39 = vadd.f32 %v1655_v8, %v1423_v35 }
 0x426   : > { %v1785_v1 = vld [vmem:[#allocation4 + $0xd0] sm:$0xff] }
 0x427   : > { %1719 = vst.msk [vmem:[#allocation4 + $0xd8] sm:$0xff] %vm334_vm1, %v1687_v39 }
 0x429   : > { %2007 = vperm.xlu1 %2296, %v2487_v28  }
 0x42c   : > { %v1426_v59 = vpop.f32.mrf.mxu2 }
 0x42d   : > { %v1688_v29 = vadd.f32 %v1656_v10, %v1426_v59 }
 0x42f   : > { %1720 = vst.msk [vmem:[#allocation4 + $0xe0] sm:$0xff] %vm334_vm1, %v1688_v29  ;;  %v1777_v29 = vld [vmem:[#allocation4 + $0x90] sm:$0xff] }
 0x430   : > { %v1883_v56 = vpop.permute.xlu2 %1882 }
 0x431   : > { %v2020_v37 = vmul.f32 %v1883_v56, %v1764_v47 }
 0x433   : > { %v2052_v48 = vpack.c.bf16 %v2020_v37, %v2020_v37  ;;  %v1769_v37 = vld [vmem:[#allocation4 + $0x50] sm:$0xff] }
 0x434   : > { %v1428_v30 = vpop.f32.mrf.mxu2 }
 0x435   : > { %2085 = vst.msk [vmem:[%s3589_s29 + $0x14] sm:$0xf] %vm2079_vm4, %v2052_v48  ;;  %v1689_v11 = vadd.f32 %v1657_v38, %v1428_v30 }
 0x437   : > { %1721 = vst.msk [vmem:[#allocation4 + $0xe8] sm:$0xff] %vm334_vm1, %v1689_v11 }
 0x439   : > { %v1958_v61 = vpop.permute.xlu2 %1957 }
 0x43a   : > { %v2035_v22 = vmul.f32 %v1958_v61, %v1779_v16  ;;  %v1765_v61 = vld [vmem:[#allocation4 + $0x30] sm:$0xff] }
 0x43b   : > { %v1213_v54 = vpop.xlane.xlu1 %1212 }
 0x43c   : > { %v2067_v21 = vpack.c.bf16 %v2035_v22, %v2035_v22  ;;  %v1245_v57 = vadd.f32 %v1213_v54, %v1117_v41  ;;  %v1431_v15 = vpop.f32.mrf.mxu2  ;;  %v1878_v25 = vpop.permute.xlu0 %1877 }
 0x43d   : > { %v1690_v12 = vadd.f32 %v1658_v46, %v1431_v15  ;;  %v2019_v31 = vmul.f32 %v1878_v25, %v1763_v50  ;;  %v1780_v15 = vld [vmem:[#allocation4 + $0xa8] sm:$0xff] }
 0x43e   : > { %2100 = vst.msk [vmem:[%s3589_s29 + $0x50] sm:$0xf] %vm2079_vm4, %v2067_v21 }
 0x43f   : > { %1278 = vst.msk [vmem:[#allocation3 + $0xf8] sm:$0xff] %vm269_vm3, %v1245_v57  ;;  %v2051_v4 = vpack.c.bf16 %v2019_v31, %v2019_v31 }
 0x440   : > { %1722 = vst.msk [vmem:[#allocation4 + $0xf0] sm:$0xff] %vm334_vm1, %v1690_v12  ;;  %v1772_v12 = vld [vmem:[#allocation4 + $0x68] sm:$0xff] }
 0x441   : > { %2084 = vst.msk [vmem:[%s3589_s29 + $0x10] sm:$0xf] %vm2079_vm4, %v2051_v4  ;;  %v1898_v32 = vpop.permute.xlu2 %1897 }
 0x442   : > { %v2023_v14 = vmul.f32 %v1898_v32, %v1767_v52  ;;  %v1776_v32 = vld [vmem:[#allocation4 + $0x88] sm:$0xff] }
 0x444   : > { %v2055_v6 = vpack.c.bf16 %v2023_v14, %v2023_v14  ;;  %v1433_v19 = vpop.f32.mrf.mxu2  ;;  %v1953_v58 = vpop.permute.xlu0 %1952 }
 0x445   : > { %v1691_v9 = vadd.f32 %v1659_v7, %v1433_v19  ;;  %v2034_v0 = vmul.f32 %v1953_v58, %v1778_v55 }
 0x446   : > { %2088 = vst.msk [vmem:[%s3589_s29 + $0x20] sm:$0xf] %vm2079_vm4, %v2055_v6  ;;  %v1822_v5 = vld [vmem:[#allocation3 + $0xf8] sm:$0xff]  ;;  %v1768_v6 = vld [vmem:[#allocation4 + $0x48] sm:$0xff] }
 0x447   : > { %1723 = vst.msk [vmem:[#allocation4 + $0xf8] sm:$0xff] %vm334_vm1, %v1691_v9  ;;  %v2066_v44 = vpack.c.bf16 %v2034_v0, %v2034_v0  ;;  %2488 = vrcp.f32 %v1822_v5  ;;  %v1787_v9 = vld [vmem:[#allocation4 + $0xe0] sm:$0xff] }
 0x449   : > { %2099 = vst.msk [vmem:[%s3589_s29 + $0x4c] sm:$0xf] %vm2079_vm4, %v2066_v44  ;;  %v1973_v62 = vpop.permute.xlu2 %1972 }
 0x44a   : > { %v2038_v18 = vmul.f32 %v1973_v62, %v1782_v2  ;;  %v1788_v62 = vld [vmem:[#allocation4 + $0xe8] sm:$0xff] }
 0x44c   : > { %v2070_v34 = vpack.c.bf16 %v2038_v18, %v2038_v18  ;;  %v1893_v13 = vpop.permute.xlu0 %1892 }
 0x44d   : > { %v2489_v49 = vpop.eup %2488  ;;  %v2022_v53 = vmul.f32 %v1893_v13, %v1766_v20  ;;  %v1783_v20 = vld [vmem:[#allocation4 + $0xc0] sm:$0xff] }
 0x44e   : > { %2103 = vst.msk [vmem:[%s3589_s29 + $0x5c] sm:$0xf] %vm2079_vm4, %v2070_v34  ;;  %2012 = vperm.xlu0 %2297, %v2489_v49  }
 0x44f   : > { %v2054_v60 = vpack.c.bf16 %v2022_v53, %v2022_v53 }
 0x451   : > { %2087 = vst.msk [vmem:[%s3589_s29 + $0x1c] sm:$0xf] %vm2079_vm4, %v2054_v60  ;;  %v1913_v43 = vpop.permute.xlu2 %1912  ;;  %v1775_v60 = vld [vmem:[#allocation4 + $0x80] sm:$0xff] }
 0x452   : > { %v2026_v26 = vmul.f32 %v1913_v43, %v1770_v23 }
 0x453   : > { %v1873_v40 = vpop.permute.xlu1 %1872 }
 0x454   : > { %v2058_v42 = vpack.c.bf16 %v2026_v26, %v2026_v26  ;;  %v2018_v63 = vmul.f32 %v1873_v40, %v1762_v27  ;;  %v1968_v8 = vpop.permute.xlu0 %1967  ;;  %v1771_v27 = vld [vmem:[#allocation4 + $0x60] sm:$0xff] }
 0x455   : > { %v2037_v35 = vmul.f32 %v1968_v8, %v1781_v33  ;;  %v1786_v8 = vld [vmem:[#allocation4 + $0xd8] sm:$0xff] }
 0x456   : > { %2091 = vst.msk [vmem:[%s3589_s29 + $0x2c] sm:$0xf] %vm2079_vm4, %v2058_v42  ;;  %v2050_v39 = vpack.c.bf16 %v2018_v63, %v2018_v63 }
 0x457   : > { %v2069_v28 = vpack.c.bf16 %v2037_v35, %v2037_v35 }
 0x458   : > { %2083 = vst.msk [vmem:[%s3589_s29 + $0xc] sm:$0xf] %vm2079_vm4, %v2050_v39 }
 0x459   : > { %2102 = vst.msk [vmem:[%s3589_s29 + $0x58] sm:$0xf] %vm2079_vm4, %v2069_v28  ;;  %v1988_v10 = vpop.permute.xlu2 %1987 }
 0x45a   : > { %v2041_v59 = vmul.f32 %v1988_v10, %v1785_v1  ;;  %v1774_v1 = vld [vmem:[#allocation4 + $0x78] sm:$0xff] }
 0x45b   : > { %v1948_v51 = vpop.permute.xlu1 %1947 }
 0x45c   : > { %v2073_v47 = vpack.c.bf16 %v2041_v59, %v2041_v59  ;;  %v2033_v56 = vmul.f32 %v1948_v51, %v1777_v29  ;;  %v1908_v38 = vpop.permute.xlu0 %1907  ;;  %v1789_v51 = vld [vmem:[#allocation4 + $0xf0] sm:$0xff] }
 0x45d   : > { %v2025_v48 = vmul.f32 %v1908_v38, %v1769_v37  ;;  %v1790_v38 = vld [vmem:[#allocation4 + $0xf8] sm:$0xff] }
 0x45e   : > { %2106 = vst.msk [vmem:[%s3589_s29 + $0x68] sm:$0xf] %vm2079_vm4, %v2073_v47  ;;  %v2065_v30 = vpack.c.bf16 %v2033_v56, %v2033_v56 }
 0x45f   : > { %v2057_v11 = vpack.c.bf16 %v2025_v48, %v2025_v48 }
 0x460   : > { %2098 = vst.msk [vmem:[%s3589_s29 + $0x48] sm:$0xf] %vm2079_vm4, %v2065_v30 }
 0x461   : > { %2090 = vst.msk [vmem:[%s3589_s29 + $0x28] sm:$0xf] %vm2079_vm4, %v2057_v11  ;;  %v1928_v3 = vpop.permute.xlu2 %1927 }
 0x462   : > { %v2029_v16 = vmul.f32 %v1928_v3, %v1773_v45 }
 0x463   : > { %v1888_v22 = vpop.permute.xlu1 %1887 }
 0x464   : > { %v2061_v36 = vpack.c.bf16 %v2029_v16, %v2029_v16  ;;  %v2021_v41 = vmul.f32 %v1888_v22, %v1765_v61  ;;  %v1983_v46 = vpop.permute.xlu0 %1982 }
 0x465   : > { %v2040_v54 = vmul.f32 %v1983_v46, %v1784_v24 }
 0x466   : > { %2094 = vst.msk [vmem:[%s3589_s29 + $0x38] sm:$0xf] %vm2079_vm4, %v2061_v36  ;;  %v2053_v21 = vpack.c.bf16 %v2021_v41, %v2021_v41 }
 0x467   : > { %v2072_v57 = vpack.c.bf16 %v2040_v54, %v2040_v54 }
 0x468   : > { %2086 = vst.msk [vmem:[%s3589_s29 + $0x18] sm:$0xf] %vm2079_vm4, %v2053_v21 }
 0x469   : > { %2105 = vst.msk [vmem:[%s3589_s29 + $0x64] sm:$0xf] %vm2079_vm4, %v2072_v57 }
 0x46b   : > { %v1963_v50 = vpop.permute.xlu1 %1962 }
 0x46c   : > { %v2036_v25 = vmul.f32 %v1963_v50, %v1780_v15  ;;  %v1923_v31 = vpop.permute.xlu0 %1922 }
 0x46d   : > { %v2028_v4 = vmul.f32 %v1923_v31, %v1772_v12 }
 0x46e   : > { %v2068_v17 = vpack.c.bf16 %v2036_v25, %v2036_v25 }
 0x46f   : > { %v2060_v52 = vpack.c.bf16 %v2028_v4, %v2028_v4 }
 0x470   : > { %2101 = vst.msk [vmem:[%s3589_s29 + $0x54] sm:$0xf] %vm2079_vm4, %v2068_v17 }
 0x471   : > { %2093 = vst.msk [vmem:[%s3589_s29 + $0x34] sm:$0xf] %vm2079_vm4, %v2060_v52  ;;  %v1943_v14 = vpop.permute.xlu2 %1942 }
 0x472   : > { %v2032_v7 = vmul.f32 %v1943_v14, %v1776_v32 }
 0x473   : > { %v1903_v19 = vpop.permute.xlu1 %1902 }
 0x474   : > { %v2064_v55 = vpack.c.bf16 %v2032_v7, %v2032_v7  ;;  %v2024_v58 = vmul.f32 %v1903_v19, %v1768_v6  ;;  %v1998_v0 = vpop.permute.xlu0 %1997 }
 0x475   : > { %v2043_v5 = vmul.f32 %v1998_v0, %v1787_v9 }
 0x476   : > { %2097 = vst.msk [vmem:[%s3589_s29 + $0x44] sm:$0xf] %vm2079_vm4, %v2064_v55  ;;  %v2056_v44 = vpack.c.bf16 %v2024_v58, %v2024_v58 }
 0x477   : > { %v2075_v2 = vpack.c.bf16 %v2043_v5, %v2043_v5 }
 0x478   : > { %2089 = vst.msk [vmem:[%s3589_s29 + $0x24] sm:$0xf] %vm2079_vm4, %v2056_v44 }
 0x479   : > { %2108 = vst.msk [vmem:[%s3589_s29 + $0x70] sm:$0xf] %vm2079_vm4, %v2075_v2  ;;  %v2003_v18 = vpop.permute.xlu2 %2002 }
 0x47a   : > { %v2044_v34 = vmul.f32 %v2003_v18, %v1788_v62 }
 0x47b   : > { %v1978_v13 = vpop.permute.xlu1 %1977 }
 0x47c   : > { %v2076_v49 = vpack.c.bf16 %v2044_v34, %v2044_v34  ;;  %v2039_v53 = vmul.f32 %v1978_v13, %v1783_v20  ;;  %v1938_v23 = vpop.permute.xlu0 %1937 }
 0x47d   : > { %v2031_v43 = vmul.f32 %v1938_v23, %v1775_v60 }
 0x47e   : > { %2109 = vst.msk [vmem:[%s3589_s29 + $0x74] sm:$0xf] %vm2079_vm4, %v2076_v49  ;;  %v2071_v26 = vpack.c.bf16 %v2039_v53, %v2039_v53 }
 0x47f   : > { %v2063_v40 = vpack.c.bf16 %v2031_v43, %v2031_v43 }
 0x480   : > { %2104 = vst.msk [vmem:[%s3589_s29 + $0x60] sm:$0xf] %vm2079_vm4, %v2071_v26 }
 0x481   : > { %2096 = vst.msk [vmem:[%s3589_s29 + $0x40] sm:$0xf] %vm2079_vm4, %v2063_v40 }
 0x483   : > { %v1918_v42 = vpop.permute.xlu1 %1917 }
 0x484   : > { %v2027_v63 = vmul.f32 %v1918_v42, %v1771_v27 }
 0x486   : > { %v2059_v33 = vpack.c.bf16 %v2027_v63, %v2027_v63 }
 0x488   : > { %2092 = vst.msk [vmem:[%s3589_s29 + $0x30] sm:$0xf] %vm2079_vm4, %v2059_v33 }
 0x48b   : > { %v1993_v35 = vpop.permute.xlu1 %1992 }
 0x48c   : > { %v2042_v39 = vmul.f32 %v1993_v35, %v1786_v8 }
 0x48e   : > { %v2074_v28 = vpack.c.bf16 %v2042_v39, %v2042_v39 }
 0x490   : > { %2107 = vst.msk [vmem:[%s3589_s29 + $0x6c] sm:$0xf] %vm2079_vm4, %v2074_v28 }
 0x493   : > { %v1933_v10 = vpop.permute.xlu1 %1932 }
 0x494   : > { %v2030_v59 = vmul.f32 %v1933_v10, %v1774_v1 }
 0x496   : > { %v2062_v29 = vpack.c.bf16 %v2030_v59, %v2030_v59 }
 0x498   : > { %2095 = vst.msk [vmem:[%s3589_s29 + $0x3c] sm:$0xf] %vm2079_vm4, %v2062_v29 }
 0x49b   : > { %v2008_v47 = vpop.permute.xlu1 %2007 }
 0x49c   : > { %v2045_v56 = vmul.f32 %v2008_v47, %v1789_v51 }
 0x49e   : > { %v2077_v37 = vpack.c.bf16 %v2045_v56, %v2045_v56 }
 0x4a0   : > { %2110 = vst.msk [vmem:[%s3589_s29 + $0x78] sm:$0xf] %vm2079_vm4, %v2077_v37 }
 0x4c0   : > { %v2013_v48 = vpop.permute.xlu0 %2012 }
 0x4c1   : > { %v2046_v30 = vmul.f32 %v2013_v48, %v1790_v38 }
 0x4c3   : > { %v2078_v11 = vpack.c.bf16 %v2046_v30, %v2046_v30 }
 0x4c5   : > { %2111 = vst.msk [vmem:[%s3589_s29 + $0x7c] sm:$0xf] %vm2079_vm4, %v2078_v11 }
 0x4c6 PF: > { %s13_s14 = sadd.s32 1, %s2512_s14   ;;  %s3866_s12 = smov %s2508_s13 }
 0x4c7   : > { %p10_p5 = scmp.ge.s32.totalorder %s13_s14, 4   ;;  %s3867_s13 = smov %s3869_s15 }
 0x4c9   :  { %12 = sbr.rel (!%p10_p5) target bundleno = 2 (0x2), region = 76 }

</bundles_post_ra>
